<compile_context>
chip_gen: v6e
topology: v6e:2x2x1
jax: 0.10.0
libtpu: 0.0.40
codegen_flags: <defaults>
</compile_context>

<pallas_src>
import functools
import math

import jax
import jax.numpy as jnp
import numpy as np
from jax import lax
from jax.experimental import pallas as pl
from jax.experimental.pallas import tpu as pltpu

IMAGE_SIZE = 16     # args.image_size
HIDDEN = 32         # args.hidden_size
MIN_SPEED = 0.0     # args.min_speed
MAX_SPEED = 4.0     # args.max_speed
IN_CH = 4
CONV_CH = 16


# --------------------- trace-time constant builders --------------------------

def _block_sizes(image_size, n_conv):
    sizes = []
    h = image_size
    for _ in range(n_conv):
        sizes.append(h)
        h = (h - 1) // 2 + 1
    return sizes, h


def _pool_matrix_T(H):
    """(H*H, Ho*Ho): AvgPool2d(3,3)/s2/p1, count_include_pad=True; pooled = act @ P^T."""
    Ho = (H - 1) // 2 + 1
    ph = (np.abs(np.arange(H)[:, None] - 2 * np.arange(Ho)[None, :]) <= 1).astype(np.float32)
    pT = (ph[:, None, :, None] * ph[None, :, None, :]).reshape(H * H, Ho * Ho) / 9.0
    return jnp.asarray(pT)


def _kron_conv_weights(w_hwio, tb):
    """(3,3,Cin,Cout) HWIO -> (9, tb*Cout, tb*Cin) = kron(I_tb, W_s^T) per 3x3 tap."""
    kh, kw, cin, cout = w_hwio.shape
    ws = jnp.transpose(w_hwio.reshape(kh * kw, cin, cout), (0, 2, 1))   # (9, Cout, Cin)
    eye = jnp.eye(tb, dtype=w_hwio.dtype)
    wk = jnp.einsum("ab,src->sarbc", eye, ws)                           # (9, tb, Cout, tb, Cin)
    return wk.reshape(9, tb * cout, tb * cin)


def _pick_batch_tile(n):
    """v5e/v6e (single TensorCore): one big grid step.  v7x & others: >=2 parallel steps."""
    try:
        kind = jax.devices()[0].device_kind.lower()
    except Exception:
        kind = ""
    single_tc = ("v5" in kind) or ("v6" in kind)
    tb = min(n, 8) if single_tc else min(max(-(-n // 2), 2), 8)
    if tb % 2:                      # keep tb*IN_CH divisible by 8 for the x BlockSpec
        tb += 1
    return max(tb, 2)


def pack_params(params, batch_tile):
    """Fold everything that only depends on params into kernel-ready constants (outside jit)."""
    tb = int(batch_tile)
    n_conv = len(params["conv"])
    sizes, hf = _block_sizes(IMAGE_SIZE, n_conv)
    final_hw = hf * hf
    latent = CONV_CH * final_hw

    wk = [_kron_conv_weights(w, tb) for (w, _, _) in params["conv"]]
    pT = [_pool_matrix_T(s) for s in sizes]
    bcol = jnp.stack([jnp.tile(b, tb)[:, None] for (_, b, _) in params["conv"]])   # (nb, tb*16, 1)
    alphas = jnp.stack([jnp.asarray(a, jnp.float32).reshape(()) for (_, _, a) in params["conv"]])

    # 0/1 regroup constants: (tb*Cout, hw) -> (tb, Cout*hw)  [exact in f32]
    j = np.arange(latent)
    rows = np.arange(tb * CONV_CH)
    spread = (j[None, :] % final_hw == np.arange(final_hw)[:, None]).astype(np.float32)
    mask2 = ((rows[:, None] % CONV_CH) == (j[None, :] // final_hw)).astype(np.float32)
    red = ((rows[None, :] // CONV_CH) == np.arange(tb)[:, None]).astype(np.float32)

    # combined head (rgbd_in_lin | speed_in) with speed normalisation folded into w2/b2
    scale = 1.0 / (MAX_SPEED - MIN_SPEED)
    w2_eff = params["w2"] * scale
    b2_eff = params["b2"] - (MIN_SPEED * scale) * params["w2"]
    wf = jnp.concatenate([params["w1"], jnp.zeros((latent, HIDDEN), jnp.float32)], axis=1)
    ws2 = jnp.concatenate([jnp.zeros((1, HIDDEN), jnp.float32), w2_eff], axis=1)
    bh = jnp.concatenate([params["b1"], b2_eff], axis=1)
    ah = jnp.concatenate([jnp.broadcast_to(jnp.asarray(params["a1"], jnp.float32), (1, HIDDEN)),
                          jnp.broadcast_to(jnp.asarray(params["a2"], jnp.float32), (1, HIDDEN))],
                         axis=1)

    return {
        "tb": tb, "n_conv": n_conv, "sizes": tuple(sizes), "final_hw": final_hw,
        "wk": wk, "pT": pT, "bcol": bcol, "alphas": alphas,
        "spread": jnp.asarray(spread), "mask2": jnp.asarray(mask2), "red": jnp.asarray(red),
        "wf": wf, "ws2": ws2, "bh": bh, "ah": ah,
    }


# ------------------------------ Pallas kernel --------------------------------

def _cyclic_read(v, k):
    """out[:, p] = v[:, (p + k) % n].  Wrapped lanes are always masked out by the caller."""
    n = v.shape[-1]
    k = k % n
    if k == 0:
        return v
    return jnp.concatenate([v[:, k:], v[:, :k]], axis=-1)


def _reflect_taps(x, H):
    """9 reflect-padded 3x3 tap views of x (rows, H*H); pixels row-major on the lane axis."""
    assert H & (H - 1) == 0, "spatial size must be a power of two"
    HW = x.shape[-1]
    log2h = int(math.log2(H))
    p = lax.broadcasted_iota(jnp.int32, (1, HW), 1)
    yi = lax.shift_right_logical(p, log2h)
    xi = jnp.bitwise_and(p, H - 1)
    top, bot = yi == 0, yi == H - 1
    left, right = xi == 0, xi == H - 1

    down, up = _cyclic_read(x, H), _cyclic_read(x, -H)          # neighbour below / above
    xv = {-1: jnp.where(top, down, up),                          # reflect(-1) = 1
          0: x,
          1: jnp.where(bot, up, down)}                           # reflect(H) = H-2
    taps = []
    for dy in (-1, 0, 1):
        v = xv[dy]
        r, l = _cyclic_read(v, 1), _cyclic_read(v, -1)           # neighbour right / left
        taps.append(jnp.where(left, r, l))                       # dx = -1
        taps.append(v)                                           # dx =  0
        taps.append(jnp.where(right, l, r))                      # dx = +1
    return taps                                                  # s = (dy+1)*3 + (dx+1)


def _obs_in_kernel(*refs, n_conv, sizes, tb):
    x_ref, sp_ref = refs[0], refs[1]
    wk = refs[2:2 + n_conv]
    pT = refs[2 + n_conv:2 + 2 * n_conv]
    (bcol_ref, spread_ref, mask2_ref, red_ref,
     wf_ref, ws2_ref, bh_ref, ah_ref, alpha_ref) = refs[2 + 2 * n_conv:2 + 2 * n_conv + 9]
    o_ref = refs[-1]

    x = x_ref[...] * 2.0 - 1.0                                   # fused `rgbd * 2 - 1`
    for blk in range(n_conv):
        taps = _reflect_taps(x, sizes[blk])
        acc = None
        for s in range(9):                                       # channel contraction per tap
            t = jnp.dot(wk[blk][s], taps[s], preferred_element_type=jnp.float32)
            acc = t if acc is None else acc + t
        y = acc + bcol_ref[blk]                                  # bias (per output-channel row)
        a = alpha_ref[blk]                                       # SMEM scalar
        y = jnp.where(y > 0.0, y, a * y)                         # PReLU
        x = jnp.dot(y, pT[blk][...], preferred_element_type=jnp.float32)   # AvgPool

    # (tb*Cout, hw) -> (tb, Cout*hw) lane-dense regroup via 0/1 matmuls + mask
    b = jnp.dot(x, spread_ref[...], preferred_element_type=jnp.float32)
    feat = jnp.dot(red_ref[...], b * mask2_ref[...], preferred_element_type=jnp.float32)

    # fused heads: [rgbd_in_lin | speed_in] (speed normalisation folded into ws2/bh)
    sp = sp_ref[0, :, :]                                         # (tb, 1)
    yh = (jnp.dot(feat, wf_ref[...], preferred_element_type=jnp.float32)
          + sp * ws2_ref[...] + bh_ref[...])
    o_ref[0, :, :] = jnp.where(yh > 0.0, yh, ah_ref[...] * yh)   # PReLU, single lane-dense store


# -------------------------------- wrapper ------------------------------------

def obs_in_forward(packed, rgbd, speed):
    """Matches Obs_IN.forward: rgbd (E,S,H,W,4) or (E,H,W,4); speed (E,S,1) or (E,1)."""
    if rgbd.ndim == 4:
        rgbd = rgbd[:, None]
    if speed.ndim == 2:
        speed = speed[:, None]
    E, S, H, W, C = rgbd.shape
    N = E * S
    HW = H * W
    tb = packed["tb"]
    n_pad = -(-N // tb) * tb
    num_tiles = n_pad // tb

    x = rgbd.reshape(N, H, W, C).astype(jnp.float32)
    x = jnp.transpose(x, (0, 3, 1, 2)).reshape(N, C, HW)         # NCHW, pixels on lanes
    x = jnp.pad(x, ((0, n_pad - N), (0, 0), (0, 0))).reshape(n_pad * C, HW)
    sp = speed.reshape(N, 1).astype(jnp.float32)
    sp = jnp.pad(sp, ((0, n_pad - N), (0, 0))).reshape(num_tiles, tb, 1)

    wk, pT = packed["wk"], packed["pT"]
    consts = (packed["bcol"], packed["spread"], packed["mask2"], packed["red"],
              packed["wf"], packed["ws2"], packed["bh"], packed["ah"])

    in_specs = [pl.BlockSpec((tb * C, HW), lambda i: (i, 0)),
                pl.BlockSpec((1, tb, 1), lambda i: (i, 0, 0))]
    in_specs += [pl.BlockSpec(m.shape, lambda i: (0, 0, 0)) for m in wk]
    in_specs += [pl.BlockSpec(m.shape, lambda i: (0, 0)) for m in pT]
    in_specs += [pl.BlockSpec(packed["bcol"].shape, lambda i: (0, 0, 0))]
    in_specs += [pl.BlockSpec(m.shape, lambda i: (0, 0)) for m in consts[1:]]
    in_specs += [pl.BlockSpec(memory_space=pltpu.MemorySpace.SMEM)]

    out = pl.pallas_call(
        functools.partial(_obs_in_kernel, n_conv=packed["n_conv"],
                          sizes=packed["sizes"], tb=tb),
        out_shape=jax.ShapeDtypeStruct((num_tiles, tb, 2 * HIDDEN), jnp.float32),
        grid=(num_tiles,),
        in_specs=in_specs,
        out_specs=pl.BlockSpec((1, tb, 2 * HIDDEN), lambda i: (i, 0, 0)),
        compiler_params=pltpu.CompilerParams(dimension_semantics=("parallel",)),
    )(x, sp, *wk, *pT, *consts, packed["alphas"])

    return out.reshape(n_pad, 2 * HIDDEN)[:N].reshape(E, S, 2 * HIDDEN)


# --------------------------- params & reference ------------------------------

def init_params(key):
    n_blocks = int(math.log2(IMAGE_SIZE) - 2)
    conv = []
    cin = IN_CH
    for _ in range(n_blocks + 1):
        key, k1, k2 = jax.random.split(key, 3)
        w = jax.random.normal(k1, (3, 3, cin, CONV_CH), jnp.float32) * 0.1   # HWIO
        b = jax.random.normal(k2, (CONV_CH,), jnp.float32) * 0.05
        conv.append((w, b, jnp.float32(0.25)))
        cin = CONV_CH
    sp = IMAGE_SIZE
    for _ in range(n_blocks + 1):
        sp = (sp - 1) // 2 + 1
    latent = CONV_CH * sp * sp
    key, k1, k2, k3, k4 = jax.random.split(key, 5)
    return {
        "conv": conv,
        "w1": jax.random.normal(k1, (latent, HIDDEN), jnp.float32) * 0.1,
        "b1": jax.random.normal(k2, (1, HIDDEN), jnp.float32) * 0.05,
        "a1": jnp.float32(0.25),
        "w2": jax.random.normal(k3, (1, HIDDEN), jnp.float32) * 0.1,
        "b2": jax.random.normal(k4, (1, HIDDEN), jnp.float32) * 0.05,
        "a2": jnp.float32(0.25),
    }


def reference_forward(params, rgbd, speed):
    """Pure-JAX f32 reference mirroring the PyTorch forward (ground truth)."""
    if rgbd.ndim == 4:
        rgbd = rgbd[:, None]
    if speed.ndim == 2:
        speed = speed[:, None]
    E, S, H, W, C = rgbd.shape
    x = rgbd.reshape(E * S, H, W, C).astype(jnp.float32) * 2.0 - 1.0
    for (w, b, a) in params["conv"]:
        xpad = jnp.pad(x, ((0, 0), (1, 1), (1, 1), (0, 0)), mode="reflect")
        y = lax.conv_general_dilated(
            xpad, w, window_strides=(1, 1), padding="VALID",
            dimension_numbers=("NHWC", "HWIO", "NHWC"),
            precision=lax.Precision.HIGHEST) + b
        y = jnp.where(y > 0, y, a * y)
        ys = lax.reduce_window(y, 0.0, lax.add, (1, 3, 3, 1), (1, 2, 2, 1),
                               ((0, 0), (1, 1), (1, 1), (0, 0)))
        x = ys / 9.0
    N, Ho, Wo, Co = x.shape
    feat = jnp.transpose(x, (0, 3, 1, 2)).reshape(N, Co * Ho * Wo)
    r = feat @ params["w1"] + params["b1"]
    r = jnp.where(r > 0, r, params["a1"] * r)
    s = (speed.reshape(E * S, 1) - MIN_SPEED) / (MAX_SPEED - MIN_SPEED)
    s = s @ params["w2"] + params["b2"]
    s = jnp.where(s > 0, s, params["a2"] * s)
    return jnp.concatenate([r, s], axis=-1).reshape(E, S, 2 * HIDDEN)


if __name__ == "__main__":
    key = jax.random.PRNGKey(0)
    kp, kr, ks = jax.random.split(key, 3)
    params = init_params(kp)

    E, S = 2, 3
    rgbd = jax.random.uniform(kr, (E, S, IMAGE_SIZE, IMAGE_SIZE, 4), jnp.float32)
    speed = jax.random.uniform(ks, (E, S, 1), jnp.float32) * MAX_SPEED

    packed = pack_params(params, _pick_batch_tile(E * S))
    fwd = jax.jit(functools.partial(obs_in_forward, packed))
    out = jax.block_until_ready(fwd(rgbd, speed))

    ref = reference_forward(params, rgbd, speed)
    assert out.shape == (E, S, 2 * HIDDEN), out.shape
    np.testing.assert_allclose(np.asarray(out), np.asarray(ref), rtol=2e-2, atol=2e-2)
    print("KERNEL_OK")
</pallas_src>

<mosaic_0001>
module attributes {stable_mosaic.version = 11 : i64} {
  func.func @_obs_in_kernel(%arg0: i32, %arg1: memref<16x256xf32, #tpu.memory_space<vmem>>, %arg2: memref<1x4x1xf32, #tpu.memory_space<vmem>>, %arg3: memref<9x64x16xf32, #tpu.memory_space<vmem>>, %arg4: memref<9x64x64xf32, #tpu.memory_space<vmem>>, %arg5: memref<9x64x64xf32, #tpu.memory_space<vmem>>, %arg6: memref<256x64xf32, #tpu.memory_space<vmem>>, %arg7: memref<64x16xf32, #tpu.memory_space<vmem>>, %arg8: memref<16x4xf32, #tpu.memory_space<vmem>>, %arg9: memref<3x64x1xf32, #tpu.memory_space<vmem>>, %arg10: memref<4x64xf32, #tpu.memory_space<vmem>>, %arg11: memref<64x64xf32, #tpu.memory_space<vmem>>, %arg12: memref<4x64xf32, #tpu.memory_space<vmem>>, %arg13: memref<64x64xf32, #tpu.memory_space<vmem>>, %arg14: memref<1x64xf32, #tpu.memory_space<vmem>>, %arg15: memref<1x64xf32, #tpu.memory_space<vmem>>, %arg16: memref<1x64xf32, #tpu.memory_space<vmem>>, %arg17: memref<3xf32, #tpu.memory_space<smem>>, %arg18: memref<1x4x64xf32, #tpu.memory_space<vmem>>) attributes {dimension_semantics = [#tpu.dimension_semantics<parallel>], iteration_bounds = array<i64: 2>, scalar_prefetch = 0 : i64, scratch_operands = 0 : i64, tpu.core_type = #tpu.core_type<tc>, window_params = [{transform_indices = @transform_0, window_bounds = array<i64: 16, 256>}, {transform_indices = @transform_1, window_bounds = array<i64: 1, 4, 1>}, {pipeline_mode = #tpu.pipeline_mode<synchronous>, transform_indices = @transform_2, window_bounds = array<i64: 9, 64, 16>}, {pipeline_mode = #tpu.pipeline_mode<synchronous>, transform_indices = @transform_3, window_bounds = array<i64: 9, 64, 64>}, {pipeline_mode = #tpu.pipeline_mode<synchronous>, transform_indices = @transform_4, window_bounds = array<i64: 9, 64, 64>}, {pipeline_mode = #tpu.pipeline_mode<synchronous>, transform_indices = @transform_5, window_bounds = array<i64: 256, 64>}, {pipeline_mode = #tpu.pipeline_mode<synchronous>, transform_indices = @transform_6, window_bounds = array<i64: 64, 16>}, {pipeline_mode = #tpu.pipeline_mode<synchronous>, transform_indices = @transform_7, window_bounds = array<i64: 16, 4>}, {pipeline_mode = #tpu.pipeline_mode<synchronous>, transform_indices = @transform_8, window_bounds = array<i64: 3, 64, 1>}, {pipeline_mode = #tpu.pipeline_mode<synchronous>, transform_indices = @transform_9, window_bounds = array<i64: 4, 64>}, {pipeline_mode = #tpu.pipeline_mode<synchronous>, transform_indices = @transform_10, window_bounds = array<i64: 64, 64>}, {pipeline_mode = #tpu.pipeline_mode<synchronous>, transform_indices = @transform_11, window_bounds = array<i64: 4, 64>}, {pipeline_mode = #tpu.pipeline_mode<synchronous>, transform_indices = @transform_12, window_bounds = array<i64: 64, 64>}, {pipeline_mode = #tpu.pipeline_mode<synchronous>, transform_indices = @transform_13, window_bounds = array<i64: 1, 64>}, {pipeline_mode = #tpu.pipeline_mode<synchronous>, transform_indices = @transform_14, window_bounds = array<i64: 1, 64>}, {pipeline_mode = #tpu.pipeline_mode<synchronous>, transform_indices = @transform_15, window_bounds = array<i64: 1, 64>}, {transform_indices = @transform_16, window_bounds = array<i64: 3>}, {transform_indices = @transform_17, window_bounds = array<i64: 1, 4, 64>}]} {
    %c0 = arith.constant 0 : index
    %c0_0 = arith.constant 0 : index
    %0 = vector.load %arg1[%c0, %c0_0] : memref<16x256xf32, #tpu.memory_space<vmem>>, vector<16x256xf32>
    %cst = arith.constant 2.000000e+00 : f32
    %1 = vector.broadcast %cst : f32 to vector<16x256xf32>
    %2 = arith.mulf %0, %1 : vector<16x256xf32>
    %cst_1 = arith.constant 1.000000e+00 : f32
    %3 = vector.broadcast %cst_1 : f32 to vector<16x256xf32>
    %4 = arith.subf %2, %3 : vector<16x256xf32>
    %5 = tpu.iota {dimensions = array<i32: 1>} : vector<1x256xi32>
    %c4_i32 = arith.constant 4 : i32
    %6 = vector.broadcast %c4_i32 : i32 to vector<1x256xi32>
    %7 = arith.shrui %5, %6 : vector<1x256xi32>
    %c15_i32 = arith.constant 15 : i32
    %8 = vector.broadcast %c15_i32 : i32 to vector<1x256xi32>
    %9 = arith.andi %5, %8 : vector<1x256xi32>
    %c0_i32 = arith.constant 0 : i32
    %10 = vector.broadcast %c0_i32 : i32 to vector<1x256xi32>
    %11 = arith.cmpi eq, %7, %10 : vector<1x256xi32>
    %c15_i32_2 = arith.constant 15 : i32
    %12 = vector.broadcast %c15_i32_2 : i32 to vector<1x256xi32>
    %13 = arith.cmpi eq, %7, %12 : vector<1x256xi32>
    %c0_i32_3 = arith.constant 0 : i32
    %14 = vector.broadcast %c0_i32_3 : i32 to vector<1x256xi32>
    %15 = arith.cmpi eq, %9, %14 : vector<1x256xi32>
    %c15_i32_4 = arith.constant 15 : i32
    %16 = vector.broadcast %c15_i32_4 : i32 to vector<1x256xi32>
    %17 = arith.cmpi eq, %9, %16 : vector<1x256xi32>
    %18 = vector.extract_strided_slice %4 {offsets = [0, 16], sizes = [16, 240], strides = [1, 1]} : vector<16x256xf32> to vector<16x240xf32>
    %19 = vector.extract_strided_slice %4 {offsets = [0, 0], sizes = [16, 16], strides = [1, 1]} : vector<16x256xf32> to vector<16x16xf32>
    %20 = tpu.concatenate %18, %19 in 1 : vector<16x240xf32>, vector<16x16xf32> -> vector<16x256xf32>
    %21 = vector.extract_strided_slice %4 {offsets = [0, 240], sizes = [16, 16], strides = [1, 1]} : vector<16x256xf32> to vector<16x16xf32>
    %22 = vector.extract_strided_slice %4 {offsets = [0, 0], sizes = [16, 240], strides = [1, 1]} : vector<16x256xf32> to vector<16x240xf32>
    %23 = tpu.concatenate %21, %22 in 1 : vector<16x16xf32>, vector<16x240xf32> -> vector<16x256xf32>
    %24 = vector.shape_cast %11 : vector<1x256xi1> to vector<1x256xi1>
    %25 = vector.broadcast %24 : vector<1x256xi1> to vector<16x256xi1>
    %26 = arith.select %25, %20, %23 : vector<16x256xi1>, vector<16x256xf32>
    %27 = vector.shape_cast %13 : vector<1x256xi1> to vector<1x256xi1>
    %28 = vector.broadcast %27 : vector<1x256xi1> to vector<16x256xi1>
    %29 = arith.select %28, %23, %20 : vector<16x256xi1>, vector<16x256xf32>
    %30 = vector.extract_strided_slice %26 {offsets = [0, 1], sizes = [16, 255], strides = [1, 1]} : vector<16x256xf32> to vector<16x255xf32>
    %31 = vector.extract_strided_slice %26 {offsets = [0, 0], sizes = [16, 1], strides = [1, 1]} : vector<16x256xf32> to vector<16x1xf32>
    %32 = tpu.concatenate %30, %31 in 1 : vector<16x255xf32>, vector<16x1xf32> -> vector<16x256xf32>
    %33 = vector.extract_strided_slice %26 {offsets = [0, 255], sizes = [16, 1], strides = [1, 1]} : vector<16x256xf32> to vector<16x1xf32>
    %34 = vector.extract_strided_slice %26 {offsets = [0, 0], sizes = [16, 255], strides = [1, 1]} : vector<16x256xf32> to vector<16x255xf32>
    %35 = tpu.concatenate %33, %34 in 1 : vector<16x1xf32>, vector<16x255xf32> -> vector<16x256xf32>
    %36 = vector.shape_cast %15 : vector<1x256xi1> to vector<1x256xi1>
    %37 = vector.broadcast %36 : vector<1x256xi1> to vector<16x256xi1>
    %38 = arith.select %37, %32, %35 : vector<16x256xi1>, vector<16x256xf32>
    %39 = vector.shape_cast %17 : vector<1x256xi1> to vector<1x256xi1>
    %40 = vector.broadcast %39 : vector<1x256xi1> to vector<16x256xi1>
    %41 = arith.select %40, %35, %32 : vector<16x256xi1>, vector<16x256xf32>
    %42 = vector.extract_strided_slice %4 {offsets = [0, 1], sizes = [16, 255], strides = [1, 1]} : vector<16x256xf32> to vector<16x255xf32>
    %43 = vector.extract_strided_slice %4 {offsets = [0, 0], sizes = [16, 1], strides = [1, 1]} : vector<16x256xf32> to vector<16x1xf32>
    %44 = tpu.concatenate %42, %43 in 1 : vector<16x255xf32>, vector<16x1xf32> -> vector<16x256xf32>
    %45 = vector.extract_strided_slice %4 {offsets = [0, 255], sizes = [16, 1], strides = [1, 1]} : vector<16x256xf32> to vector<16x1xf32>
    %46 = vector.extract_strided_slice %4 {offsets = [0, 0], sizes = [16, 255], strides = [1, 1]} : vector<16x256xf32> to vector<16x255xf32>
    %47 = tpu.concatenate %45, %46 in 1 : vector<16x1xf32>, vector<16x255xf32> -> vector<16x256xf32>
    %48 = vector.shape_cast %15 : vector<1x256xi1> to vector<1x256xi1>
    %49 = vector.broadcast %48 : vector<1x256xi1> to vector<16x256xi1>
    %50 = arith.select %49, %44, %47 : vector<16x256xi1>, vector<16x256xf32>
    %51 = vector.shape_cast %17 : vector<1x256xi1> to vector<1x256xi1>
    %52 = vector.broadcast %51 : vector<1x256xi1> to vector<16x256xi1>
    %53 = arith.select %52, %47, %44 : vector<16x256xi1>, vector<16x256xf32>
    %54 = vector.extract_strided_slice %29 {offsets = [0, 1], sizes = [16, 255], strides = [1, 1]} : vector<16x256xf32> to vector<16x255xf32>
    %55 = vector.extract_strided_slice %29 {offsets = [0, 0], sizes = [16, 1], strides = [1, 1]} : vector<16x256xf32> to vector<16x1xf32>
    %56 = tpu.concatenate %54, %55 in 1 : vector<16x255xf32>, vector<16x1xf32> -> vector<16x256xf32>
    %57 = vector.extract_strided_slice %29 {offsets = [0, 255], sizes = [16, 1], strides = [1, 1]} : vector<16x256xf32> to vector<16x1xf32>
    %58 = vector.extract_strided_slice %29 {offsets = [0, 0], sizes = [16, 255], strides = [1, 1]} : vector<16x256xf32> to vector<16x255xf32>
    %59 = tpu.concatenate %57, %58 in 1 : vector<16x1xf32>, vector<16x255xf32> -> vector<16x256xf32>
    %60 = vector.shape_cast %15 : vector<1x256xi1> to vector<1x256xi1>
    %61 = vector.broadcast %60 : vector<1x256xi1> to vector<16x256xi1>
    %62 = arith.select %61, %56, %59 : vector<16x256xi1>, vector<16x256xf32>
    %63 = vector.shape_cast %17 : vector<1x256xi1> to vector<1x256xi1>
    %64 = vector.broadcast %63 : vector<1x256xi1> to vector<16x256xi1>
    %65 = arith.select %64, %59, %56 : vector<16x256xi1>, vector<16x256xf32>
    %c0_5 = arith.constant 0 : index
    %c0_6 = arith.constant 0 : index
    %c0_7 = arith.constant 0 : index
    %66 = vector.load %arg3[%c0_5, %c0_6, %c0_7] : memref<9x64x16xf32, #tpu.memory_space<vmem>>, vector<1x64x16xf32>
    %67 = vector.shape_cast %66 : vector<1x64x16xf32> to vector<64x16xf32>
    %cst_8 = arith.constant dense<0.000000e+00> : vector<64x256xf32>
    %68 = tpu.matmul %67, %38, %cst_8 {dimension_numbers = #tpu.dot_dimension_numbers<[1], [0], [0], [1], [0, 0, 1, 1], [], []>} : vector<64x16xf32>, vector<16x256xf32>, vector<64x256xf32> -> vector<64x256xf32>
    %c1 = arith.constant 1 : index
    %c0_9 = arith.constant 0 : index
    %c0_10 = arith.constant 0 : index
    %69 = vector.load %arg3[%c1, %c0_9, %c0_10] : memref<9x64x16xf32, #tpu.memory_space<vmem>>, vector<1x64x16xf32>
    %70 = vector.shape_cast %69 : vector<1x64x16xf32> to vector<64x16xf32>
    %cst_11 = arith.constant dense<0.000000e+00> : vector<64x256xf32>
    %71 = tpu.matmul %70, %26, %cst_11 {dimension_numbers = #tpu.dot_dimension_numbers<[1], [0], [0], [1], [0, 0, 1, 1], [], []>} : vector<64x16xf32>, vector<16x256xf32>, vector<64x256xf32> -> vector<64x256xf32>
    %72 = arith.addf %68, %71 : vector<64x256xf32>
    %c2 = arith.constant 2 : index
    %c0_12 = arith.constant 0 : index
    %c0_13 = arith.constant 0 : index
    %73 = vector.load %arg3[%c2, %c0_12, %c0_13] : memref<9x64x16xf32, #tpu.memory_space<vmem>>, vector<1x64x16xf32>
    %74 = vector.shape_cast %73 : vector<1x64x16xf32> to vector<64x16xf32>
    %cst_14 = arith.constant dense<0.000000e+00> : vector<64x256xf32>
    %75 = tpu.matmul %74, %41, %cst_14 {dimension_numbers = #tpu.dot_dimension_numbers<[1], [0], [0], [1], [0, 0, 1, 1], [], []>} : vector<64x16xf32>, vector<16x256xf32>, vector<64x256xf32> -> vector<64x256xf32>
    %76 = arith.addf %72, %75 : vector<64x256xf32>
    %c3 = arith.constant 3 : index
    %c0_15 = arith.constant 0 : index
    %c0_16 = arith.constant 0 : index
    %77 = vector.load %arg3[%c3, %c0_15, %c0_16] : memref<9x64x16xf32, #tpu.memory_space<vmem>>, vector<1x64x16xf32>
    %78 = vector.shape_cast %77 : vector<1x64x16xf32> to vector<64x16xf32>
    %cst_17 = arith.constant dense<0.000000e+00> : vector<64x256xf32>
    %79 = tpu.matmul %78, %50, %cst_17 {dimension_numbers = #tpu.dot_dimension_numbers<[1], [0], [0], [1], [0, 0, 1, 1], [], []>} : vector<64x16xf32>, vector<16x256xf32>, vector<64x256xf32> -> vector<64x256xf32>
    %80 = arith.addf %76, %79 : vector<64x256xf32>
    %c4 = arith.constant 4 : index
    %c0_18 = arith.constant 0 : index
    %c0_19 = arith.constant 0 : index
    %81 = vector.load %arg3[%c4, %c0_18, %c0_19] : memref<9x64x16xf32, #tpu.memory_space<vmem>>, vector<1x64x16xf32>
    %82 = vector.shape_cast %81 : vector<1x64x16xf32> to vector<64x16xf32>
    %cst_20 = arith.constant dense<0.000000e+00> : vector<64x256xf32>
    %83 = tpu.matmul %82, %4, %cst_20 {dimension_numbers = #tpu.dot_dimension_numbers<[1], [0], [0], [1], [0, 0, 1, 1], [], []>} : vector<64x16xf32>, vector<16x256xf32>, vector<64x256xf32> -> vector<64x256xf32>
    %84 = arith.addf %80, %83 : vector<64x256xf32>
    %c5 = arith.constant 5 : index
    %c0_21 = arith.constant 0 : index
    %c0_22 = arith.constant 0 : index
    %85 = vector.load %arg3[%c5, %c0_21, %c0_22] : memref<9x64x16xf32, #tpu.memory_space<vmem>>, vector<1x64x16xf32>
    %86 = vector.shape_cast %85 : vector<1x64x16xf32> to vector<64x16xf32>
    %cst_23 = arith.constant dense<0.000000e+00> : vector<64x256xf32>
    %87 = tpu.matmul %86, %53, %cst_23 {dimension_numbers = #tpu.dot_dimension_numbers<[1], [0], [0], [1], [0, 0, 1, 1], [], []>} : vector<64x16xf32>, vector<16x256xf32>, vector<64x256xf32> -> vector<64x256xf32>
    %88 = arith.addf %84, %87 : vector<64x256xf32>
    %c6 = arith.constant 6 : index
    %c0_24 = arith.constant 0 : index
    %c0_25 = arith.constant 0 : index
    %89 = vector.load %arg3[%c6, %c0_24, %c0_25] : memref<9x64x16xf32, #tpu.memory_space<vmem>>, vector<1x64x16xf32>
    %90 = vector.shape_cast %89 : vector<1x64x16xf32> to vector<64x16xf32>
    %cst_26 = arith.constant dense<0.000000e+00> : vector<64x256xf32>
    %91 = tpu.matmul %90, %62, %cst_26 {dimension_numbers = #tpu.dot_dimension_numbers<[1], [0], [0], [1], [0, 0, 1, 1], [], []>} : vector<64x16xf32>, vector<16x256xf32>, vector<64x256xf32> -> vector<64x256xf32>
    %92 = arith.addf %88, %91 : vector<64x256xf32>
    %c7 = arith.constant 7 : index
    %c0_27 = arith.constant 0 : index
    %c0_28 = arith.constant 0 : index
    %93 = vector.load %arg3[%c7, %c0_27, %c0_28] : memref<9x64x16xf32, #tpu.memory_space<vmem>>, vector<1x64x16xf32>
    %94 = vector.shape_cast %93 : vector<1x64x16xf32> to vector<64x16xf32>
    %cst_29 = arith.constant dense<0.000000e+00> : vector<64x256xf32>
    %95 = tpu.matmul %94, %29, %cst_29 {dimension_numbers = #tpu.dot_dimension_numbers<[1], [0], [0], [1], [0, 0, 1, 1], [], []>} : vector<64x16xf32>, vector<16x256xf32>, vector<64x256xf32> -> vector<64x256xf32>
    %96 = arith.addf %92, %95 : vector<64x256xf32>
    %c8 = arith.constant 8 : index
    %c0_30 = arith.constant 0 : index
    %c0_31 = arith.constant 0 : index
    %97 = vector.load %arg3[%c8, %c0_30, %c0_31] : memref<9x64x16xf32, #tpu.memory_space<vmem>>, vector<1x64x16xf32>
    %98 = vector.shape_cast %97 : vector<1x64x16xf32> to vector<64x16xf32>
    %cst_32 = arith.constant dense<0.000000e+00> : vector<64x256xf32>
    %99 = tpu.matmul %98, %65, %cst_32 {dimension_numbers = #tpu.dot_dimension_numbers<[1], [0], [0], [1], [0, 0, 1, 1], [], []>} : vector<64x16xf32>, vector<16x256xf32>, vector<64x256xf32> -> vector<64x256xf32>
    %100 = arith.addf %96, %99 : vector<64x256xf32>
    %c0_33 = arith.constant 0 : index
    %c0_34 = arith.constant 0 : index
    %c0_35 = arith.constant 0 : index
    %101 = vector.load %arg9[%c0_33, %c0_34, %c0_35] : memref<3x64x1xf32, #tpu.memory_space<vmem>>, vector<1x64x1xf32>
    %102 = vector.shape_cast %101 : vector<1x64x1xf32> to vector<64x1xf32>
    %103 = vector.broadcast %102 : vector<64x1xf32> to vector<64x256xf32>
    %104 = arith.addf %100, %103 : vector<64x256xf32>
    %c0_36 = arith.constant 0 : index
    %105 = memref.load %arg17[%c0_36] : memref<3xf32, #tpu.memory_space<smem>>
    %cst_37 = arith.constant 0.000000e+00 : f32
    %106 = vector.broadcast %cst_37 : f32 to vector<64x256xf32>
    %107 = arith.cmpf ogt, %104, %106 : vector<64x256xf32>
    %108 = vector.broadcast %105 : f32 to vector<64x256xf32>
    %109 = arith.mulf %108, %104 : vector<64x256xf32>
    %110 = arith.select %107, %104, %109 : vector<64x256xi1>, vector<64x256xf32>
    %c0_38 = arith.constant 0 : index
    %c0_39 = arith.constant 0 : index
    %111 = vector.load %arg6[%c0_38, %c0_39] : memref<256x64xf32, #tpu.memory_space<vmem>>, vector<256x64xf32>
    %cst_40 = arith.constant dense<0.000000e+00> : vector<64x64xf32>
    %112 = tpu.matmul %110, %111, %cst_40 {dimension_numbers = #tpu.dot_dimension_numbers<[1], [0], [0], [1], [0, 0, 1, 1], [], []>} : vector<64x256xf32>, vector<256x64xf32>, vector<64x64xf32> -> vector<64x64xf32>
    %113 = tpu.iota {dimensions = array<i32: 1>} : vector<1x64xi32>
    %c3_i32 = arith.constant 3 : i32
    %114 = vector.broadcast %c3_i32 : i32 to vector<1x64xi32>
    %115 = arith.shrui %113, %114 : vector<1x64xi32>
    %c7_i32 = arith.constant 7 : i32
    %116 = vector.broadcast %c7_i32 : i32 to vector<1x64xi32>
    %117 = arith.andi %113, %116 : vector<1x64xi32>
    %c0_i32_41 = arith.constant 0 : i32
    %118 = vector.broadcast %c0_i32_41 : i32 to vector<1x64xi32>
    %119 = arith.cmpi eq, %115, %118 : vector<1x64xi32>
    %c7_i32_42 = arith.constant 7 : i32
    %120 = vector.broadcast %c7_i32_42 : i32 to vector<1x64xi32>
    %121 = arith.cmpi eq, %115, %120 : vector<1x64xi32>
    %c0_i32_43 = arith.constant 0 : i32
    %122 = vector.broadcast %c0_i32_43 : i32 to vector<1x64xi32>
    %123 = arith.cmpi eq, %117, %122 : vector<1x64xi32>
    %c7_i32_44 = arith.constant 7 : i32
    %124 = vector.broadcast %c7_i32_44 : i32 to vector<1x64xi32>
    %125 = arith.cmpi eq, %117, %124 : vector<1x64xi32>
    %126 = vector.extract_strided_slice %112 {offsets = [0, 8], sizes = [64, 56], strides = [1, 1]} : vector<64x64xf32> to vector<64x56xf32>
    %127 = vector.extract_strided_slice %112 {offsets = [0, 0], sizes = [64, 8], strides = [1, 1]} : vector<64x64xf32> to vector<64x8xf32>
    %128 = tpu.concatenate %126, %127 in 1 : vector<64x56xf32>, vector<64x8xf32> -> vector<64x64xf32>
    %129 = vector.extract_strided_slice %112 {offsets = [0, 56], sizes = [64, 8], strides = [1, 1]} : vector<64x64xf32> to vector<64x8xf32>
    %130 = vector.extract_strided_slice %112 {offsets = [0, 0], sizes = [64, 56], strides = [1, 1]} : vector<64x64xf32> to vector<64x56xf32>
    %131 = tpu.concatenate %129, %130 in 1 : vector<64x8xf32>, vector<64x56xf32> -> vector<64x64xf32>
    %132 = vector.shape_cast %119 : vector<1x64xi1> to vector<1x64xi1>
    %133 = vector.broadcast %132 : vector<1x64xi1> to vector<64x64xi1>
    %134 = arith.select %133, %128, %131 : vector<64x64xi1>, vector<64x64xf32>
    %135 = vector.shape_cast %121 : vector<1x64xi1> to vector<1x64xi1>
    %136 = vector.broadcast %135 : vector<1x64xi1> to vector<64x64xi1>
    %137 = arith.select %136, %131, %128 : vector<64x64xi1>, vector<64x64xf32>
    %138 = vector.extract_strided_slice %134 {offsets = [0, 1], sizes = [64, 63], strides = [1, 1]} : vector<64x64xf32> to vector<64x63xf32>
    %139 = vector.extract_strided_slice %134 {offsets = [0, 0], sizes = [64, 1], strides = [1, 1]} : vector<64x64xf32> to vector<64x1xf32>
    %140 = tpu.concatenate %138, %139 in 1 : vector<64x63xf32>, vector<64x1xf32> -> vector<64x64xf32>
    %141 = vector.extract_strided_slice %134 {offsets = [0, 63], sizes = [64, 1], strides = [1, 1]} : vector<64x64xf32> to vector<64x1xf32>
    %142 = vector.extract_strided_slice %134 {offsets = [0, 0], sizes = [64, 63], strides = [1, 1]} : vector<64x64xf32> to vector<64x63xf32>
    %143 = tpu.concatenate %141, %142 in 1 : vector<64x1xf32>, vector<64x63xf32> -> vector<64x64xf32>
    %144 = vector.shape_cast %123 : vector<1x64xi1> to vector<1x64xi1>
    %145 = vector.broadcast %144 : vector<1x64xi1> to vector<64x64xi1>
    %146 = arith.select %145, %140, %143 : vector<64x64xi1>, vector<64x64xf32>
    %147 = vector.shape_cast %125 : vector<1x64xi1> to vector<1x64xi1>
    %148 = vector.broadcast %147 : vector<1x64xi1> to vector<64x64xi1>
    %149 = arith.select %148, %143, %140 : vector<64x64xi1>, vector<64x64xf32>
    %150 = vector.extract_strided_slice %112 {offsets = [0, 1], sizes = [64, 63], strides = [1, 1]} : vector<64x64xf32> to vector<64x63xf32>
    %151 = vector.extract_strided_slice %112 {offsets = [0, 0], sizes = [64, 1], strides = [1, 1]} : vector<64x64xf32> to vector<64x1xf32>
    %152 = tpu.concatenate %150, %151 in 1 : vector<64x63xf32>, vector<64x1xf32> -> vector<64x64xf32>
    %153 = vector.extract_strided_slice %112 {offsets = [0, 63], sizes = [64, 1], strides = [1, 1]} : vector<64x64xf32> to vector<64x1xf32>
    %154 = vector.extract_strided_slice %112 {offsets = [0, 0], sizes = [64, 63], strides = [1, 1]} : vector<64x64xf32> to vector<64x63xf32>
    %155 = tpu.concatenate %153, %154 in 1 : vector<64x1xf32>, vector<64x63xf32> -> vector<64x64xf32>
    %156 = vector.shape_cast %123 : vector<1x64xi1> to vector<1x64xi1>
    %157 = vector.broadcast %156 : vector<1x64xi1> to vector<64x64xi1>
    %158 = arith.select %157, %152, %155 : vector<64x64xi1>, vector<64x64xf32>
    %159 = vector.shape_cast %125 : vector<1x64xi1> to vector<1x64xi1>
    %160 = vector.broadcast %159 : vector<1x64xi1> to vector<64x64xi1>
    %161 = arith.select %160, %155, %152 : vector<64x64xi1>, vector<64x64xf32>
    %162 = vector.extract_strided_slice %137 {offsets = [0, 1], sizes = [64, 63], strides = [1, 1]} : vector<64x64xf32> to vector<64x63xf32>
    %163 = vector.extract_strided_slice %137 {offsets = [0, 0], sizes = [64, 1], strides = [1, 1]} : vector<64x64xf32> to vector<64x1xf32>
    %164 = tpu.concatenate %162, %163 in 1 : vector<64x63xf32>, vector<64x1xf32> -> vector<64x64xf32>
    %165 = vector.extract_strided_slice %137 {offsets = [0, 63], sizes = [64, 1], strides = [1, 1]} : vector<64x64xf32> to vector<64x1xf32>
    %166 = vector.extract_strided_slice %137 {offsets = [0, 0], sizes = [64, 63], strides = [1, 1]} : vector<64x64xf32> to vector<64x63xf32>
    %167 = tpu.concatenate %165, %166 in 1 : vector<64x1xf32>, vector<64x63xf32> -> vector<64x64xf32>
    %168 = vector.shape_cast %123 : vector<1x64xi1> to vector<1x64xi1>
    %169 = vector.broadcast %168 : vector<1x64xi1> to vector<64x64xi1>
    %170 = arith.select %169, %164, %167 : vector<64x64xi1>, vector<64x64xf32>
    %171 = vector.shape_cast %125 : vector<1x64xi1> to vector<1x64xi1>
    %172 = vector.broadcast %171 : vector<1x64xi1> to vector<64x64xi1>
    %173 = arith.select %172, %167, %164 : vector<64x64xi1>, vector<64x64xf32>
    %c0_45 = arith.constant 0 : index
    %c0_46 = arith.constant 0 : index
    %c0_47 = arith.constant 0 : index
    %174 = vector.load %arg4[%c0_45, %c0_46, %c0_47] : memref<9x64x64xf32, #tpu.memory_space<vmem>>, vector<1x64x64xf32>
    %175 = vector.shape_cast %174 : vector<1x64x64xf32> to vector<64x64xf32>
    %cst_48 = arith.constant dense<0.000000e+00> : vector<64x64xf32>
    %176 = tpu.matmul %175, %146, %cst_48 {dimension_numbers = #tpu.dot_dimension_numbers<[1], [0], [0], [1], [0, 0, 1, 1], [], []>} : vector<64x64xf32>, vector<64x64xf32>, vector<64x64xf32> -> vector<64x64xf32>
    %c1_49 = arith.constant 1 : index
    %c0_50 = arith.constant 0 : index
    %c0_51 = arith.constant 0 : index
    %177 = vector.load %arg4[%c1_49, %c0_50, %c0_51] : memref<9x64x64xf32, #tpu.memory_space<vmem>>, vector<1x64x64xf32>
    %178 = vector.shape_cast %177 : vector<1x64x64xf32> to vector<64x64xf32>
    %cst_52 = arith.constant dense<0.000000e+00> : vector<64x64xf32>
    %179 = tpu.matmul %178, %134, %cst_52 {dimension_numbers = #tpu.dot_dimension_numbers<[1], [0], [0], [1], [0, 0, 1, 1], [], []>} : vector<64x64xf32>, vector<64x64xf32>, vector<64x64xf32> -> vector<64x64xf32>
    %180 = arith.addf %176, %179 : vector<64x64xf32>
    %c2_53 = arith.constant 2 : index
    %c0_54 = arith.constant 0 : index
    %c0_55 = arith.constant 0 : index
    %181 = vector.load %arg4[%c2_53, %c0_54, %c0_55] : memref<9x64x64xf32, #tpu.memory_space<vmem>>, vector<1x64x64xf32>
    %182 = vector.shape_cast %181 : vector<1x64x64xf32> to vector<64x64xf32>
    %cst_56 = arith.constant dense<0.000000e+00> : vector<64x64xf32>
    %183 = tpu.matmul %182, %149, %cst_56 {dimension_numbers = #tpu.dot_dimension_numbers<[1], [0], [0], [1], [0, 0, 1, 1], [], []>} : vector<64x64xf32>, vector<64x64xf32>, vector<64x64xf32> -> vector<64x64xf32>
    %184 = arith.addf %180, %183 : vector<64x64xf32>
    %c3_57 = arith.constant 3 : index
    %c0_58 = arith.constant 0 : index
    %c0_59 = arith.constant 0 : index
    %185 = vector.load %arg4[%c3_57, %c0_58, %c0_59] : memref<9x64x64xf32, #tpu.memory_space<vmem>>, vector<1x64x64xf32>
    %186 = vector.shape_cast %185 : vector<1x64x64xf32> to vector<64x64xf32>
    %cst_60 = arith.constant dense<0.000000e+00> : vector<64x64xf32>
    %187 = tpu.matmul %186, %158, %cst_60 {dimension_numbers = #tpu.dot_dimension_numbers<[1], [0], [0], [1], [0, 0, 1, 1], [], []>} : vector<64x64xf32>, vector<64x64xf32>, vector<64x64xf32> -> vector<64x64xf32>
    %188 = arith.addf %184, %187 : vector<64x64xf32>
    %c4_61 = arith.constant 4 : index
    %c0_62 = arith.constant 0 : index
    %c0_63 = arith.constant 0 : index
    %189 = vector.load %arg4[%c4_61, %c0_62, %c0_63] : memref<9x64x64xf32, #tpu.memory_space<vmem>>, vector<1x64x64xf32>
    %190 = vector.shape_cast %189 : vector<1x64x64xf32> to vector<64x64xf32>
    %cst_64 = arith.constant dense<0.000000e+00> : vector<64x64xf32>
    %191 = tpu.matmul %190, %112, %cst_64 {dimension_numbers = #tpu.dot_dimension_numbers<[1], [0], [0], [1], [0, 0, 1, 1], [], []>} : vector<64x64xf32>, vector<64x64xf32>, vector<64x64xf32> -> vector<64x64xf32>
    %192 = arith.addf %188, %191 : vector<64x64xf32>
    %c5_65 = arith.constant 5 : index
    %c0_66 = arith.constant 0 : index
    %c0_67 = arith.constant 0 : index
    %193 = vector.load %arg4[%c5_65, %c0_66, %c0_67] : memref<9x64x64xf32, #tpu.memory_space<vmem>>, vector<1x64x64xf32>
    %194 = vector.shape_cast %193 : vector<1x64x64xf32> to vector<64x64xf32>
    %cst_68 = arith.constant dense<0.000000e+00> : vector<64x64xf32>
    %195 = tpu.matmul %194, %161, %cst_68 {dimension_numbers = #tpu.dot_dimension_numbers<[1], [0], [0], [1], [0, 0, 1, 1], [], []>} : vector<64x64xf32>, vector<64x64xf32>, vector<64x64xf32> -> vector<64x64xf32>
    %196 = arith.addf %192, %195 : vector<64x64xf32>
    %c6_69 = arith.constant 6 : index
    %c0_70 = arith.constant 0 : index
    %c0_71 = arith.constant 0 : index
    %197 = vector.load %arg4[%c6_69, %c0_70, %c0_71] : memref<9x64x64xf32, #tpu.memory_space<vmem>>, vector<1x64x64xf32>
    %198 = vector.shape_cast %197 : vector<1x64x64xf32> to vector<64x64xf32>
    %cst_72 = arith.constant dense<0.000000e+00> : vector<64x64xf32>
    %199 = tpu.matmul %198, %170, %cst_72 {dimension_numbers = #tpu.dot_dimension_numbers<[1], [0], [0], [1], [0, 0, 1, 1], [], []>} : vector<64x64xf32>, vector<64x64xf32>, vector<64x64xf32> -> vector<64x64xf32>
    %200 = arith.addf %196, %199 : vector<64x64xf32>
    %c7_73 = arith.constant 7 : index
    %c0_74 = arith.constant 0 : index
    %c0_75 = arith.constant 0 : index
    %201 = vector.load %arg4[%c7_73, %c0_74, %c0_75] : memref<9x64x64xf32, #tpu.memory_space<vmem>>, vector<1x64x64xf32>
    %202 = vector.shape_cast %201 : vector<1x64x64xf32> to vector<64x64xf32>
    %cst_76 = arith.constant dense<0.000000e+00> : vector<64x64xf32>
    %203 = tpu.matmul %202, %137, %cst_76 {dimension_numbers = #tpu.dot_dimension_numbers<[1], [0], [0], [1], [0, 0, 1, 1], [], []>} : vector<64x64xf32>, vector<64x64xf32>, vector<64x64xf32> -> vector<64x64xf32>
    %204 = arith.addf %200, %203 : vector<64x64xf32>
    %c8_77 = arith.constant 8 : index
    %c0_78 = arith.constant 0 : index
    %c0_79 = arith.constant 0 : index
    %205 = vector.load %arg4[%c8_77, %c0_78, %c0_79] : memref<9x64x64xf32, #tpu.memory_space<vmem>>, vector<1x64x64xf32>
    %206 = vector.shape_cast %205 : vector<1x64x64xf32> to vector<64x64xf32>
    %cst_80 = arith.constant dense<0.000000e+00> : vector<64x64xf32>
    %207 = tpu.matmul %206, %173, %cst_80 {dimension_numbers = #tpu.dot_dimension_numbers<[1], [0], [0], [1], [0, 0, 1, 1], [], []>} : vector<64x64xf32>, vector<64x64xf32>, vector<64x64xf32> -> vector<64x64xf32>
    %208 = arith.addf %204, %207 : vector<64x64xf32>
    %c1_81 = arith.constant 1 : index
    %c0_82 = arith.constant 0 : index
    %c0_83 = arith.constant 0 : index
    %209 = vector.load %arg9[%c1_81, %c0_82, %c0_83] : memref<3x64x1xf32, #tpu.memory_space<vmem>>, vector<1x64x1xf32>
    %210 = vector.shape_cast %209 : vector<1x64x1xf32> to vector<64x1xf32>
    %211 = vector.broadcast %210 : vector<64x1xf32> to vector<64x64xf32>
    %212 = arith.addf %208, %211 : vector<64x64xf32>
    %c1_84 = arith.constant 1 : index
    %213 = memref.load %arg17[%c1_84] : memref<3xf32, #tpu.memory_space<smem>>
    %cst_85 = arith.constant 0.000000e+00 : f32
    %214 = vector.broadcast %cst_85 : f32 to vector<64x64xf32>
    %215 = arith.cmpf ogt, %212, %214 : vector<64x64xf32>
    %216 = vector.broadcast %213 : f32 to vector<64x64xf32>
    %217 = arith.mulf %216, %212 : vector<64x64xf32>
    %218 = arith.select %215, %212, %217 : vector<64x64xi1>, vector<64x64xf32>
    %c0_86 = arith.constant 0 : index
    %c0_87 = arith.constant 0 : index
    %219 = vector.load %arg7[%c0_86, %c0_87] : memref<64x16xf32, #tpu.memory_space<vmem>>, vector<64x16xf32>
    %cst_88 = arith.constant dense<0.000000e+00> : vector<64x16xf32>
    %220 = tpu.matmul %218, %219, %cst_88 {dimension_numbers = #tpu.dot_dimension_numbers<[1], [0], [0], [1], [0, 0, 1, 1], [], []>} : vector<64x64xf32>, vector<64x16xf32>, vector<64x16xf32> -> vector<64x16xf32>
    %221 = tpu.iota {dimensions = array<i32: 1>} : vector<1x16xi32>
    %c2_i32 = arith.constant 2 : i32
    %222 = vector.broadcast %c2_i32 : i32 to vector<1x16xi32>
    %223 = arith.shrui %221, %222 : vector<1x16xi32>
    %c3_i32_89 = arith.constant 3 : i32
    %224 = vector.broadcast %c3_i32_89 : i32 to vector<1x16xi32>
    %225 = arith.andi %221, %224 : vector<1x16xi32>
    %c0_i32_90 = arith.constant 0 : i32
    %226 = vector.broadcast %c0_i32_90 : i32 to vector<1x16xi32>
    %227 = arith.cmpi eq, %223, %226 : vector<1x16xi32>
    %c3_i32_91 = arith.constant 3 : i32
    %228 = vector.broadcast %c3_i32_91 : i32 to vector<1x16xi32>
    %229 = arith.cmpi eq, %223, %228 : vector<1x16xi32>
    %c0_i32_92 = arith.constant 0 : i32
    %230 = vector.broadcast %c0_i32_92 : i32 to vector<1x16xi32>
    %231 = arith.cmpi eq, %225, %230 : vector<1x16xi32>
    %c3_i32_93 = arith.constant 3 : i32
    %232 = vector.broadcast %c3_i32_93 : i32 to vector<1x16xi32>
    %233 = arith.cmpi eq, %225, %232 : vector<1x16xi32>
    %234 = vector.extract_strided_slice %220 {offsets = [0, 4], sizes = [64, 12], strides = [1, 1]} : vector<64x16xf32> to vector<64x12xf32>
    %235 = vector.extract_strided_slice %220 {offsets = [0, 0], sizes = [64, 4], strides = [1, 1]} : vector<64x16xf32> to vector<64x4xf32>
    %236 = tpu.concatenate %234, %235 in 1 : vector<64x12xf32>, vector<64x4xf32> -> vector<64x16xf32>
    %237 = vector.extract_strided_slice %220 {offsets = [0, 12], sizes = [64, 4], strides = [1, 1]} : vector<64x16xf32> to vector<64x4xf32>
    %238 = vector.extract_strided_slice %220 {offsets = [0, 0], sizes = [64, 12], strides = [1, 1]} : vector<64x16xf32> to vector<64x12xf32>
    %239 = tpu.concatenate %237, %238 in 1 : vector<64x4xf32>, vector<64x12xf32> -> vector<64x16xf32>
    %240 = vector.shape_cast %227 : vector<1x16xi1> to vector<1x16xi1>
    %241 = vector.broadcast %240 : vector<1x16xi1> to vector<64x16xi1>
    %242 = arith.select %241, %236, %239 : vector<64x16xi1>, vector<64x16xf32>
    %243 = vector.shape_cast %229 : vector<1x16xi1> to vector<1x16xi1>
    %244 = vector.broadcast %243 : vector<1x16xi1> to vector<64x16xi1>
    %245 = arith.select %244, %239, %236 : vector<64x16xi1>, vector<64x16xf32>
    %246 = vector.extract_strided_slice %242 {offsets = [0, 1], sizes = [64, 15], strides = [1, 1]} : vector<64x16xf32> to vector<64x15xf32>
    %247 = vector.extract_strided_slice %242 {offsets = [0, 0], sizes = [64, 1], strides = [1, 1]} : vector<64x16xf32> to vector<64x1xf32>
    %248 = tpu.concatenate %246, %247 in 1 : vector<64x15xf32>, vector<64x1xf32> -> vector<64x16xf32>
    %249 = vector.extract_strided_slice %242 {offsets = [0, 15], sizes = [64, 1], strides = [1, 1]} : vector<64x16xf32> to vector<64x1xf32>
    %250 = vector.extract_strided_slice %242 {offsets = [0, 0], sizes = [64, 15], strides = [1, 1]} : vector<64x16xf32> to vector<64x15xf32>
    %251 = tpu.concatenate %249, %250 in 1 : vector<64x1xf32>, vector<64x15xf32> -> vector<64x16xf32>
    %252 = vector.shape_cast %231 : vector<1x16xi1> to vector<1x16xi1>
    %253 = vector.broadcast %252 : vector<1x16xi1> to vector<64x16xi1>
    %254 = arith.select %253, %248, %251 : vector<64x16xi1>, vector<64x16xf32>
    %255 = vector.shape_cast %233 : vector<1x16xi1> to vector<1x16xi1>
    %256 = vector.broadcast %255 : vector<1x16xi1> to vector<64x16xi1>
    %257 = arith.select %256, %251, %248 : vector<64x16xi1>, vector<64x16xf32>
    %258 = vector.extract_strided_slice %220 {offsets = [0, 1], sizes = [64, 15], strides = [1, 1]} : vector<64x16xf32> to vector<64x15xf32>
    %259 = vector.extract_strided_slice %220 {offsets = [0, 0], sizes = [64, 1], strides = [1, 1]} : vector<64x16xf32> to vector<64x1xf32>
    %260 = tpu.concatenate %258, %259 in 1 : vector<64x15xf32>, vector<64x1xf32> -> vector<64x16xf32>
    %261 = vector.extract_strided_slice %220 {offsets = [0, 15], sizes = [64, 1], strides = [1, 1]} : vector<64x16xf32> to vector<64x1xf32>
    %262 = vector.extract_strided_slice %220 {offsets = [0, 0], sizes = [64, 15], strides = [1, 1]} : vector<64x16xf32> to vector<64x15xf32>
    %263 = tpu.concatenate %261, %262 in 1 : vector<64x1xf32>, vector<64x15xf32> -> vector<64x16xf32>
    %264 = vector.shape_cast %231 : vector<1x16xi1> to vector<1x16xi1>
    %265 = vector.broadcast %264 : vector<1x16xi1> to vector<64x16xi1>
    %266 = arith.select %265, %260, %263 : vector<64x16xi1>, vector<64x16xf32>
    %267 = vector.shape_cast %233 : vector<1x16xi1> to vector<1x16xi1>
    %268 = vector.broadcast %267 : vector<1x16xi1> to vector<64x16xi1>
    %269 = arith.select %268, %263, %260 : vector<64x16xi1>, vector<64x16xf32>
    %270 = vector.extract_strided_slice %245 {offsets = [0, 1], sizes = [64, 15], strides = [1, 1]} : vector<64x16xf32> to vector<64x15xf32>
    %271 = vector.extract_strided_slice %245 {offsets = [0, 0], sizes = [64, 1], strides = [1, 1]} : vector<64x16xf32> to vector<64x1xf32>
    %272 = tpu.concatenate %270, %271 in 1 : vector<64x15xf32>, vector<64x1xf32> -> vector<64x16xf32>
    %273 = vector.extract_strided_slice %245 {offsets = [0, 15], sizes = [64, 1], strides = [1, 1]} : vector<64x16xf32> to vector<64x1xf32>
    %274 = vector.extract_strided_slice %245 {offsets = [0, 0], sizes = [64, 15], strides = [1, 1]} : vector<64x16xf32> to vector<64x15xf32>
    %275 = tpu.concatenate %273, %274 in 1 : vector<64x1xf32>, vector<64x15xf32> -> vector<64x16xf32>
    %276 = vector.shape_cast %231 : vector<1x16xi1> to vector<1x16xi1>
    %277 = vector.broadcast %276 : vector<1x16xi1> to vector<64x16xi1>
    %278 = arith.select %277, %272, %275 : vector<64x16xi1>, vector<64x16xf32>
    %279 = vector.shape_cast %233 : vector<1x16xi1> to vector<1x16xi1>
    %280 = vector.broadcast %279 : vector<1x16xi1> to vector<64x16xi1>
    %281 = arith.select %280, %275, %272 : vector<64x16xi1>, vector<64x16xf32>
    %c0_94 = arith.constant 0 : index
    %c0_95 = arith.constant 0 : index
    %c0_96 = arith.constant 0 : index
    %282 = vector.load %arg5[%c0_94, %c0_95, %c0_96] : memref<9x64x64xf32, #tpu.memory_space<vmem>>, vector<1x64x64xf32>
    %283 = vector.shape_cast %282 : vector<1x64x64xf32> to vector<64x64xf32>
    %cst_97 = arith.constant dense<0.000000e+00> : vector<64x16xf32>
    %284 = tpu.matmul %283, %254, %cst_97 {dimension_numbers = #tpu.dot_dimension_numbers<[1], [0], [0], [1], [0, 0, 1, 1], [], []>} : vector<64x64xf32>, vector<64x16xf32>, vector<64x16xf32> -> vector<64x16xf32>
    %c1_98 = arith.constant 1 : index
    %c0_99 = arith.constant 0 : index
    %c0_100 = arith.constant 0 : index
    %285 = vector.load %arg5[%c1_98, %c0_99, %c0_100] : memref<9x64x64xf32, #tpu.memory_space<vmem>>, vector<1x64x64xf32>
    %286 = vector.shape_cast %285 : vector<1x64x64xf32> to vector<64x64xf32>
    %cst_101 = arith.constant dense<0.000000e+00> : vector<64x16xf32>
    %287 = tpu.matmul %286, %242, %cst_101 {dimension_numbers = #tpu.dot_dimension_numbers<[1], [0], [0], [1], [0, 0, 1, 1], [], []>} : vector<64x64xf32>, vector<64x16xf32>, vector<64x16xf32> -> vector<64x16xf32>
    %288 = arith.addf %284, %287 : vector<64x16xf32>
    %c2_102 = arith.constant 2 : index
    %c0_103 = arith.constant 0 : index
    %c0_104 = arith.constant 0 : index
    %289 = vector.load %arg5[%c2_102, %c0_103, %c0_104] : memref<9x64x64xf32, #tpu.memory_space<vmem>>, vector<1x64x64xf32>
    %290 = vector.shape_cast %289 : vector<1x64x64xf32> to vector<64x64xf32>
    %cst_105 = arith.constant dense<0.000000e+00> : vector<64x16xf32>
    %291 = tpu.matmul %290, %257, %cst_105 {dimension_numbers = #tpu.dot_dimension_numbers<[1], [0], [0], [1], [0, 0, 1, 1], [], []>} : vector<64x64xf32>, vector<64x16xf32>, vector<64x16xf32> -> vector<64x16xf32>
    %292 = arith.addf %288, %291 : vector<64x16xf32>
    %c3_106 = arith.constant 3 : index
    %c0_107 = arith.constant 0 : index
    %c0_108 = arith.constant 0 : index
    %293 = vector.load %arg5[%c3_106, %c0_107, %c0_108] : memref<9x64x64xf32, #tpu.memory_space<vmem>>, vector<1x64x64xf32>
    %294 = vector.shape_cast %293 : vector<1x64x64xf32> to vector<64x64xf32>
    %cst_109 = arith.constant dense<0.000000e+00> : vector<64x16xf32>
    %295 = tpu.matmul %294, %266, %cst_109 {dimension_numbers = #tpu.dot_dimension_numbers<[1], [0], [0], [1], [0, 0, 1, 1], [], []>} : vector<64x64xf32>, vector<64x16xf32>, vector<64x16xf32> -> vector<64x16xf32>
    %296 = arith.addf %292, %295 : vector<64x16xf32>
    %c4_110 = arith.constant 4 : index
    %c0_111 = arith.constant 0 : index
    %c0_112 = arith.constant 0 : index
    %297 = vector.load %arg5[%c4_110, %c0_111, %c0_112] : memref<9x64x64xf32, #tpu.memory_space<vmem>>, vector<1x64x64xf32>
    %298 = vector.shape_cast %297 : vector<1x64x64xf32> to vector<64x64xf32>
    %cst_113 = arith.constant dense<0.000000e+00> : vector<64x16xf32>
    %299 = tpu.matmul %298, %220, %cst_113 {dimension_numbers = #tpu.dot_dimension_numbers<[1], [0], [0], [1], [0, 0, 1, 1], [], []>} : vector<64x64xf32>, vector<64x16xf32>, vector<64x16xf32> -> vector<64x16xf32>
    %300 = arith.addf %296, %299 : vector<64x16xf32>
    %c5_114 = arith.constant 5 : index
    %c0_115 = arith.constant 0 : index
    %c0_116 = arith.constant 0 : index
    %301 = vector.load %arg5[%c5_114, %c0_115, %c0_116] : memref<9x64x64xf32, #tpu.memory_space<vmem>>, vector<1x64x64xf32>
    %302 = vector.shape_cast %301 : vector<1x64x64xf32> to vector<64x64xf32>
    %cst_117 = arith.constant dense<0.000000e+00> : vector<64x16xf32>
    %303 = tpu.matmul %302, %269, %cst_117 {dimension_numbers = #tpu.dot_dimension_numbers<[1], [0], [0], [1], [0, 0, 1, 1], [], []>} : vector<64x64xf32>, vector<64x16xf32>, vector<64x16xf32> -> vector<64x16xf32>
    %304 = arith.addf %300, %303 : vector<64x16xf32>
    %c6_118 = arith.constant 6 : index
    %c0_119 = arith.constant 0 : index
    %c0_120 = arith.constant 0 : index
    %305 = vector.load %arg5[%c6_118, %c0_119, %c0_120] : memref<9x64x64xf32, #tpu.memory_space<vmem>>, vector<1x64x64xf32>
    %306 = vector.shape_cast %305 : vector<1x64x64xf32> to vector<64x64xf32>
    %cst_121 = arith.constant dense<0.000000e+00> : vector<64x16xf32>
    %307 = tpu.matmul %306, %278, %cst_121 {dimension_numbers = #tpu.dot_dimension_numbers<[1], [0], [0], [1], [0, 0, 1, 1], [], []>} : vector<64x64xf32>, vector<64x16xf32>, vector<64x16xf32> -> vector<64x16xf32>
    %308 = arith.addf %304, %307 : vector<64x16xf32>
    %c7_122 = arith.constant 7 : index
    %c0_123 = arith.constant 0 : index
    %c0_124 = arith.constant 0 : index
    %309 = vector.load %arg5[%c7_122, %c0_123, %c0_124] : memref<9x64x64xf32, #tpu.memory_space<vmem>>, vector<1x64x64xf32>
    %310 = vector.shape_cast %309 : vector<1x64x64xf32> to vector<64x64xf32>
    %cst_125 = arith.constant dense<0.000000e+00> : vector<64x16xf32>
    %311 = tpu.matmul %310, %245, %cst_125 {dimension_numbers = #tpu.dot_dimension_numbers<[1], [0], [0], [1], [0, 0, 1, 1], [], []>} : vector<64x64xf32>, vector<64x16xf32>, vector<64x16xf32> -> vector<64x16xf32>
    %312 = arith.addf %308, %311 : vector<64x16xf32>
    %c8_126 = arith.constant 8 : index
    %c0_127 = arith.constant 0 : index
    %c0_128 = arith.constant 0 : index
    %313 = vector.load %arg5[%c8_126, %c0_127, %c0_128] : memref<9x64x64xf32, #tpu.memory_space<vmem>>, vector<1x64x64xf32>
    %314 = vector.shape_cast %313 : vector<1x64x64xf32> to vector<64x64xf32>
    %cst_129 = arith.constant dense<0.000000e+00> : vector<64x16xf32>
    %315 = tpu.matmul %314, %281, %cst_129 {dimension_numbers = #tpu.dot_dimension_numbers<[1], [0], [0], [1], [0, 0, 1, 1], [], []>} : vector<64x64xf32>, vector<64x16xf32>, vector<64x16xf32> -> vector<64x16xf32>
    %316 = arith.addf %312, %315 : vector<64x16xf32>
    %c2_130 = arith.constant 2 : index
    %c0_131 = arith.constant 0 : index
    %c0_132 = arith.constant 0 : index
    %317 = vector.load %arg9[%c2_130, %c0_131, %c0_132] : memref<3x64x1xf32, #tpu.memory_space<vmem>>, vector<1x64x1xf32>
    %318 = vector.shape_cast %317 : vector<1x64x1xf32> to vector<64x1xf32>
    %319 = vector.broadcast %318 : vector<64x1xf32> to vector<64x16xf32>
    %320 = arith.addf %316, %319 : vector<64x16xf32>
    %c2_133 = arith.constant 2 : index
    %321 = memref.load %arg17[%c2_133] : memref<3xf32, #tpu.memory_space<smem>>
    %cst_134 = arith.constant 0.000000e+00 : f32
    %322 = vector.broadcast %cst_134 : f32 to vector<64x16xf32>
    %323 = arith.cmpf ogt, %320, %322 : vector<64x16xf32>
    %324 = vector.broadcast %321 : f32 to vector<64x16xf32>
    %325 = arith.mulf %324, %320 : vector<64x16xf32>
    %326 = arith.select %323, %320, %325 : vector<64x16xi1>, vector<64x16xf32>
    %c0_135 = arith.constant 0 : index
    %c0_136 = arith.constant 0 : index
    %327 = vector.load %arg8[%c0_135, %c0_136] : memref<16x4xf32, #tpu.memory_space<vmem>>, vector<16x4xf32>
    %cst_137 = arith.constant dense<0.000000e+00> : vector<64x4xf32>
    %328 = tpu.matmul %326, %327, %cst_137 {dimension_numbers = #tpu.dot_dimension_numbers<[1], [0], [0], [1], [0, 0, 1, 1], [], []>} : vector<64x16xf32>, vector<16x4xf32>, vector<64x4xf32> -> vector<64x4xf32>
    %c0_138 = arith.constant 0 : index
    %c0_139 = arith.constant 0 : index
    %329 = vector.load %arg10[%c0_138, %c0_139] : memref<4x64xf32, #tpu.memory_space<vmem>>, vector<4x64xf32>
    %cst_140 = arith.constant dense<0.000000e+00> : vector<64x64xf32>
    %330 = tpu.matmul %328, %329, %cst_140 {dimension_numbers = #tpu.dot_dimension_numbers<[1], [0], [0], [1], [0, 0, 1, 1], [], []>} : vector<64x4xf32>, vector<4x64xf32>, vector<64x64xf32> -> vector<64x64xf32>
    %c0_141 = arith.constant 0 : index
    %c0_142 = arith.constant 0 : index
    %331 = vector.load %arg12[%c0_141, %c0_142] : memref<4x64xf32, #tpu.memory_space<vmem>>, vector<4x64xf32>
    %c0_143 = arith.constant 0 : index
    %c0_144 = arith.constant 0 : index
    %332 = vector.load %arg11[%c0_143, %c0_144] : memref<64x64xf32, #tpu.memory_space<vmem>>, vector<64x64xf32>
    %333 = arith.mulf %330, %332 : vector<64x64xf32>
    %cst_145 = arith.constant dense<0.000000e+00> : vector<4x64xf32>
    %334 = tpu.matmul %331, %333, %cst_145 {dimension_numbers = #tpu.dot_dimension_numbers<[1], [0], [0], [1], [0, 0, 1, 1], [], []>} : vector<4x64xf32>, vector<64x64xf32>, vector<4x64xf32> -> vector<4x64xf32>
    %c0_146 = arith.constant 0 : index
    %c0_147 = arith.constant 0 : index
    %c0_148 = arith.constant 0 : index
    %335 = vector.load %arg2[%c0_146, %c0_147, %c0_148] : memref<1x4x1xf32, #tpu.memory_space<vmem>>, vector<1x4x1xf32>
    %336 = vector.shape_cast %335 : vector<1x4x1xf32> to vector<4x1xf32>
    %c0_149 = arith.constant 0 : index
    %c0_150 = arith.constant 0 : index
    %337 = vector.load %arg13[%c0_149, %c0_150] : memref<64x64xf32, #tpu.memory_space<vmem>>, vector<64x64xf32>
    %cst_151 = arith.constant dense<0.000000e+00> : vector<4x64xf32>
    %338 = tpu.matmul %334, %337, %cst_151 {dimension_numbers = #tpu.dot_dimension_numbers<[1], [0], [0], [1], [0, 0, 1, 1], [], []>} : vector<4x64xf32>, vector<64x64xf32>, vector<4x64xf32> -> vector<4x64xf32>
    %c0_152 = arith.constant 0 : index
    %c0_153 = arith.constant 0 : index
    %339 = vector.load %arg14[%c0_152, %c0_153] : memref<1x64xf32, #tpu.memory_space<vmem>>, vector<1x64xf32>
    %340 = vector.broadcast %336 : vector<4x1xf32> to vector<4x64xf32>
    %341 = vector.broadcast %339 : vector<1x64xf32> to vector<4x64xf32>
    %342 = arith.mulf %340, %341 : vector<4x64xf32>
    %343 = arith.addf %338, %342 : vector<4x64xf32>
    %c0_154 = arith.constant 0 : index
    %c0_155 = arith.constant 0 : index
    %344 = vector.load %arg15[%c0_154, %c0_155] : memref<1x64xf32, #tpu.memory_space<vmem>>, vector<1x64xf32>
    %345 = vector.broadcast %344 : vector<1x64xf32> to vector<4x64xf32>
    %346 = arith.addf %343, %345 : vector<4x64xf32>
    %cst_156 = arith.constant 0.000000e+00 : f32
    %347 = vector.broadcast %cst_156 : f32 to vector<4x64xf32>
    %348 = arith.cmpf ogt, %346, %347 : vector<4x64xf32>
    %c0_157 = arith.constant 0 : index
    %c0_158 = arith.constant 0 : index
    %349 = vector.load %arg16[%c0_157, %c0_158] : memref<1x64xf32, #tpu.memory_space<vmem>>, vector<1x64xf32>
    %350 = vector.broadcast %349 : vector<1x64xf32> to vector<4x64xf32>
    %351 = arith.mulf %350, %346 : vector<4x64xf32>
    %352 = arith.select %348, %346, %351 : vector<4x64xi1>, vector<4x64xf32>
    %c0_159 = arith.constant 0 : index
    %c0_160 = arith.constant 0 : index
    %c0_161 = arith.constant 0 : index
    %353 = vector.load %arg18[%c0_159, %c0_160, %c0_161] : memref<1x4x64xf32, #tpu.memory_space<vmem>>, vector<1x4x64xf32>
    %354 = vector.shape_cast %353 : vector<1x4x64xf32> to vector<4x64xf32>
    %355 = vector.shape_cast %352 : vector<4x64xf32> to vector<1x4x64xf32>
    tpu.vector_store %arg18[%c0_159, %c0_160, %c0_161], %355 {strides = array<i32>} : memref<1x4x64xf32, #tpu.memory_space<vmem>>, vector<1x4x64xf32>,
    return
  }
  func.func @transform_0(%arg0: i32) -> (i32, i32) {
    %c0_i32 = arith.constant 0 : i32
    %c0_i32_0 = arith.constant 0 : i32
    return %arg0, %c0_i32 : i32, i32
  }
  func.func @transform_1(%arg0: i32) -> (i32, i32, i32) {
    %c0_i32 = arith.constant 0 : i32
    %c0_i32_0 = arith.constant 0 : i32
    %c0_i32_1 = arith.constant 0 : i32
    return %arg0, %c0_i32, %c0_i32_0 : i32, i32, i32
  }
  func.func @transform_2(%arg0: i32) -> (i32, i32, i32) {
    %c0_i32 = arith.constant 0 : i32
    %c0_i32_0 = arith.constant 0 : i32
    %c0_i32_1 = arith.constant 0 : i32
    %c0_i32_2 = arith.constant 0 : i32
    return %c0_i32, %c0_i32_0, %c0_i32_1 : i32, i32, i32
  }
  func.func @transform_3(%arg0: i32) -> (i32, i32, i32) {
    %c0_i32 = arith.constant 0 : i32
    %c0_i32_0 = arith.constant 0 : i32
    %c0_i32_1 = arith.constant 0 : i32
    %c0_i32_2 = arith.constant 0 : i32
    return %c0_i32, %c0_i32_0, %c0_i32_1 : i32, i32, i32
  }
  func.func @transform_4(%arg0: i32) -> (i32, i32, i32) {
    %c0_i32 = arith.constant 0 : i32
    %c0_i32_0 = arith.constant 0 : i32
    %c0_i32_1 = arith.constant 0 : i32
    %c0_i32_2 = arith.constant 0 : i32
    return %c0_i32, %c0_i32_0, %c0_i32_1 : i32, i32, i32
  }
  func.func @transform_5(%arg0: i32) -> (i32, i32) {
    %c0_i32 = arith.constant 0 : i32
    %c0_i32_0 = arith.constant 0 : i32
    %c0_i32_1 = arith.constant 0 : i32
    return %c0_i32, %c0_i32_0 : i32, i32
  }
  func.func @transform_6(%arg0: i32) -> (i32, i32) {
    %c0_i32 = arith.constant 0 : i32
    %c0_i32_0 = arith.constant 0 : i32
    %c0_i32_1 = arith.constant 0 : i32
    return %c0_i32, %c0_i32_0 : i32, i32
  }
  func.func @transform_7(%arg0: i32) -> (i32, i32) {
    %c0_i32 = arith.constant 0 : i32
    %c0_i32_0 = arith.constant 0 : i32
    %c0_i32_1 = arith.constant 0 : i32
    return %c0_i32, %c0_i32_0 : i32, i32
  }
  func.func @transform_8(%arg0: i32) -> (i32, i32, i32) {
    %c0_i32 = arith.constant 0 : i32
    %c0_i32_0 = arith.constant 0 : i32
    %c0_i32_1 = arith.constant 0 : i32
    %c0_i32_2 = arith.constant 0 : i32
    return %c0_i32, %c0_i32_0, %c0_i32_1 : i32, i32, i32
  }
  func.func @transform_9(%arg0: i32) -> (i32, i32) {
    %c0_i32 = arith.constant 0 : i32
    %c0_i32_0 = arith.constant 0 : i32
    %c0_i32_1 = arith.constant 0 : i32
    return %c0_i32, %c0_i32_0 : i32, i32
  }
  func.func @transform_10(%arg0: i32) -> (i32, i32) {
    %c0_i32 = arith.constant 0 : i32
    %c0_i32_0 = arith.constant 0 : i32
    %c0_i32_1 = arith.constant 0 : i32
    return %c0_i32, %c0_i32_0 : i32, i32
  }
  func.func @transform_11(%arg0: i32) -> (i32, i32) {
    %c0_i32 = arith.constant 0 : i32
    %c0_i32_0 = arith.constant 0 : i32
    %c0_i32_1 = arith.constant 0 : i32
    return %c0_i32, %c0_i32_0 : i32, i32
  }
  func.func @transform_12(%arg0: i32) -> (i32, i32) {
    %c0_i32 = arith.constant 0 : i32
    %c0_i32_0 = arith.constant 0 : i32
    %c0_i32_1 = arith.constant 0 : i32
    return %c0_i32, %c0_i32_0 : i32, i32
  }
  func.func @transform_13(%arg0: i32) -> (i32, i32) {
    %c0_i32 = arith.constant 0 : i32
    %c0_i32_0 = arith.constant 0 : i32
    %c0_i32_1 = arith.constant 0 : i32
    return %c0_i32, %c0_i32_0 : i32, i32
  }
  func.func @transform_14(%arg0: i32) -> (i32, i32) {
    %c0_i32 = arith.constant 0 : i32
    %c0_i32_0 = arith.constant 0 : i32
    %c0_i32_1 = arith.constant 0 : i32
    return %c0_i32, %c0_i32_0 : i32, i32
  }
  func.func @transform_15(%arg0: i32) -> (i32, i32) {
    %c0_i32 = arith.constant 0 : i32
    %c0_i32_0 = arith.constant 0 : i32
    %c0_i32_1 = arith.constant 0 : i32
    return %c0_i32, %c0_i32_0 : i32, i32
  }
  func.func @transform_16(%arg0: i32) -> i32 {
    %c0_i32 = arith.constant 0 : i32
    %c0_i32_0 = arith.constant 0 : i32
    return %c0_i32 : i32
  }
  func.func @transform_17(%arg0: i32) -> (i32, i32, i32) {
    %c0_i32 = arith.constant 0 : i32
    %c0_i32_0 = arith.constant 0 : i32
    %c0_i32_1 = arith.constant 0 : i32
    return %arg0, %c0_i32, %c0_i32_0 : i32, i32, i32
  }
}

</mosaic_0001>

<bundles_post_ra>
// kernel: obs_in_forward.1
= control target key start
LH: loop header
LB: loop body
LE: loop exit
PB: predicated region body
PF: predicated region fallthrough
CT: control target
= control target key end

     0   :  { %s12345_s0 = inlined_call_operand.vmem [shape: f32[32,256], index: 0, kind: input, shape index: {}]   ;;  %s12346_s1 = inlined_call_operand.vmem [shape: f32[2,4,1], index: 1, kind: input, shape index: {}]   ;;  %s12347_s2 = inlined_call_operand.vmem [shape: f32[9,64,16], index: 2, kind: input, shape index: {}]   ;;  %s12348_s3 = inlined_call_operand.vmem [shape: f32[9,64,64], index: 3, kind: input, shape index: {}]   ;;  %s12349_s4 = inlined_call_operand.hbm [shape: f32[9,64,64], index: 4, kind: input, shape index: {}]   ;;  %s12350_s5 = inlined_call_operand.vmem [shape: f32[256,64], index: 5, kind: input, shape index: {}]   ;;  %s12351_s6 = inlined_call_operand.vmem [shape: f32[64,16], index: 6, kind: input, shape index: {}]   ;;  %s12352_s7 = inlined_call_operand.hbm [shape: f32[16,4], index: 7, kind: input, shape index: {}]   ;;  %s12353_s8 = inlined_call_operand.hbm [shape: f32[3,64,1], index: 8, kind: input, shape index: {}]   ;;  %s12354_s9 = inlined_call_operand.vmem [shape: f32[4,64], index: 9, kind: input, shape index: {}]   ;;  %s12355_s10 = inlined_call_operand.hbm [shape: f32[64,64], index: 10, kind: input, shape index: {}]   ;;  %s12356_s11 = inlined_call_operand.vmem [shape: f32[4,64], index: 11, kind: input, shape index: {}]   ;;  %s12357_s12 = inlined_call_operand.hbm [shape: f32[64,64], index: 12, kind: input, shape index: {}]   ;;  %s12358_s13 = inlined_call_operand.vmem [shape: f32[1,64], index: 13, kind: input, shape index: {}]   ;;  %s12359_s14 = inlined_call_operand.vmem [shape: f32[1,64], index: 14, kind: input, shape index: {}]   ;;  %s12360_s15 = inlined_call_operand.vmem [shape: f32[1,64], index: 15, kind: input, shape index: {}]   ;;  %s12361_s16 = inlined_call_operand.vmem [shape: f32[3], index: 16, kind: input, shape index: {}]   ;;  %s12362_s17 = inlined_call_operand.vmem [shape: f32[2,4,64], index: 17, kind: output, shape index: {}]  }
   0x1   :  { %12417 = sst [smem:[#allocation52_spill]] %s12345_s0 }
   0x2   :  { %12418 = sst [smem:[#allocation53_spill]] %s12346_s1 }
   0x3   :  { %12419 = sst [smem:[#allocation54_spill]] %s12349_s4 }
   0x4   :  { %22 = vsyncpa [#allocation3], 0 }
   0x5   :  { %23 = vsyncpa [#allocation6], 0 }
   0x6   :  { %24 = vsyncpa [#allocation9], 0 }
   0x7   :  { %25 = vsyncpa [#allocation4], 0  ;;  %s8952_s24 = smov 0  }
   0x8 LB: > { %s8958_s25 = sadd.s32 4294967295, %s8833_s24   ;;  %p7170_p0 = scmp.ge.s32.totalorder %s8833_s24, 1  ;;  %s8833_s24 = sphi %s8952_s24, %s31_s24  }
   0x9   : > { %p429_p1 = scmp.lt.s32.totalorder %s8833_s24, 3  ;;  %p8617_p2 = scmp.eq.s32.totalorder %s8958_s25, 0 }
   0xa   : > { %s8835_s27 = smov [#allocation5]   ;;  %s8836_s29 = smov [#allocation8]  }
   0xb   : > { %p8963_p3 = pnand %p7170_p0, %p429_p1  ;;  %s466_s28 = sshll.u32 %s8835_s27, 4  ;;  %s467_s28 = int_to_ptr.vmem [resolvable:$true] %s466_s28 }
   0xc   : > { %s495_s0 = sshll.u32 %s8836_s29, 4  ;;  %s8837_s18 = smov [#allocation2]   ;;  %s8969_s0 = int_to_ptr.vmem [resolvable:$true] %s495_s0 }
   0xd   : > { %p8598_p4 = pneg %p8963_p3  ;;  %s447_s19 = sshll.u32 %s8837_s18, 4  ;;  %s8977_s19 = int_to_ptr.vmem [resolvable:$true] %s447_s19 }
   0xe   : > { %s8838_s1 = smov [#allocation7]   ;;  %s8677_s22 = scalar_lea.vmem %s467_s28, 256 }
   0xf   : > { %p8973_p5 = pnand %p8617_p2, %p8598_p4  ;;  %s8979_s20 = sshll.u32 %s8838_s1, 4  ;;  %s480_s20 = int_to_ptr.vmem [resolvable:$true] %s8979_s20 }
  0x10   : > { %p8678_p7 = scmp.ne.s32.totalorder %s467_s28, %s8677_s22  ;;  %p8685_p10 = scmp.lt.s32.totalorder %s467_s28, %s467_s28 }
  0x11   : > { %p8983_p6 = pneg %p8973_p5  ;;  %p8686_p11 = scmp.lt.s32.totalorder %s8677_s22, %s8677_s22 }
  0x13   : > { %p8680_p8 = pnand %p8678_p7, %p8983_p6  ;;  %p8687_p12 = por %p8686_p11, %p8685_p10 }
  0x15   : > { %p8681_p9 = pneg %p8680_p8 }
  0x17   : > { %p8688_p13 = pnand %p8687_p12, %p8681_p9 }
  0x19   : > { %8691 = shalt.err (!%p8688_p13)
}
  0x1a   : > { %s8839_s23 = smov 128   ;;  %s8840_s27 = smov 8  }
  0x1b   : > { %8604 = dma.hbm_to_vmem [thread:$0]  (!%p8973_p5), %s12352_s7, 256, %s467_s28, [#allocation6], %s8839_s23, %s8839_s23, %s8840_s27  }
  0x1c   : > { %s8703_s1 = scalar_lea.vmem %s8969_s0, 1024  ;;  %p8711_p7 = scmp.lt.s32.totalorder %s8969_s0, %s8969_s0 }
  0x1d   : > { %p8704_p0 = scmp.ne.s32.totalorder %s8969_s0, %s8703_s1  ;;  %p8712_p8 = scmp.lt.s32.totalorder %s8703_s1, %s8703_s1 }
  0x1f   : > { %p8706_p1 = pnand %p8704_p0, %p8983_p6  ;;  %p8713_p9 = por %p8712_p8, %p8711_p7 }
  0x21   : > { %p8707_p4 = pneg %p8706_p1 }
  0x23   : > { %p8714_p10 = pnand %p8713_p9, %p8707_p4 }
  0x25   : > { %8717 = shalt.err (!%p8714_p10)
}
  0x26   : > { %8610 = dma.hbm_to_vmem [thread:$0]  (!%p8973_p5), %s12355_s10, 1024, %s8969_s0, [#allocation9], %s8839_s23, %s8839_s23, %s8840_s27  }
  0x27   : > { %s8729_s28 = scalar_lea.vmem %s8977_s19, 9216  ;;  %p8737_p0 = scmp.lt.s32.totalorder %s8977_s19, %s8977_s19 }
  0x28   : > { %p8730_p11 = scmp.ne.s32.totalorder %s8977_s19, %s8729_s28  ;;  %p8738_p1 = scmp.lt.s32.totalorder %s8729_s28, %s8729_s28 }
  0x2a   : > { %p8732_p12 = pnand %p8730_p11, %p8983_p6  ;;  %p8739_p4 = por %p8738_p1, %p8737_p0 }
  0x2c   : > { %p8733_p13 = pneg %p8732_p12 }
  0x2e   : > { %p8740_p7 = pnand %p8739_p4, %p8733_p13 }
  0x30   : > { %8743 = shalt.err (!%p8740_p7)
}
  0x31   : > { %s12423_s4 = sld [smem:[#allocation54_spill]]  ;;  %s8755_s0 = scalar_lea.vmem %s480_s20, 3072 }
  0x32   : > { %p8756_p8 = scmp.ne.s32.totalorder %s480_s20, %s8755_s0  ;;  %p8763_p11 = scmp.lt.s32.totalorder %s480_s20, %s480_s20 }
  0x33   : > { %p8764_p12 = scmp.lt.s32.totalorder %s8755_s0, %s8755_s0 }
  0x34   : > { %p8758_p9 = pnand %p8756_p8, %p8983_p6 }
  0x35   : > { %p8765_p13 = por %p8764_p12, %p8763_p11 }
  0x36   : > { %p8759_p10 = pneg %p8758_p9 }
  0x37   : > { %8601 = dma.hbm_to_vmem [thread:$0]  (!%p8973_p5), %s12423_s4, 9216, %s8977_s19, [#allocation3], %s8839_s23, %s8839_s23, %s8840_s27  }
  0x38   : > { %p8766_p0 = pnand %p8765_p13, %p8759_p10 }
  0x3a   : > { %8769 = shalt.err (!%p8766_p0)
}
  0x3b   : > { %8607 = dma.hbm_to_vmem [thread:$0]  (!%p8973_p5), %s12353_s8, 3072, %s480_s20, [#allocation6], %s8839_s23, %s8839_s23, %s8840_s27  }
  0x3c   : > { %s8841_s19 = smov [#allocation10]   ;;  %s534_s4 = sshll.u32 %s12361_s16, 4  ;;  %s535_s4 = int_to_ptr.vmem [resolvable:$true] %s534_s4 }
  0x3d   : > { %s511_s28 = sshll.u32 %s8841_s19, 4  ;;  %s512_s28 = int_to_ptr.vmem [resolvable:$true] %s511_s28 }
  0x3e   : > { %s8781_s0 = scalar_lea.vmem %s512_s28, 1024  ;;  %p8789_p8 = scmp.lt.s32.totalorder %s512_s28, %s512_s28 }
  0x3f   : > { %p8782_p1 = scmp.ne.s32.totalorder %s512_s28, %s8781_s0  ;;  %p8790_p9 = scmp.lt.s32.totalorder %s8781_s0, %s8781_s0 }
  0x41   : > { %p8784_p4 = pnand %p8782_p1, %p8983_p6  ;;  %p8791_p10 = por %p8790_p9, %p8789_p8 }
  0x43   : > { %p8785_p7 = pneg %p8784_p4 }
  0x45   : > { %p8792_p11 = pnand %p8791_p10, %p8785_p7 }
  0x47   : > { %8795 = shalt.err (!%p8792_p11)
}
  0x48   : > { %8613 = dma.hbm_to_vmem [thread:$0]  (!%p8973_p5), %s12357_s12, 1024, %s512_s28, [#allocation9], %s8839_s23, %s8839_s23, %s8840_s27  }
  0x49   : > { %s8796_s29 = scalar_lea.vmem %s535_s4, 16  ;;  %p8804_p1 = scmp.lt.s32.totalorder %s535_s4, %s535_s4 }
  0x4a   : > { %p8797_p12 = scmp.ne.s32.totalorder %s535_s4, %s8796_s29  ;;  %p8805_p4 = scmp.lt.s32.totalorder %s8796_s29, %s8796_s29 }
  0x4c   : > { %p8799_p13 = pnand %p8797_p12, %p8983_p6  ;;  %p8806_p8 = por %p8805_p4, %p8804_p1 }
  0x4e   : > { %p8800_p0 = pneg %p8799_p13 }
  0x50   : > { %p8807_p7 = pnand %p8806_p8, %p8800_p0 }
  0x52   : > { %8810 = shalt.err (!%p8807_p7)
}
  0x53   : > { %s8842_s19 = smov [#allocation11]   ;;  %564 = sbr.rel (%p8963_p3) target bundleno = 3165 (0xc5d), region = 88 }
  0x54   : > { %8616 = dma.vmem_to_smem (!%p8973_p5), %s535_s4, 16, %s8842_s19, [#allocation4]  }
  0x58   : > { %8816 = dma.done.wait (%p8617_p2), [#allocation3], 9216  }
  0x59   : > { %8818 = vsyncadd (%p8617_p2), [#allocation3], 4294958080 }
  0x5a   : > { %8820 = dma.done.wait (%p8617_p2), [#allocation6], 3328  }
  0x5b   : > { %8822 = vsyncadd (%p8617_p2), [#allocation6], 4294963968 }
  0x5c   : > { %8824 = dma.done.wait (%p8617_p2), [#allocation9], 2048  }
  0x5d   : > { %8826 = vsyncadd (%p8617_p2), [#allocation9], 4294965248 }
  0x5e   : > { %8828 = dma.done.wait (%p8617_p2), [#allocation4], 16  }
  0x5f   : > { %8830 = vsyncadd (%p8617_p2), [#allocation4], 4294967280 }
  0x60   : > { %590 = sfence }
  0x61   : > { %s7185_s4 = sshll.u32 %s8958_s25, 1  ;;  %s12424_s23 = sld [smem:[#allocation52_spill]]  ;;  %v12363_v12 = vmov 0.0   ;;  %v668_v13 = vlaneseq  ;;  %vm716_vm0 = vcmask 130048   ;;  %vm695_vm1 = vcmask 916480   ;;  %v7194_v33 = vld [vmem:[%s12347_s2 + $0x40] sm:$0xff] }
  0x62   : > { %p642_p3 = scmp.lt.s32.totalorder %s7185_s4, 3  ;;  %s8843_s28 = smov 16   ;;  %996 = vmatprep.mubr.f32.mxu0 %v12363_v12  ;;  %1032 = vmatprep.mubr.f32.mxu1 %v12363_v12  ;;  %v7200_v34 = vld [vmem:[%s12347_s2 + $0x70] sm:$0xff]  ;;  %v7195_v35 = vld [vmem:[%s12347_s2 + $0x48] sm:$0xff]  ;;  %v7201_v36 = vld [vmem:[%s12347_s2 + $0x78] sm:$0xff]  ;;  %vm753_vm4 = vcmask 1039360  }
  0x63   : > { %s8844_s18 = smov 112   ;;  %v9095_v14 = vand.u32 127, %v668_v13  ;;  %s8846_s1 = smov 127   ;;  %v7196_v37 = vld [vmem:[%s12347_s2 + $0x50] sm:$0xff]  ;;  %v7197_v38 = vld [vmem:[%s12347_s2 + $0x58] sm:$0xff]  ;;  %v7198_v39 = vld [vmem:[%s12347_s2 + $0x60] sm:$0xff] }
  0x64   : > { %s12624_s4 = smov (!%p642_p3, %s7185_s4), 3  ;;  %s8847_s0 = smov 1   ;;  %v7199_v41 = vld [vmem:[%s12347_s2 + $0x68] sm:$0xff]  ;;  %vm774_vm5 = vcmask 7168   ;;  %v7236_v56 = vld [vmem:[%s12347_s2 + $0xd0] sm:$0xff]  ;;  %v7269_v55 = vld [vmem:[%s12347_s2 + $0x158] sm:$0xff] }
  0x65   : > { %s7572_s26 = sshll.u32 %s12624_s4, 4  ;;  %12425 = vst [vmem:[#allocation16_spill] sm:$0xff] %v9095_v14  ;;  %v671_v15 = vshrl.u32 %v9095_v14, 4  ;;  %v670_v40 = vadd.s32 128, %v9095_v14  ;;  %v673_v51 = vand.u32 15, %v9095_v14  ;;  %v7251_v54 = vld [vmem:[%s12347_s2 + $0x108] sm:$0xff] }
  0x66   : > { %v7285_v57 = vld [vmem:[%s12347_s2 + $0x198] sm:$0xff]  ;;  %s2380_s4 = sld [smem:[#allocation11]]  ;;  %s8850_s30 = smov 120  }
  0x67   : > { %s646_s27 = scalar_lea.vmem %s12424_s23, %s7572_s26  ;;  %vm9100_vm2 = vcmp.eq.s32.totalorder %v671_v15, 0  ;;  %v672_v42 = vshrl.u32 %v670_v40, 4  ;;  %v674_v50 = vand.u32 15, %v670_v40  ;;  %vm9229_vm8 = vcmp.eq.s32.totalorder %v673_v51, 0  ;;  %s8849_s26 = smov 56  }
  0x68   : > { %v659_v0 = vld [vmem:[%s646_s27 + $0x18] sm:$0xff]  ;;  %v658_v1 = vld [vmem:[%s646_s27 + $0x10] sm:$0xff]  ;;  %v657_v4 = vld [vmem:[%s646_s27 + $0x8] sm:$0xff]  ;;  %vm9233_vm9 = vcmp.eq.s32.totalorder %v673_v51, 15  ;;  %s8851_s21 = smov 8   ;;  %s8852_s23 = smov 72  }
  0x69   : > { %v663_v2 = vmul.f32 2.0, %v659_v0  ;;  %v662_v3 = vmul.f32 2.0, %v658_v1  ;;  %v656_v5 = vld [vmem:[%s646_s27] sm:$0xff]  ;;  %v661_v8 = vmul.f32 2.0, %v657_v4  ;;  %vm678_vm3 = vcmp.eq.s32.totalorder %v672_v42, 15  ;;  %v894_v42 = vld [vmem:[%s12347_s2 + $0x18] sm:$0xff] }
  0x6a   : > { %v660_v9 = vmul.f32 2.0, %v656_v5  ;;  %vm9221_vm6 = vcmp.eq.s32.totalorder %v674_v50, 0  ;;  %vm9225_vm7 = vcmp.eq.s32.totalorder %v674_v50, 15  ;;  %v2318_v51 = vld [vmem:[#allocation7 + $0x10] sm:$0xff]  ;;  %s8853_s27 = smov 63   ;;  %p648_p2 = scmp.lt.s32.totalorder %s8958_s25, 1 }
  0x6b   : > { %v9077_v6 = vadd.f32 -1.0, %v663_v2  ;;  %v9079_v7 = vadd.f32 -1.0, %v662_v3  ;;  %v9085_v10 = vadd.f32 -1.0, %v661_v8  ;;  %s12594_s22 = sld [smem:[#allocation53_spill]] }
  0x6c   : > { %v9087_v11 = vadd.f32 -1.0, %v660_v9  ;;  %s12626_s25 = smov (!%p648_p2, %s8958_s25), 1  ;;  %s12264_s19 = sld [smem:[#allocation11 + $0x2]] }
  0x6d   : > { %708 = vrot.lane.b32.xlu1 %v9077_v6, %s8843_s28  ;;  %691 = vrot.lane.b32.xlu0 %v9079_v7, %s8844_s18 }
  0x71   : > { %714 = vrot.lane.b32.xlu1 %v9079_v7, %s8843_s28  ;;  %693 = vrot.lane.b32.xlu0 %v9077_v6, %s8844_s18 }
  0x75   : > { %689 = vrot.lane.b32.xlu1 %v9085_v10, %s8844_s18  ;;  %687 = vrot.lane.b32.xlu0 %v9087_v11, %s8844_s18  ;;  %s8860_s18 = smov 113  }
  0x79   : > { %712 = vrot.lane.b32.xlu1 %v9087_v11, %s8843_s28  ;;  %706 = vrot.lane.b32.xlu0 %v9085_v10, %s8843_s28  ;;  %s8854_s28 = smov 65  }
  0xdf   : > { %v709_v16 = vpop.permute.xlu1 %708  ;;  %v9098_v17 = vpop.permute.xlu0 %691 }
  0xe3   : > { %v715_v19 = vpop.permute.xlu1 %714  ;;  %v9104_v20 = vpop.permute.xlu0 %693 }
  0xe4   : > { %v9107_v21 = vsel %vm716_vm0, %v715_v19, %v709_v16  ;;  %v724_v22 = vsel %vm716_vm0, %v709_v16, %v715_v19  ;;  %v9113_v23 = vsel %vm695_vm1, %v9098_v17, %v9104_v20  ;;  %v705_v43 = vsel %vm695_vm1, %v9104_v20, %v9098_v17  ;;  %v891_v20 = vld [vmem:[%s12347_s2] sm:$0xff] }
  0xe5   : > { %960 = vmatprep.subr.mxu0 %v9107_v21  ;;  %8570 = vmatprep.subr.mxu1 %v9107_v21  ;;  %v731_v24 = vsel %vm9100_vm2, %v9113_v23, %v724_v22  ;;  %v9205_v44 = vsel %vm678_vm3, %v9107_v21, %v705_v43 }
  0xe6   : > { %751 = vrot.lane.b32.xlu1 %v9107_v21, %s8846_s1  ;;  %766 = vrot.lane.b32.xlu0 %v9107_v21, %s8847_s0  ;;  %v7218_v21 = vld [vmem:[%s12347_s2 + $0x80] sm:$0xff] }
  0xe7   : > { %961 = vmatpush1.msra.mxu0 %v731_v24  ;;  %8572 = vmatpush1.msra.mxu1 %v731_v24  ;;  %v690_v25 = vpop.permute.xlu1 %689  ;;  %v688_v26 = vpop.permute.xlu0 %687 }
  0xe8   : > { %v9126_v29 = vsel %vm695_vm1, %v688_v26, %v690_v25  ;;  %v704_v45 = vsel %vm695_vm1, %v690_v25, %v688_v26  ;;  %v2316_v25 = vld [vmem:[#allocation7] sm:$0xff]  ;;  %v892_v26 = vld [vmem:[%s12347_s2 + $0x8] sm:$0xff] }
  0xea   : > { %749 = vrot.lane.b32.xlu0 %v731_v24, %s8846_s1 }
  0xeb   : > { %v713_v27 = vpop.permute.xlu1 %712  ;;  %v707_v28 = vpop.permute.xlu0 %706 }
  0xec   : > { %v717_v30 = vsel %vm716_vm0, %v713_v27, %v707_v28  ;;  %v723_v31 = vsel %vm716_vm0, %v707_v28, %v713_v27  ;;  %v7219_v27 = vld [vmem:[%s12347_s2 + $0x88] sm:$0xff] }
  0xed   : > { %747 = vrot.lane.b32.xlu1 %v717_v30, %s8846_s1  ;;  %962 = vmatprep.subr.mxu0 %v717_v30  ;;  %v729_v32 = vsel %vm9100_vm2, %v9126_v29, %v723_v31  ;;  %v9212_v46 = vsel %vm678_vm3, %v717_v30, %v704_v45  ;;  %v8848_v31 = vmov 0  }
  0xee   : > { %8571 = vmatprep.subr.mxu1 %v717_v30  ;;  %745 = vrot.lane.b32.xlu0 %v729_v32, %s8846_s1 }
  0xef   : > { %963 = vmatpush1.msra.mxu0 %v729_v32  ;;  %8573 = vmatpush1.msra.mxu1 %v729_v32 }
  0xf0   : > { %7202 = vmatmul.mubr.msk.f32.vlgmr.msra.gmra.mxu0 %vm716_vm0, %v7194_v33  ;;  %7208 = vmatmul.mubr.msk.f32.vlgmr.msra.gmra.mxu1 %vm716_vm0, %v7200_v34 }
  0xf1   : > { %772 = vrot.lane.b32.xlu1 %v731_v24, %s8847_s0  ;;  %1002 = vmatprep.mubr.f32.mxu0 %v12363_v12 }
  0xf2   : > { %764 = vrot.lane.b32.xlu0 %v717_v30, %s8847_s0  ;;  %1038 = vmatprep.mubr.f32.mxu1 %v12363_v12 }
  0xf3   : > { %8664 = vset.pattern.permute.xlu0 %v8848_v31  ;;  %8665 = vset.pattern.permute.xlu1 %v8848_v31 }
  0xf4   : > { %7203 = vmatmul.mubr.msk.f32.gmra.mxu0 %vm716_vm0, %v7195_v35  ;;  %7209 = vmatmul.mubr.msk.f32.gmra.mxu1 %vm716_vm0, %v7201_v36 }
  0xf5   : > { %770 = vrot.lane.b32.xlu1 %v729_v32, %s8847_s0  ;;  %1008 = vmatprep.mubr.f32.mxu0 %v12363_v12 }
  0xf6   : > { %803 = vrot.lane.b32.xlu0 %v9079_v7, %s8846_s1  ;;  %1133 = vmatprep.mubr.f32.mxu1 %v12363_v12 }
  0xf8   : > { %7204 = vmatmul.mubr.msk.f32.gmra.mxu0 %vm716_vm0, %v7196_v37 }
  0xf9   : > { %805 = vrot.lane.b32.xlu1 %v9077_v6, %s8846_s1  ;;  %1014 = vmatprep.mubr.f32.mxu0 %v12363_v12 }
  0xfa   : > { %819 = vrot.lane.b32.xlu0 %v9077_v6, %s8847_s0 }
  0xfc   : > { %7205 = vmatmul.mubr.msk.f32.gmra.mxu0 %vm716_vm0, %v7197_v38 }
  0xfd   : > { %825 = vrot.lane.b32.xlu1 %v9079_v7, %s8847_s0  ;;  %1020 = vmatprep.mubr.f32.mxu0 %v12363_v12 }
  0xfe   : > { %799 = vrot.lane.b32.xlu0 %v9087_v11, %s8846_s1 }
 0x100   : > { %7206 = vmatmul.mubr.msk.f32.gmra.mxu0 %vm716_vm0, %v7198_v39  ;;  %v2319_v39 = vld [vmem:[#allocation7 + $0x18] sm:$0xff] }
 0x101   : > { %801 = vrot.lane.b32.xlu1 %v9085_v10, %s8846_s1  ;;  %1026 = vmatprep.mubr.f32.mxu0 %v12363_v12 }
 0x102   : > { %817 = vrot.lane.b32.xlu0 %v9085_v10, %s8847_s0 }
 0x104   : > { %7207 = vmatmul.mubr.msk.f32.gmra.mxu0 %vm716_vm0, %v7199_v41  ;;  %v2317_v41 = vld [vmem:[#allocation7 + $0x8] sm:$0xff] }
 0x105   : > { %823 = vrot.lane.b32.xlu1 %v9087_v11, %s8847_s0  ;;  %1279 = vmatprep.mubr.f32.mxu0 %v12363_v12 }
 0x106   : > { %851 = vrot.lane.b32.xlu0 %v9113_v23, %s8846_s1 }
 0x109   : > { %873 = vrot.lane.b32.xlu1 %v9113_v23, %s8847_s0 }
 0x10a   : > { %847 = vrot.lane.b32.xlu0 %v9126_v29, %s8846_s1 }
 0x10d   : > { %853 = vrot.lane.b32.xlu1 %v9205_v44, %s8846_s1 }
 0x10e   : > { %867 = vrot.lane.b32.xlu0 %v9205_v44, %s8847_s0 }
 0x111   : > { %849 = vrot.lane.b32.xlu1 %v9212_v46, %s8846_s1 }
 0x112   : > { %865 = vrot.lane.b32.xlu0 %v9212_v46, %s8847_s0 }
 0x115   : > { %871 = vrot.lane.b32.xlu1 %v9126_v29, %s8847_s0 }
 0x116   : > { %2326 = vperm.xlu0 %8664, %v2316_v25   ;;  %v7234_v25 = vld [vmem:[%s12347_s2 + $0xc0] sm:$0xff] }
 0x119   : > { %2331 = vperm.xlu1 %8665, %v2317_v41   ;;  %v7254_v41 = vld [vmem:[%s12347_s2 + $0x120] sm:$0xff] }
 0x11a   : > { %2341 = vperm.xlu0 %8664, %v2319_v39   ;;  %v7253_v39 = vld [vmem:[%s12347_s2 + $0x118] sm:$0xff] }
 0x11d   : > { %2336 = vperm.xlu1 %8665, %v2318_v51  }
 0x158   : > { %v767_v47 = vpop.permute.xlu0 %766  ;;  %v752_v48 = vpop.permute.xlu1 %751 }
 0x15c   : > { %v750_v49 = vpop.permute.xlu0 %749 }
 0x15d   : > { %v755_v59 = vsel %vm753_vm4, %v750_v49, %v752_v48  ;;  %v763_v60 = vsel %vm753_vm4, %v752_v48, %v750_v49 }
 0x15f   : > { %v748_v52 = vpop.permute.xlu1 %747 }
 0x160   : > { %v746_v53 = vpop.permute.xlu0 %745 }
 0x161   : > { %v754_v5 = vsel %vm753_vm4, %v746_v53, %v748_v52  ;;  %v762_v8 = vsel %vm753_vm4, %v748_v52, %v746_v53 }
 0x163   : > { %v773_v58 = vpop.permute.xlu1 %772 }
 0x164   : > { %v776_v61 = vsel %vm774_vm5, %v773_v58, %v767_v47  ;;  %v782_v62 = vsel %vm774_vm5, %v767_v47, %v773_v58  ;;  %v765_v63 = vpop.permute.xlu0 %764  ;;  %v2321_v47 = vld [vmem:[#allocation7 + $0x28] sm:$0xff]  ;;  %v895_v58 = vld [vmem:[%s12347_s2 + $0x20] sm:$0xff] }
 0x165   : > { %v790_v0 = vsel %vm9221_vm6, %v763_v60, %v776_v61  ;;  %v798_v1 = vsel %vm9225_vm7, %v776_v61, %v763_v60  ;;  %v789_v2 = vsel %vm9229_vm8, %v755_v59, %v782_v62  ;;  %v797_v3 = vsel %vm9233_vm9, %v782_v62, %v755_v59  ;;  %v7222_v59 = vld [vmem:[%s12347_s2 + $0xa0] sm:$0xff]  ;;  %2351 = vperm.xlu0 %8664, %v2321_v47   ;;  %v2323_v62 = vld [vmem:[#allocation7 + $0x38] sm:$0xff]  ;;  %v7257_v47 = vld [vmem:[%s12347_s2 + $0x138] sm:$0xff] }
 0x166   : > { %1097 = vmatprep.subr.mxu1 %v790_v0  ;;  %1243 = vmatprep.subr.mxu0 %v798_v1  ;;  %v2320_v0 = vld [vmem:[#allocation7 + $0x20] sm:$0xff]  ;;  %v896_v1 = vld [vmem:[%s12347_s2 + $0x28] sm:$0xff] }
 0x167   : > { %v771_v4 = vpop.permute.xlu1 %770  ;;  %1098 = vmatpush1.msra.mxu1 %v789_v2  ;;  %1244 = vmatpush1.msra.mxu0 %v797_v3  ;;  %v7223_v2 = vld [vmem:[%s12347_s2 + $0xa8] sm:$0xff] }
 0x168   : > { %v775_v9 = vsel %vm774_vm5, %v771_v4, %v765_v63  ;;  %v781_v13 = vsel %vm774_vm5, %v765_v63, %v771_v4  ;;  %v804_v15 = vpop.permute.xlu0 %803  ;;  %2346 = vperm.xlu1 %8665, %v2320_v0   ;;  %v7273_v0 = vld [vmem:[%s12347_s2 + $0x178] sm:$0xff] }
 0x169   : > { %v788_v16 = vsel %vm9221_vm6, %v762_v8, %v775_v9  ;;  %v796_v17 = vsel %vm9225_vm7, %v775_v9, %v762_v8  ;;  %v787_v18 = vsel %vm9229_vm8, %v754_v5, %v781_v13  ;;  %v795_v19 = vsel %vm9233_vm9, %v781_v13, %v754_v5  ;;  %2361 = vperm.xlu0 %8664, %v2323_v62   ;;  %v2322_v8 = vld [vmem:[#allocation7 + $0x30] sm:$0xff]  ;;  %v897_v13 = vld [vmem:[%s12347_s2 + $0x30] sm:$0xff] }
 0x16a   : > { %1099 = vmatprep.subr.mxu1 %v788_v16  ;;  %1245 = vmatprep.subr.mxu0 %v796_v17  ;;  %v7272_v62 = vld [vmem:[%s12347_s2 + $0x170] sm:$0xff] }
 0x16b   : > { %v806_v22 = vpop.permute.xlu1 %805  ;;  %1100 = vmatpush1.msra.mxu1 %v787_v18  ;;  %1246 = vmatpush1.msra.mxu0 %v795_v19  ;;  %v898_v18 = vld [vmem:[%s12347_s2 + $0x38] sm:$0xff] }
 0x16c   : > { %7210 = vmatmul.mubr.msk.f32.vlgmr.msra.gmra.mxu1 %vm716_vm0, %v891_v20  ;;  %7226 = vmatmul.mubr.msk.f32.vlgmr.msra.gmra.mxu0 %vm716_vm0, %v7218_v21  ;;  %v820_v24 = vpop.permute.xlu0 %819  ;;  %v9278_v28 = vsel %vm753_vm4, %v804_v15, %v806_v22  ;;  %v816_v30 = vsel %vm753_vm4, %v806_v22, %v804_v15  ;;  %v7224_v15 = vld [vmem:[%s12347_s2 + $0xb0] sm:$0xff]  ;;  %v7225_v19 = vld [vmem:[%s12347_s2 + $0xb8] sm:$0xff] }
 0x16d   : > { %1139 = vmatprep.mubr.f32.mxu1 %v12363_v12  ;;  %1285 = vmatprep.mubr.f32.mxu0 %v12363_v12 }
 0x16e   : > { %1567 = vmatprep.subr.mxu0 %v9077_v6  ;;  %v893_v6 = vld [vmem:[%s12347_s2 + $0x10] sm:$0xff]  ;;  %2356 = vperm.xlu1 %8665, %v2322_v8  }
 0x16f   : > { %v826_v32 = vpop.permute.xlu1 %825  ;;  %1568 = vmatpush1.msra.mxu0 %v9079_v7  ;;  %v7220_v7 = vld [vmem:[%s12347_s2 + $0x90] sm:$0xff] }
 0x170   : > { %v828_v33 = vsel %vm774_vm5, %v826_v32, %v820_v24  ;;  %v9285_v34 = vsel %vm774_vm5, %v820_v24, %v826_v32  ;;  %7211 = vmatmul.mubr.msk.f32.gmra.mxu1 %vm716_vm0, %v892_v26  ;;  %7227 = vmatmul.mubr.msk.f32.gmra.mxu0 %vm716_vm0, %v7219_v27  ;;  %v800_v35 = vpop.permute.xlu0 %799  ;;  %v7250_v26 = vld [vmem:[%s12347_s2 + $0x100] sm:$0xff]  ;;  %v7300_v8 = vld [vmem:[%s12347_s2 + $0x1d0] sm:$0xff] }
 0x171   : > { %1145 = vmatprep.mubr.f32.mxu1 %v12363_v12  ;;  %1291 = vmatprep.mubr.f32.mxu0 %v12363_v12  ;;  %v838_v36 = vsel %vm9221_vm6, %v816_v30, %v828_v33  ;;  %v837_v37 = vsel %vm9229_vm8, %v9278_v28, %v9285_v34  ;;  %v842_v60 = vsel %vm9225_vm7, %v828_v33, %v816_v30 }
 0x172   : > { %1405 = vmatprep.subr.mxu1 %v838_v36  ;;  %1569 = vmatprep.subr.mxu0 %v9085_v10  ;;  %v7221_v10 = vld [vmem:[%s12347_s2 + $0x98] sm:$0xff]  ;;  %v841_v32 = vsel %vm9233_vm9, %v9285_v34, %v9278_v28  ;;  %v7235_v36 = vld [vmem:[%s12347_s2 + $0xc8] sm:$0xff] }
 0x173   : > { %v802_v38 = vpop.permute.xlu1 %801  ;;  %1406 = vmatpush1.msra.mxu1 %v837_v37  ;;  %1570 = vmatpush1.msra.mxu0 %v9087_v11 }
 0x174   : > { %7212 = vmatmul.mubr.msk.f32.gmra.mxu1 %vm716_vm0, %v893_v6  ;;  %7228 = vmatmul.mubr.msk.f32.gmra.mxu0 %vm716_vm0, %v7220_v7  ;;  %v818_v40 = vpop.permute.xlu0 %817  ;;  %v9316_v11 = vsel %vm753_vm4, %v800_v35, %v802_v38  ;;  %v9319_v43 = vsel %vm753_vm4, %v802_v38, %v800_v35  ;;  %v7252_v38 = vld [vmem:[%s12347_s2 + $0x110] sm:$0xff] }
 0x175   : > { %1151 = vmatprep.mubr.f32.mxu1 %v12363_v12  ;;  %1297 = vmatprep.mubr.f32.mxu0 %v12363_v12 }
 0x177   : > { %v824_v45 = vpop.permute.xlu1 %823 }
 0x178   : > { %v9322_v48 = vsel %vm774_vm5, %v824_v45, %v818_v40  ;;  %v9325_v49 = vsel %vm774_vm5, %v818_v40, %v824_v45  ;;  %7213 = vmatmul.mubr.msk.f32.gmra.mxu1 %vm716_vm0, %v894_v42  ;;  %7229 = vmatmul.mubr.msk.f32.gmra.mxu0 %vm716_vm0, %v7221_v10  ;;  %v852_v50 = vpop.permute.xlu0 %851  ;;  %v7238_v40 = vld [vmem:[%s12347_s2 + $0xe0] sm:$0xff]  ;;  %v7239_v42 = vld [vmem:[%s12347_s2 + $0xe8] sm:$0xff]  ;;  %v7241_v45 = vld [vmem:[%s12347_s2 + $0xf8] sm:$0xff] }
 0x179   : > { %v836_v52 = vsel %vm9221_vm6, %v9319_v43, %v9322_v48  ;;  %1157 = vmatprep.mubr.f32.mxu1 %v12363_v12  ;;  %1303 = vmatprep.mubr.f32.mxu0 %v12363_v12  ;;  %v835_v53 = vsel %vm9229_vm8, %v9316_v11, %v9325_v49  ;;  %v840_v6 = vsel %vm9225_vm7, %v9322_v48, %v9319_v43  ;;  %v7255_v10 = vld [vmem:[%s12347_s2 + $0x128] sm:$0xff]  ;;  %v7256_v43 = vld [vmem:[%s12347_s2 + $0x130] sm:$0xff]  ;;  %v7266_v48 = vld [vmem:[%s12347_s2 + $0x140] sm:$0xff] }
 0x17a   : > { %1407 = vmatprep.subr.mxu1 %v836_v52  ;;  %v839_v34 = vsel %vm9233_vm9, %v9325_v49, %v9316_v11  ;;  %v7240_v11 = vld [vmem:[%s12347_s2 + $0xf0] sm:$0xff]  ;;  %v7282_v49 = vld [vmem:[%s12347_s2 + $0x180] sm:$0xff] }
 0x17b   : > { %v874_v61 = vpop.permute.xlu1 %873  ;;  %1408 = vmatpush1.msra.mxu1 %v835_v53  ;;  %v7267_v53 = vld [vmem:[%s12347_s2 + $0x148] sm:$0xff] }
 0x17c   : > { %7214 = vmatmul.mubr.msk.f32.gmra.mxu1 %vm716_vm0, %v895_v58  ;;  %7230 = vmatmul.mubr.msk.f32.gmra.mxu0 %vm716_vm0, %v7222_v59  ;;  %v848_v63 = vpop.permute.xlu0 %847  ;;  %v7270_v58 = vld [vmem:[%s12347_s2 + $0x160] sm:$0xff] }
 0x17d   : > { %1729 = vmatprep.subr.mxu1 %v842_v60  ;;  %1163 = vmatprep.mubr.f32.mxu1 %v12363_v12  ;;  %v7286_v59 = vld [vmem:[%s12347_s2 + $0x1a0] sm:$0xff]  ;;  %v7271_v60 = vld [vmem:[%s12347_s2 + $0x168] sm:$0xff] }
 0x17e   : > { %1309 = vmatprep.mubr.f32.mxu0 %v12363_v12 }
 0x17f   : > { %v854_v3 = vpop.permute.xlu1 %853 }
 0x180   : > { %v864_v4 = vsel %vm753_vm4, %v854_v3, %v852_v50  ;;  %7215 = vmatmul.mubr.msk.f32.gmra.mxu1 %vm716_vm0, %v896_v1  ;;  %7231 = vmatmul.mubr.msk.f32.gmra.mxu0 %vm716_vm0, %v7223_v2  ;;  %v868_v5 = vpop.permute.xlu0 %867  ;;  %v9384_v21 = vsel %vm753_vm4, %v852_v50, %v854_v3  ;;  %v7289_v1 = vld [vmem:[%s12347_s2 + $0x1b8] sm:$0xff]  ;;  %v7298_v2 = vld [vmem:[%s12347_s2 + $0x1c0] sm:$0xff] }
 0x181   : > { %v876_v9 = vsel %vm774_vm5, %v874_v61, %v868_v5  ;;  %1169 = vmatprep.mubr.f32.mxu1 %v12363_v12  ;;  %1315 = vmatprep.mubr.f32.mxu0 %v12363_v12  ;;  %v9387_v22 = vsel %vm774_vm5, %v868_v5, %v874_v61  ;;  %v7287_v61 = vld [vmem:[%s12347_s2 + $0x1a8] sm:$0xff]  ;;  %v7314_v3 = vld [vmem:[%s12347_s2 + $0x200] sm:$0xff] }
 0x182   : > { %v886_v16 = vsel %vm9221_vm6, %v864_v4, %v876_v9  ;;  %v885_v33 = vsel %vm9229_vm8, %v9384_v21, %v9387_v22  ;;  %v890_v37 = vsel %vm9225_vm7, %v876_v9, %v864_v4  ;;  %v889_v50 = vsel %vm9233_vm9, %v9387_v22, %v9384_v21  ;;  %v7299_v4 = vld [vmem:[%s12347_s2 + $0x1c8] sm:$0xff]  ;;  %v7316_v9 = vld [vmem:[%s12347_s2 + $0x210] sm:$0xff]  ;;  %v7305_v22 = vld [vmem:[%s12347_s2 + $0x1f8] sm:$0xff] }
 0x183   : > { %v850_v17 = vpop.permute.xlu1 %849  ;;  %1891 = vmatprep.subr.mxu0 %v886_v16  ;;  %v7315_v5 = vld [vmem:[%s12347_s2 + $0x208] sm:$0xff]  ;;  %v7302_v16 = vld [vmem:[%s12347_s2 + $0x1e0] sm:$0xff]  ;;  %v7320_v21 = vld [vmem:[%s12347_s2 + $0x230] sm:$0xff] }
 0x184   : > { %7216 = vmatmul.mubr.msk.f32.gmra.mxu1 %vm716_vm0, %v897_v13  ;;  %7232 = vmatmul.mubr.msk.f32.gmra.mxu0 %vm716_vm0, %v7224_v15  ;;  %v866_v24 = vpop.permute.xlu0 %865  ;;  %v9404_v31 = vsel %vm753_vm4, %v850_v17, %v848_v63  ;;  %v9417_v35 = vsel %vm753_vm4, %v848_v63, %v850_v17  ;;  %v7288_v63 = vld [vmem:[%s12347_s2 + $0x1b0] sm:$0xff]  ;;  %v7301_v13 = vld [vmem:[%s12347_s2 + $0x1d8] sm:$0xff]  ;;  %v7318_v17 = vld [vmem:[%s12347_s2 + $0x220] sm:$0xff] }
 0x185   : > { %1175 = vmatprep.mubr.f32.mxu1 %v12363_v12  ;;  %1321 = vmatprep.mubr.f32.mxu0 %v12363_v12  ;;  %v7317_v15 = vld [vmem:[%s12347_s2 + $0x218] sm:$0xff] }
 0x187   : > { %v872_v20 = vpop.permute.xlu1 %871 }
 0x188   : > { %7217 = vmatmul.mubr.msk.f32.gmra.mxu1 %vm716_vm0, %v898_v18  ;;  %7233 = vmatmul.mubr.msk.f32.gmra.mxu0 %vm716_vm0, %v7225_v19  ;;  %v9398_v27 = vsel %vm774_vm5, %v872_v20, %v866_v24  ;;  %v9401_v30 = vsel %vm774_vm5, %v866_v24, %v872_v20  ;;  %v7303_v18 = vld [vmem:[%s12347_s2 + $0x1e8] sm:$0xff]  ;;  %v7304_v20 = vld [vmem:[%s12347_s2 + $0x1f0] sm:$0xff]  ;;  %v7321_v24 = vld [vmem:[%s12347_s2 + $0x238] sm:$0xff] }
 0x189   : > { %1441 = vmatprep.mubr.f32.mxu1 %v12363_v12  ;;  %1603 = vmatprep.mubr.f32.mxu0 %v12363_v12  ;;  %v884_v28 = vsel %vm9221_vm6, %v9404_v31, %v9398_v27  ;;  %v883_v7 = vsel %vm9229_vm8, %v9417_v35, %v9401_v30  ;;  %v888_v51 = vsel %vm9225_vm7, %v9398_v27, %v9404_v31  ;;  %v7319_v19 = vld [vmem:[%s12347_s2 + $0x228] sm:$0xff]  ;;  %v2445_v27 = vld [vmem:[%s12350_s5 + $0x78] sm:$0xff]  ;;  %v2444_v31 = vld [vmem:[%s12350_s5 + $0x70] sm:$0xff] }
 0x18a   : > { %v887_v52 = vsel %vm9233_vm9, %v9401_v30, %v9417_v35  ;;  %v2460_v30 = vld [vmem:[%s12350_s5 + $0xf0] sm:$0xff]  ;;  %v2443_v35 = vld [vmem:[%s12350_s5 + $0x68] sm:$0xff] }
 0x18c   : > { %7242 = vmatmul.mubr.msk.f32.vlgmr.msra.gmra.mxu1 %vm716_vm0, %v7234_v25  ;;  %7258 = vmatmul.mubr.msk.f32.vlgmr.msra.gmra.mxu0 %vm716_vm0, %v7250_v26  ;;  %v2461_v25 = vld [vmem:[%s12350_s5 + $0xf8] sm:$0xff] }
 0x18d   : > { %1730 = vmatpush1.msra.mxu1 %v841_v32  ;;  %1892 = vmatpush1.msra.mxu0 %v885_v33  ;;  %v2459_v32 = vld [vmem:[%s12350_s5 + $0xe8] sm:$0xff] }
 0x18e   : > { %1731 = vmatprep.subr.mxu1 %v840_v6  ;;  %1893 = vmatprep.subr.mxu0 %v884_v28  ;;  %v2458_v6 = vld [vmem:[%s12350_s5 + $0xe0] sm:$0xff] }
 0x18f   : > { %1732 = vmatpush1.msra.mxu1 %v839_v34  ;;  %1894 = vmatpush1.msra.mxu0 %v883_v7  ;;  %v2442_v28 = vld [vmem:[%s12350_s5 + $0x60] sm:$0xff]  ;;  %v2457_v34 = vld [vmem:[%s12350_s5 + $0xd8] sm:$0xff] }
 0x190   : > { %1447 = vmatprep.mubr.f32.mxu1 %v12363_v12  ;;  %1609 = vmatprep.mubr.f32.mxu0 %v12363_v12 }
 0x191   : > { %2053 = vmatprep.subr.mxu1 %v9205_v44  ;;  %2215 = vmatprep.subr.mxu0 %v890_v37  ;;  %v7237_v44 = vld [vmem:[%s12347_s2 + $0xd8] sm:$0xff]  ;;  %v2440_v37 = vld [vmem:[%s12350_s5 + $0x50] sm:$0xff] }
 0x192   : > { %7243 = vmatmul.mubr.msk.f32.gmra.mxu1 %vm716_vm0, %v7235_v36  ;;  %7259 = vmatmul.mubr.msk.f32.gmra.mxu0 %vm716_vm0, %v7251_v54  ;;  %v2441_v36 = vld [vmem:[%s12350_s5 + $0x58] sm:$0xff]  ;;  %v2456_v54 = vld [vmem:[%s12350_s5 + $0xd0] sm:$0xff] }
 0x193   : > { %1453 = vmatprep.mubr.f32.mxu1 %v12363_v12  ;;  %1615 = vmatprep.mubr.f32.mxu0 %v12363_v12 }
 0x196   : > { %7244 = vmatmul.mubr.msk.f32.gmra.mxu1 %vm716_vm0, %v7236_v56  ;;  %7260 = vmatmul.mubr.msk.f32.gmra.mxu0 %vm716_vm0, %v7252_v38  ;;  %v2455_v56 = vld [vmem:[%s12350_s5 + $0xc8] sm:$0xff] }
 0x197   : > { %1459 = vmatprep.mubr.f32.mxu1 %v12363_v12  ;;  %1621 = vmatprep.mubr.f32.mxu0 %v12363_v12 }
 0x19a   : > { %7245 = vmatmul.mubr.msk.f32.gmra.mxu1 %vm716_vm0, %v7237_v44  ;;  %7261 = vmatmul.mubr.msk.f32.gmra.mxu0 %vm716_vm0, %v7253_v39  ;;  %v2439_v44 = vld [vmem:[%s12350_s5 + $0x48] sm:$0xff]  ;;  %v2454_v39 = vld [vmem:[%s12350_s5 + $0xc0] sm:$0xff] }
 0x19b   : > { %1465 = vmatprep.mubr.f32.mxu1 %v12363_v12  ;;  %1627 = vmatprep.mubr.f32.mxu0 %v12363_v12 }
 0x19e   : > { %7246 = vmatmul.mubr.msk.f32.gmra.mxu1 %vm716_vm0, %v7238_v40  ;;  %7262 = vmatmul.mubr.msk.f32.gmra.mxu0 %vm716_vm0, %v7254_v41  ;;  %v2438_v40 = vld [vmem:[%s12350_s5 + $0x40] sm:$0xff]  ;;  %v2453_v41 = vld [vmem:[%s12350_s5 + $0xb8] sm:$0xff] }
 0x19f   : > { %1471 = vmatprep.mubr.f32.mxu1 %v12363_v12  ;;  %1633 = vmatprep.mubr.f32.mxu0 %v12363_v12 }
 0x1a2   : > { %7247 = vmatmul.mubr.msk.f32.gmra.mxu1 %vm716_vm0, %v7239_v42  ;;  %7263 = vmatmul.mubr.msk.f32.gmra.mxu0 %vm716_vm0, %v7255_v10  ;;  %v2437_v10 = vld [vmem:[%s12350_s5 + $0x38] sm:$0xff] }
 0x1a3   : > { %1477 = vmatprep.mubr.f32.mxu1 %v12363_v12  ;;  %1639 = vmatprep.mubr.f32.mxu0 %v12363_v12 }
 0x1a6   : > { %7248 = vmatmul.mubr.msk.f32.gmra.mxu1 %vm716_vm0, %v7240_v11  ;;  %7264 = vmatmul.mubr.msk.f32.gmra.mxu0 %vm716_vm0, %v7256_v43  ;;  %v2452_v11 = vld [vmem:[%s12350_s5 + $0xb0] sm:$0xff] }
 0x1a7   : > { %1483 = vmatprep.mubr.f32.mxu1 %v12363_v12  ;;  %1645 = vmatprep.mubr.f32.mxu0 %v12363_v12  ;;  %v2436_v43 = vld [vmem:[%s12350_s5 + $0x30] sm:$0xff] }
 0x1aa   : > { %7249 = vmatmul.mubr.msk.f32.gmra.mxu1 %vm716_vm0, %v7241_v45  ;;  %7265 = vmatmul.mubr.msk.f32.gmra.mxu0 %vm716_vm0, %v7257_v47  ;;  %v2451_v45 = vld [vmem:[%s12350_s5 + $0xa8] sm:$0xff] }
 0x1ab   : > { %1765 = vmatprep.mubr.f32.mxu1 %v12363_v12  ;;  %1927 = vmatprep.mubr.f32.mxu0 %v12363_v12 }
 0x1ae   : > { %7274 = vmatmul.mubr.msk.f32.vlgmr.msra.gmra.mxu1 %vm716_vm0, %v7266_v48  ;;  %7290 = vmatmul.mubr.msk.f32.vlgmr.msra.gmra.mxu0 %vm716_vm0, %v7282_v49  ;;  %v2435_v48 = vld [vmem:[%s12350_s5 + $0x28] sm:$0xff]  ;;  %v2450_v49 = vld [vmem:[%s12350_s5 + $0xa0] sm:$0xff] }
 0x1af   : > { %2054 = vmatpush1.msra.mxu1 %v9113_v23  ;;  %2216 = vmatpush1.msra.mxu0 %v889_v50  ;;  %v7283_v23 = vld [vmem:[%s12347_s2 + $0x188] sm:$0xff]  ;;  %v2434_v50 = vld [vmem:[%s12350_s5 + $0x20] sm:$0xff] }
 0x1b0   : > { %2055 = vmatprep.subr.mxu1 %v9212_v46  ;;  %2217 = vmatprep.subr.mxu0 %v888_v51  ;;  %v7268_v46 = vld [vmem:[%s12347_s2 + $0x150] sm:$0xff]  ;;  %v9686_v26 = vpop.f32.mrf.mxu0  ;;  %v2449_v51 = vld [vmem:[%s12350_s5 + $0x98] sm:$0xff] }
 0x1b1   : > { %2056 = vmatpush1.msra.mxu1 %v9126_v29  ;;  %2218 = vmatpush1.msra.mxu0 %v887_v52  ;;  %v7284_v29 = vld [vmem:[%s12347_s2 + $0x190] sm:$0xff] }
 0x1b2   : > { %1771 = vmatprep.mubr.f32.mxu1 %v12363_v12  ;;  %1933 = vmatprep.mubr.f32.mxu0 %v12363_v12  ;;  %v9700_v33 = vpop.f32.mrf.mxu0 }
 0x1b3   : > { %7275 = vmatmul.mubr.msk.f32.gmra.mxu1 %vm716_vm0, %v7267_v53  ;;  %7291 = vmatmul.mubr.msk.f32.gmra.mxu0 %vm716_vm0, %v7283_v23  ;;  %v2433_v53 = vld [vmem:[%s12350_s5 + $0x18] sm:$0xff]  ;;  %v2448_v23 = vld [vmem:[%s12350_s5 + $0x90] sm:$0xff] }
 0x1b4   : > { %1777 = vmatprep.mubr.f32.mxu1 %v12363_v12  ;;  %1939 = vmatprep.mubr.f32.mxu0 %v12363_v12  ;;  %v9714_v7 = vpop.f32.mrf.mxu0 }
 0x1b5   : > { %7573 = vmatprep.subr.mxu1 %v2461_v25 }
 0x1b6   : > { %v9728_v38 = vpop.f32.mrf.mxu0 }
 0x1b7   : > { %7276 = vmatmul.mubr.msk.f32.gmra.mxu1 %vm716_vm0, %v7268_v46  ;;  %7292 = vmatmul.mubr.msk.f32.gmra.mxu0 %vm716_vm0, %v7284_v29  ;;  %v2432_v46 = vld [vmem:[%s12350_s5 + $0x10] sm:$0xff] }
 0x1b8   : > { %1783 = vmatprep.mubr.f32.mxu1 %v12363_v12  ;;  %1945 = vmatprep.mubr.f32.mxu0 %v12363_v12  ;;  %v1010_v42 = vpop.f32.mrf.mxu0 }
 0x1ba   : > { %v9754_v47 = vpop.f32.mrf.mxu0 }
 0x1bb   : > { %7277 = vmatmul.mubr.msk.f32.gmra.mxu1 %vm716_vm0, %v7269_v55  ;;  %7293 = vmatmul.mubr.msk.f32.gmra.mxu0 %vm716_vm0, %v7285_v57  ;;  %v2447_v55 = vld [vmem:[%s12350_s5 + $0x88] sm:$0xff] }
 0x1bc   : > { %1789 = vmatprep.mubr.f32.mxu1 %v12363_v12  ;;  %1951 = vmatprep.mubr.f32.mxu0 %v12363_v12  ;;  %v1016_v52 = vpop.f32.mrf.mxu0  ;;  %v2431_v57 = vld [vmem:[%s12350_s5 + $0x8] sm:$0xff] }
 0x1be   : > { %v9777_v29 = vpop.f32.mrf.mxu0 }
 0x1bf   : > { %7278 = vmatmul.mubr.msk.f32.gmra.mxu1 %vm716_vm0, %v7270_v58  ;;  %7294 = vmatmul.mubr.msk.f32.gmra.mxu0 %vm716_vm0, %v7286_v59  ;;  %v2446_v58 = vld [vmem:[%s12350_s5 + $0x80] sm:$0xff] }
 0x1c0   : > { %1795 = vmatprep.mubr.f32.mxu1 %v12363_v12  ;;  %1957 = vmatprep.mubr.f32.mxu0 %v12363_v12  ;;  %v2430_v59 = vld [vmem:[%s12350_s5] sm:$0xff] }
 0x1c3   : > { %7279 = vmatmul.mubr.msk.f32.gmra.mxu1 %vm716_vm0, %v7271_v60  ;;  %7295 = vmatmul.mubr.msk.f32.gmra.mxu0 %vm716_vm0, %v7287_v61  ;;  %v1022_v60 = vpop.f32.mrf.mxu0  ;;  %v1034_v61 = vpop.f32.mrf.mxu1 }
 0x1c4   : > { %1801 = vmatprep.mubr.f32.mxu1 %v12363_v12  ;;  %1963 = vmatprep.mubr.f32.mxu0 %v12363_v12 }
 0x1c7   : > { %7280 = vmatmul.mubr.msk.f32.gmra.mxu1 %vm716_vm0, %v7272_v62  ;;  %7296 = vmatmul.mubr.msk.f32.gmra.mxu0 %vm716_vm0, %v7288_v63  ;;  %v9791_v62 = vpop.f32.mrf.mxu0  ;;  %v9793_v63 = vpop.f32.mrf.mxu1 }
 0x1c8   : > { %1807 = vmatprep.mubr.f32.mxu1 %v12363_v12  ;;  %1969 = vmatprep.mubr.f32.mxu0 %v12363_v12 }
 0x1cb   : > { %7281 = vmatmul.mubr.msk.f32.gmra.mxu1 %vm716_vm0, %v7273_v0  ;;  %7297 = vmatmul.mubr.msk.f32.gmra.mxu0 %vm716_vm0, %v7289_v1  ;;  %v1028_v0 = vpop.f32.mrf.mxu0  ;;  %v1040_v1 = vpop.f32.mrf.mxu1 }
 0x1cc   : > { %2089 = vmatprep.mubr.f32.mxu1 %v12363_v12  ;;  %2251 = vmatprep.mubr.f32.mxu0 %v12363_v12 }
 0x1cf   : > { %7306 = vmatmul.mubr.msk.f32.vlgmr.msra.gmra.mxu1 %vm716_vm0, %v7298_v2  ;;  %7322 = vmatmul.mubr.msk.f32.vlgmr.msra.gmra.mxu0 %vm716_vm0, %v7314_v3  ;;  %v9795_v2 = vpop.f32.mrf.mxu0  ;;  %v9797_v3 = vpop.f32.mrf.mxu1 }
 0x1d0   : > { %2095 = vmatprep.mubr.f32.mxu1 %v12363_v12  ;;  %2257 = vmatprep.mubr.f32.mxu0 %v12363_v12 }
 0x1d1   : > { %7574 = vmatpush3.msra.mxu1 %v2445_v27 }
 0x1d2   : > { %7575 = vmatprep.subr.mxu1 %v2460_v30 }
 0x1d3   : > { %7307 = vmatmul.mubr.msk.f32.gmra.mxu1 %vm716_vm0, %v7299_v4  ;;  %7323 = vmatmul.mubr.msk.f32.gmra.mxu0 %vm716_vm0, %v7315_v5 }
 0x1d4   : > { %2101 = vmatprep.mubr.f32.mxu1 %v12363_v12  ;;  %2263 = vmatprep.mubr.f32.mxu0 %v12363_v12 }
 0x1d5   : > { %7576 = vmatpush3.msra.mxu1 %v2444_v31 }
 0x1d6   : > { %7577 = vmatprep.subr.mxu1 %v2459_v32 }
 0x1d7   : > { %7308 = vmatmul.mubr.msk.f32.gmra.mxu1 %vm716_vm0, %v7300_v8  ;;  %7324 = vmatmul.mubr.msk.f32.gmra.mxu0 %vm716_vm0, %v7316_v9 }
 0x1d8   : > { %2107 = vmatprep.mubr.f32.mxu1 %v12363_v12  ;;  %2269 = vmatprep.mubr.f32.mxu0 %v12363_v12 }
 0x1d9   : > { %7578 = vmatpush3.msra.mxu1 %v2443_v35 }
 0x1da   : > { %7579 = vmatprep.subr.mxu1 %v2458_v6 }
 0x1db   : > { %7309 = vmatmul.mubr.msk.f32.gmra.mxu1 %vm716_vm0, %v7301_v13  ;;  %7325 = vmatmul.mubr.msk.f32.gmra.mxu0 %vm716_vm0, %v7317_v15 }
 0x1dc   : > { %2113 = vmatprep.mubr.f32.mxu1 %v12363_v12  ;;  %2275 = vmatprep.mubr.f32.mxu0 %v12363_v12 }
 0x1dd   : > { %7580 = vmatpush3.msra.mxu1 %v2442_v28 }
 0x1de   : > { %7581 = vmatprep.subr.mxu1 %v2457_v34 }
 0x1df   : > { %7310 = vmatmul.mubr.msk.f32.gmra.mxu1 %vm716_vm0, %v7302_v16  ;;  %7326 = vmatmul.mubr.msk.f32.gmra.mxu0 %vm716_vm0, %v7318_v17 }
 0x1e0   : > { %2119 = vmatprep.mubr.f32.mxu1 %v12363_v12  ;;  %2281 = vmatprep.mubr.f32.mxu0 %v12363_v12 }
 0x1e1   : > { %7582 = vmatpush3.msra.mxu1 %v2441_v36 }
 0x1e2   : > { %7583 = vmatprep.subr.mxu1 %v2456_v54 }
 0x1e3   : > { %7311 = vmatmul.mubr.msk.f32.gmra.mxu1 %vm716_vm0, %v7303_v18  ;;  %7327 = vmatmul.mubr.msk.f32.gmra.mxu0 %vm716_vm0, %v7319_v19 }
 0x1e4   : > { %2125 = vmatprep.mubr.f32.mxu1 %v12363_v12  ;;  %2287 = vmatprep.mubr.f32.mxu0 %v12363_v12 }
 0x1e5   : > { %7584 = vmatpush3.msra.mxu1 %v2440_v37 }
 0x1e6   : > { %7585 = vmatprep.subr.mxu1 %v2455_v56 }
 0x1e7   : > { %7312 = vmatmul.mubr.msk.f32.gmra.mxu1 %vm716_vm0, %v7304_v20  ;;  %7328 = vmatmul.mubr.msk.f32.gmra.mxu0 %vm716_vm0, %v7320_v21 }
 0x1e8   : > { %2131 = vmatprep.mubr.f32.mxu1 %v12363_v12  ;;  %2293 = vmatprep.mubr.f32.mxu0 %v12363_v12 }
 0x1e9   : > { %7586 = vmatpush3.msra.mxu1 %v2439_v44 }
 0x1ea   : > { %7587 = vmatprep.subr.mxu1 %v2454_v39 }
 0x1eb   : > { %7313 = vmatmul.mubr.msk.f32.gmra.mxu1 %vm716_vm0, %v7305_v22  ;;  %7329 = vmatmul.mubr.msk.f32.gmra.mxu0 %vm716_vm0, %v7321_v24 }
 0x1ec   : > { %7588 = vmatpush3.msra.mxu1 %v2438_v40 }
 0x1ed   : > { %7589 = vmatprep.subr.mxu1 %v2453_v41 }
 0x1ee   : > { %7590 = vmatpush3.msra.mxu1 %v2437_v10 }
 0x1ef   : > { %7591 = vmatprep.subr.mxu1 %v2452_v11 }
 0x1f0   : > { %7592 = vmatpush3.msra.mxu1 %v2436_v43 }
 0x1f1   : > { %7593 = vmatprep.subr.mxu1 %v2451_v45 }
 0x1f2   : > { %7594 = vmatpush3.msra.mxu1 %v2435_v48 }
 0x1f3   : > { %7595 = vmatprep.subr.mxu1 %v2450_v49 }
 0x1f4   : > { %7596 = vmatpush3.msra.mxu1 %v2434_v50 }
 0x1f5   : > { %7597 = vmatprep.subr.mxu1 %v2449_v51 }
 0x1f6   : > { %7598 = vmatpush3.msra.mxu1 %v2433_v53 }
 0x1f7   : > { %7599 = vmatprep.subr.mxu1 %v2448_v23 }
 0x1f8   : > { %7600 = vmatpush3.msra.mxu1 %v2432_v46 }
 0x1f9   : > { %7601 = vmatprep.subr.mxu1 %v2447_v55 }
 0x1fa   : > { %7602 = vmatpush3.msra.mxu1 %v2431_v57 }
 0x1fb   : > { %7603 = vmatprep.subr.mxu1 %v2446_v58 }
 0x1fc   : > { %7604 = vmatpush3.msra.mxu1 %v2430_v59 }
 0x22c   : > { %v1135_v4 = vpop.f32.mrf.mxu1  ;;  %v1281_v5 = vpop.f32.mrf.mxu0 }
 0x22d   : > { %v1136_v8 = vadd.f32 %v1135_v4, %v9686_v26 }
 0x22e   : > { %v9800_v9 = vpop.f32.mrf.mxu1  ;;  %v9802_v13 = vpop.f32.mrf.mxu0 }
 0x22f   : > { %v9804_v15 = vadd.f32 %v1281_v5, %v1136_v8 }
 0x230   : > { %v1141_v16 = vpop.f32.mrf.mxu1  ;;  %v1287_v17 = vpop.f32.mrf.mxu0 }
 0x231   : > { %v1142_v18 = vadd.f32 %v1141_v16, %v9714_v7 }
 0x232   : > { %v9807_v19 = vpop.f32.mrf.mxu1  ;;  %v9809_v20 = vpop.f32.mrf.mxu0 }
 0x233   : > { %v9811_v21 = vadd.f32 %v1287_v17, %v1142_v18 }
 0x234   : > { %v1147_v22 = vpop.f32.mrf.mxu1  ;;  %v1293_v24 = vpop.f32.mrf.mxu0 }
 0x235   : > { %v1148_v25 = vadd.f32 %v1147_v22, %v1010_v42 }
 0x236   : > { %v9813_v26 = vpop.f32.mrf.mxu1  ;;  %v9815_v27 = vpop.f32.mrf.mxu0 }
 0x237   : > { %v9817_v30 = vadd.f32 %v1293_v24, %v1148_v25 }
 0x238   : > { %v1153_v31 = vpop.f32.mrf.mxu1  ;;  %v1299_v32 = vpop.f32.mrf.mxu0 }
 0x239   : > { %v1154_v35 = vadd.f32 %v1153_v31, %v1016_v52 }
 0x23a   : > { %v9819_v6 = vpop.f32.mrf.mxu1  ;;  %v9821_v28 = vpop.f32.mrf.mxu0 }
 0x23b   : > { %v9823_v34 = vadd.f32 %v1299_v32, %v1154_v35 }
 0x23c   : > { %v1159_v7 = vpop.f32.mrf.mxu1  ;;  %v1305_v36 = vpop.f32.mrf.mxu0 }
 0x23d   : > { %v1160_v54 = vadd.f32 %v1159_v7, %v1022_v60 }
 0x23e   : > { %v9825_v37 = vpop.f32.mrf.mxu1  ;;  %v9827_v56 = vpop.f32.mrf.mxu0 }
 0x23f   : > { %v9829_v44 = vadd.f32 %v1305_v36, %v1160_v54 }
 0x240   : > { %v1165_v39 = vpop.f32.mrf.mxu1  ;;  %v1311_v40 = vpop.f32.mrf.mxu0 }
 0x241   : > { %v1166_v41 = vadd.f32 %v1165_v39, %v1028_v0 }
 0x242   : > { %v9831_v42 = vpop.f32.mrf.mxu1  ;;  %v9833_v10 = vpop.f32.mrf.mxu0 }
 0x243   : > { %v9835_v11 = vadd.f32 %v1311_v40, %v1166_v41 }
 0x244   : > { %v1171_v43 = vpop.f32.mrf.mxu1  ;;  %v1317_v45 = vpop.f32.mrf.mxu0 }
 0x245   : > { %v1172_v48 = vadd.f32 %v1171_v43, %v1034_v61 }
 0x246   : > { %v9837_v49 = vpop.f32.mrf.mxu1  ;;  %v9839_v50 = vpop.f32.mrf.mxu0 }
 0x247   : > { %v9841_v51 = vadd.f32 %v1317_v45, %v1172_v48 }
 0x248   : > { %v1177_v52 = vpop.f32.mrf.mxu1  ;;  %v1323_v53 = vpop.f32.mrf.mxu0 }
 0x249   : > { %12436 = vst [vmem:[#allocation17_spill] sm:$0xff] %v9841_v51  ;;  %v1178_v23 = vadd.f32 %v1177_v52, %v1040_v1 }
 0x24a   : > { %v9843_v46 = vpop.f32.mrf.mxu1  ;;  %v9845_v55 = vpop.f32.mrf.mxu0 }
 0x24b   : > { %v9847_v57 = vadd.f32 %v1323_v53, %v1178_v23 }
 0x24c   : > { %v1443_v58 = vpop.f32.mrf.mxu1  ;;  %v9849_v59 = vpop.f32.mrf.mxu0 }
 0x24d   : > { %12437 = vst [vmem:[#allocation18_spill] sm:$0xff] %v9847_v57 }
 0x24e   : > { %v1445_v60 = vpop.f32.mrf.mxu1  ;;  %v9851_v61 = vpop.f32.mrf.mxu0 }
 0x252   : > { %v9853_v0 = vpop.f32.mrf.mxu1  ;;  %v9855_v4 = vpop.f32.mrf.mxu0 }
 0x254   : > { %v9857_v5 = vpop.f32.mrf.mxu1  ;;  %v9859_v8 = vpop.f32.mrf.mxu0 }
 0x256   : > { %v9861_v1 = vpop.f32.mrf.mxu1  ;;  %v9863_v16 = vpop.f32.mrf.mxu0 }
 0x258   : > { %v9865_v17 = vpop.f32.mrf.mxu1  ;;  %v9867_v18 = vpop.f32.mrf.mxu0 }
 0x25a   : > { %v9869_v22 = vpop.f32.mrf.mxu1  ;;  %v9871_v24 = vpop.f32.mrf.mxu0 }
 0x25c   : > { %v9873_v25 = vpop.f32.mrf.mxu1  ;;  %v9875_v31 = vpop.f32.mrf.mxu0 }
 0x25e   : > { %v9877_v32 = vpop.f32.mrf.mxu1  ;;  %v9879_v35 = vpop.f32.mrf.mxu0 }
 0x25f   : > { %12438 = vst [vmem:[#allocation19_spill] sm:$0xff] %v9879_v35 }
 0x260   : > { %v9881_v7 = vpop.f32.mrf.mxu1  ;;  %v9883_v36 = vpop.f32.mrf.mxu0 }
 0x261   : > { %12439 = vst [vmem:[#allocation20_spill] sm:$0xff] %v9883_v36 }
 0x262   : > { %v9885_v54 = vpop.f32.mrf.mxu1  ;;  %v9887_v39 = vpop.f32.mrf.mxu0 }
 0x263   : > { %12440 = vst [vmem:[#allocation21_spill] sm:$0xff] %v9887_v39 }
 0x264   : > { %v9889_v40 = vpop.f32.mrf.mxu1  ;;  %v9891_v41 = vpop.f32.mrf.mxu0 }
 0x265   : > { %12441 = vst [vmem:[#allocation22_spill] sm:$0xff] %v9889_v40  ;;  %12442 = vst [vmem:[#allocation23_spill] sm:$0xff] %v9891_v41 }
 0x266   : > { %v9893_v43 = vpop.f32.mrf.mxu1  ;;  %v9895_v45 = vpop.f32.mrf.mxu0 }
 0x267   : > { %12443 = vst [vmem:[#allocation24_spill] sm:$0xff] %v9893_v43  ;;  %12444 = vst [vmem:[#allocation25_spill] sm:$0xff] %v9895_v45 }
 0x268   : > { %v9897_v48 = vpop.f32.mrf.mxu1  ;;  %v9899_v52 = vpop.f32.mrf.mxu0 }
 0x269   : > { %12445 = vst [vmem:[#allocation26_spill] sm:$0xff] %v9897_v48  ;;  %12446 = vst [vmem:[#allocation27_spill] sm:$0xff] %v9899_v52 }
 0x26a   : > { %v9901_v53 = vpop.f32.mrf.mxu1  ;;  %v9903_v23 = vpop.f32.mrf.mxu0 }
 0x26b   : > { %12447 = vst [vmem:[#allocation28_spill] sm:$0xff] %v9901_v53  ;;  %12448 = vst [vmem:[#allocation29_spill] sm:$0xff] %v9903_v23 }
 0x26c   : > { %v9905_v12 = vpop.f32.mrf.mxu1  ;;  %v9907_v14 = vpop.f32.mrf.mxu0 }
 0x26d   : > { %12449 = vst [vmem:[#allocation30_spill] sm:$0xff] %v9905_v12  ;;  %12450 = vst [vmem:[#allocation31_spill] sm:$0xff] %v9907_v14 }
 0x26e   : > { %v1767_v39 = vpop.f32.mrf.mxu1  ;;  %v9909_v36 = vpop.f32.mrf.mxu0 }
 0x270   : > { %v1769_v41 = vpop.f32.mrf.mxu1  ;;  %v9911_v57 = vpop.f32.mrf.mxu0 }
 0x271   : > { %12451 = vst [vmem:[#allocation32_spill] sm:$0xff] %v9911_v57 }
 0x273   : > { %v1773_v35 = vpop.f32.mrf.mxu1  ;;  %v9913_v45 = vpop.f32.mrf.mxu0 }
 0x274   : > { %12452 = vst [vmem:[#allocation33_spill] sm:$0xff] %v9913_v45  ;;  %v1138_v45 = vadd.f32 %v9800_v9, %v9700_v33  ;;  %v1156_v33 = vadd.f32 %v9819_v6, %v9777_v29  ;;  %v1490_v9 = vadd.f32 %v1443_v58, %v9804_v15  ;;  %v1168_v15 = vadd.f32 %v9831_v42, %v9795_v2 }
 0x275   : > { %v9915_v48 = vpop.f32.mrf.mxu1  ;;  %v9917_v52 = vpop.f32.mrf.mxu0 }
 0x276   : > { %12453 = vst [vmem:[#allocation34_spill] sm:$0xff] %v9917_v52 }
 0x277   : > { %v9919_v53 = vpop.f32.mrf.mxu1  ;;  %v9921_v23 = vpop.f32.mrf.mxu0 }
 0x278   : > { %12454 = vst [vmem:[#allocation35_spill] sm:$0xff] %v9919_v53  ;;  %12455 = vst [vmem:[#allocation36_spill] sm:$0xff] %v9921_v23 }
 0x279   : > { %v9923_v12 = vpop.f32.mrf.mxu1  ;;  %v9925_v14 = vpop.f32.mrf.mxu0 }
 0x27a   : > { %12456 = vst [vmem:[#allocation37_spill] sm:$0xff] %v9923_v12  ;;  %12457 = vst [vmem:[#allocation38_spill] sm:$0xff] %v9925_v14  ;;  %v1329_v14 = vadd.f32 %v9802_v13, %v1138_v45 }
 0x27b   : > { %v9927_v43 = vpop.f32.mrf.mxu1  ;;  %v9929_v51 = vpop.f32.mrf.mxu0 }
 0x27c   : > { %12458 = vst [vmem:[#allocation39_spill] sm:$0xff] %v9927_v43  ;;  %12459 = vst [vmem:[#allocation40_spill] sm:$0xff] %v9929_v51  ;;  %v1144_v51 = vadd.f32 %v9807_v19, %v9728_v38 }
 0x27d   : > { %v9931_v57 = vpop.f32.mrf.mxu1  ;;  %v9933_v40 = vpop.f32.mrf.mxu0 }
 0x27e   : > { %12460 = vst [vmem:[#allocation41_spill] sm:$0xff] %v9931_v57  ;;  %12461 = vst [vmem:[#allocation42_spill] sm:$0xff] %v9933_v40  ;;  %v1150_v57 = vadd.f32 %v9813_v26, %v9754_v47  ;;  %v1331_v38 = vadd.f32 %v9809_v20, %v1144_v51  ;;  %v1162_v47 = vadd.f32 %v9825_v37, %v9791_v62 }
 0x27f   : > { %v9937_v52 = vpop.f32.mrf.mxu1  ;;  %v9939_v53 = vpop.f32.mrf.mxu0  ;;  %v1492_v26 = vadd.f32 %v9853_v0, %v9811_v21  ;;  %v1174_v20 = vadd.f32 %v9837_v49, %v9793_v63  ;;  %v1180_v62 = vadd.f32 %v9843_v46, %v9797_v3  ;;  %v1494_v37 = vadd.f32 %v9861_v1, %v9817_v30 }
 0x280   : > { %12462 = vst [vmem:[#allocation43_spill] sm:$0xff] %v9939_v53  ;;  %v1491_v53 = vadd.f32 %v1445_v60, %v1329_v14  ;;  %v1333_v19 = vadd.f32 %v9815_v27, %v1150_v57  ;;  %v1335_v14 = vadd.f32 %v9821_v28, %v1156_v33  ;;  %v1652_v27 = vadd.f32 %v9849_v59, %v1490_v9  ;;  %v12467_v33 = vld [vmem:[#allocation19_spill] sm:$0xff]  ;;  %v12468_v9 = vld [vmem:[#allocation32_spill] sm:$0xff] }
 0x281   : > { %v9941_v23 = vpop.f32.mrf.mxu1  ;;  %v9943_v12 = vpop.f32.mrf.mxu0  ;;  %v1493_v21 = vadd.f32 %v9857_v5, %v1331_v38  ;;  %v1496_v63 = vadd.f32 %v9869_v22, %v9823_v34  ;;  %v1337_v3 = vadd.f32 %v9827_v56, %v1162_v47  ;;  %v1654_v46 = vadd.f32 %v9855_v4, %v1492_v26  ;;  %v12471_v47 = vld [vmem:[#allocation28_spill] sm:$0xff] }
 0x282   : > { %12463 = vst [vmem:[#allocation44_spill] sm:$0xff] %v9943_v12  ;;  %v1653_v6 = vadd.f32 %v9851_v61, %v1491_v53  ;;  %v1495_v2 = vadd.f32 %v9865_v17, %v1333_v19  ;;  %v1497_v42 = vadd.f32 %v9873_v25, %v1335_v14  ;;  %v1814_v49 = vadd.f32 %v1767_v39, %v1652_v27  ;;  %v12473_v14 = vld [vmem:[#allocation33_spill] sm:$0xff] }
 0x283   : > { %v9950_v40 = vpop.f32.mrf.mxu1  ;;  %v9952_v43 = vpop.f32.mrf.mxu0  ;;  %v9997_v30 = vstv %s2380_s4  ;;  %v1339_v59 = vadd.f32 %v9833_v10, %v1168_v15  ;;  %v1341_v60 = vadd.f32 %v9839_v50, %v1174_v20  ;;  %v1498_v34 = vadd.f32 %v9877_v32, %v9829_v44  ;;  %v12465_v32 = vld [vmem:[#allocation17_spill] sm:$0xff] }
 0x284   : > { %v1815_v61 = vadd.f32 %v1769_v41, %v1653_v6  ;;  %v1343_v0 = vadd.f32 %v9845_v55, %v1180_v62  ;;  %v1655_v56 = vadd.f32 %v9859_v8, %v1493_v21  ;;  %v1656_v4 = vadd.f32 %v9863_v16, %v1494_v37  ;;  %v12464_v8 = vld [vmem:[#allocation22_spill] sm:$0xff]  ;;  %v12474_v62 = vld [vmem:[#allocation35_spill] sm:$0xff]  ;;  %v12475_v21 = vld [vmem:[#allocation37_spill] sm:$0xff] }
 0x285   : > { %v9957_v12 = vpop.f32.mrf.mxu1  ;;  %v9959_v13 = vpop.f32.mrf.mxu0  ;;  %v1816_v5 = vadd.f32 %v1773_v35, %v1654_v46  ;;  %v1657_v22 = vadd.f32 %v9867_v18, %v1495_v2  ;;  %v1658_v10 = vadd.f32 %v9871_v24, %v1496_v63  ;;  %v1659_v50 = vadd.f32 %v9875_v31, %v1497_v42  ;;  %v12466_v35 = vld [vmem:[#allocation24_spill] sm:$0xff]  ;;  %v12477_v46 = vld [vmem:[#allocation21_spill] sm:$0xff] }
 0x286   : > { %v1976_v44 = vadd.f32 %v9909_v36, %v1814_v49  ;;  %v1499_v25 = vadd.f32 %v9881_v7, %v1337_v3  ;;  %v1500_v55 = vadd.f32 %v9885_v54, %v9835_v11  ;;  %v1501_v16 = vadd.f32 %v12464_v8, %v1339_v59  ;;  %v12469_v36 = vld [vmem:[#allocation26_spill] sm:$0xff]  ;;  %v2327_v2 = vpop.permute.xlu0 %2326  ;;  %v12476_v49 = vld [vmem:[#allocation20_spill] sm:$0xff] }
 0x287   : > { %v9967_v45 = vpop.f32.mrf.mxu1  ;;  %v9969_v29 = vpop.f32.mrf.mxu0  ;;  %v1502_v39 = vadd.f32 %v12466_v35, %v12465_v32  ;;  %v1660_v18 = vadd.f32 %v12467_v33, %v1498_v34  ;;  %v1977_v24 = vadd.f32 %v12468_v9, %v1815_v61  ;;  %v1817_v31 = vadd.f32 %v9915_v48, %v1655_v56  ;;  %v12470_v7 = vld [vmem:[#allocation18_spill] sm:$0xff]  ;;  %v12479_v61 = vld [vmem:[#allocation25_spill] sm:$0xff]  ;;  %v12481_v35 = vld [vmem:[#allocation27_spill] sm:$0xff] }
 0x288   : > { %v1503_v19 = vadd.f32 %v12469_v36, %v1341_v60  ;;  %v1504_v26 = vadd.f32 %v12471_v47, %v12470_v7  ;;  %v12472_v11 = vld [vmem:[#allocation30_spill] sm:$0xff]  ;;  %v1978_v15 = vadd.f32 %v12473_v14, %v1816_v5  ;;  %v1818_v6 = vadd.f32 %v12474_v62, %v1656_v4  ;;  %v2332_v48 = vpop.permute.xlu1 %2331  ;;  %v12478_v60 = vld [vmem:[#allocation23_spill] sm:$0xff]  ;;  %v12487_v14 = vld [vmem:[#allocation41_spill] sm:$0xff] }
 0x289   : > { %v9983_v51 = vpop.f32.mrf.mxu1  ;;  %v9985_v28 = vpop.f32.mrf.mxu0  ;;  %v1505_v54 = vadd.f32 %v12472_v11, %v1343_v0  ;;  %v1819_v37 = vadd.f32 %v12475_v21, %v1657_v22  ;;  %v1661_v3 = vadd.f32 %v12476_v49, %v1499_v25  ;;  %v1662_v59 = vadd.f32 %v12477_v46, %v1500_v55  ;;  %v12483_v25 = vld [vmem:[#allocation31_spill] sm:$0xff]  ;;  %v12486_v7 = vld [vmem:[#allocation38_spill] sm:$0xff] }
 0x28a   : > { %v1663_v34 = vadd.f32 %v12478_v60, %v1501_v16  ;;  %v10034_v0 = vadd.f32 %v12479_v61, %v1502_v39  ;;  %v12484_v16 = vld [vmem:[#allocation39_spill] sm:$0xff] }
 0x28b   : > { %v9993_v57 = vpop.f32.mrf.mxu1  ;;  %v9995_v58 = vpop.f32.mrf.mxu0  ;;  %v10044_v55 = vadd.f32 %v12483_v25, %v1505_v54  ;;  %v1820_v9 = vadd.f32 %v12484_v16, %v1658_v10  ;;  %v1824_v16 = vadd.f32 %v9950_v40, %v1662_v59 }
 0x28c   : > { %v2337_v21 = vpop.permute.xlu1 %2336 }
 0x28d   : > { %v10006_v1 = vpop.f32.mrf.mxu1  ;;  %v10008_v17 = vpop.f32.mrf.mxu0 }
 0x28f   : > { %v2091_v41 = vpop.f32.mrf.mxu1  ;;  %v2253_v53 = vpop.f32.mrf.mxu0 }
 0x290   : > { %v2138_v38 = vadd.f32 %v2091_v41, %v1976_v44  ;;  %v12480_v44 = vld [vmem:[#allocation34_spill] sm:$0xff]  ;;  %v10038_v41 = vadd.f32 %v12481_v35, %v1503_v19 }
 0x291   : > { %v2093_v20 = vpop.f32.mrf.mxu1  ;;  %v2255_v27 = vpop.f32.mrf.mxu0  ;;  %v1979_v8 = vadd.f32 %v12480_v44, %v1817_v31  ;;  %v1981_v31 = vadd.f32 %v12486_v7, %v1819_v37  ;;  %v1822_v37 = vadd.f32 %v9937_v52, %v1660_v18 }
 0x292   : > { %v2300_v63 = vadd.f32 %v2253_v53, %v2138_v38  ;;  %v2139_v42 = vadd.f32 %v2093_v20, %v1977_v24  ;;  %v12482_v53 = vld [vmem:[#allocation29_spill] sm:$0xff]  ;;  %v12485_v38 = vld [vmem:[#allocation36_spill] sm:$0xff] }
 0x293   : > { %v2097_v56 = vpop.f32.mrf.mxu1  ;;  %v2259_v5 = vpop.f32.mrf.mxu0  ;;  %v10041_v33 = vadd.f32 %v12482_v53, %v1504_v26  ;;  %v1980_v36 = vadd.f32 %v12485_v38, %v1818_v6  ;;  %v12491_v53 = vld [vmem:[#allocation44_spill] sm:$0xff] }
 0x294   : > { %v2364_v4 = vadd.f32 %v2327_v2, %v2300_v63  ;;  %v2301_v32 = vadd.f32 %v2255_v27, %v2139_v42  ;;  %v2140_v22 = vadd.f32 %v2097_v56, %v1978_v15  ;;  %v1821_v15 = vadd.f32 %v12487_v14, %v1659_v50  ;;  %v12488_v63 = vld [vmem:[#allocation40_spill] sm:$0xff]  ;;  %v2342_v38 = vpop.permute.xlu0 %2341 }
 0x295   : > { %v2099_v39 = vpop.f32.mrf.mxu1  ;;  %v2261_v24 = vpop.f32.mrf.mxu0  ;;  %v1982_v6 = vadd.f32 %v12488_v63, %v1820_v9 }
 0x296   : > { %v2365_v47 = vadd.f32 %v2327_v2, %v2301_v32  ;;  %v2141_v11 = vadd.f32 %v2099_v39, %v1979_v8  ;;  %vm2381_vm10 = vcmp.gt.f32.partialorder %v2364_v4, 0.0  ;;  %v2398_v19 = vmul.f32 %v9997_v30, %v2364_v4  ;;  %v2347_v63 = vpop.permute.xlu1 %2346 }
 0x297   : > { %v2302_v26 = vadd.f32 %v2259_v5, %v2140_v22  ;;  %v2103_v20 = vpop.f32.mrf.mxu1  ;;  %v2265_v27 = vpop.f32.mrf.mxu0  ;;  %v1823_v2 = vadd.f32 %v9941_v23, %v1661_v3  ;;  %v12489_v5 = vld [vmem:[#allocation42_spill] sm:$0xff]  ;;  %v12490_v3 = vld [vmem:[#allocation43_spill] sm:$0xff] }
 0x298   : > { %v2142_v54 = vadd.f32 %v2103_v20, %v1980_v36  ;;  %v2303_v62 = vadd.f32 %v2261_v24, %v2141_v11  ;;  %vm2382_vm11 = vcmp.gt.f32.partialorder %v2365_v47, 0.0  ;;  %v2399_v10 = vmul.f32 %v9997_v30, %v2365_v47 }
 0x299   : > { %v2366_v42 = vadd.f32 %v2332_v48, %v2302_v26  ;;  %v2105_v50 = vpop.f32.mrf.mxu1  ;;  %v2267_v49 = vpop.f32.mrf.mxu0  ;;  %v1983_v44 = vadd.f32 %v12489_v5, %v1821_v15  ;;  %v2414_v32 = vsel %vm2381_vm10, %v2364_v4, %v2398_v19  ;;  %v1985_v25 = vadd.f32 %v12491_v53, %v1823_v2 }
 0x29a   : > { %v2367_v46 = vadd.f32 %v2332_v48, %v2303_v62  ;;  %v2143_v60 = vadd.f32 %v2105_v50, %v1981_v31  ;;  %v2304_v61 = vadd.f32 %v2265_v27, %v2142_v54  ;;  %v2415_v56 = vsel %vm2382_vm11, %v2365_v47, %v2399_v10 }
 0x29b   : > { %v2109_v8 = vpop.f32.mrf.mxu1  ;;  %2526 = vmatprep.mubr.f32.mxu1 %v2415_v56  ;;  %v2271_v22 = vpop.f32.mrf.mxu0  ;;  %vm2383_vm12 = vcmp.gt.f32.partialorder %v2366_v42, 0.0  ;;  %v2400_v35 = vmul.f32 %v9997_v30, %v2366_v42  ;;  %v1984_v48 = vadd.f32 %v12490_v3, %v1822_v37  ;;  %v1825_v4 = vadd.f32 %v9957_v12, %v1663_v34 }
 0x29c   : > { %v2368_v52 = vadd.f32 %v2337_v21, %v2304_v61  ;;  %v2144_v18 = vadd.f32 %v2109_v8, %v1982_v6  ;;  %v2305_v23 = vadd.f32 %v2267_v49, %v2143_v60  ;;  %2527 = vmatmul.mubr.f32.vlgmr.msra.gmra.mxu1 %v2414_v32  ;;  %vm2384_vm13 = vcmp.gt.f32.partialorder %v2367_v46, 0.0 }
 0x29d   : > { %v2111_v9 = vpop.f32.mrf.mxu1  ;;  %v2273_v39 = vpop.f32.mrf.mxu0  ;;  %v2401_v24 = vmul.f32 %v9997_v30, %v2367_v46  ;;  %v2416_v14 = vsel %vm2383_vm12, %v2366_v42, %v2400_v35  ;;  %v1986_v20 = vadd.f32 %v9952_v43, %v1824_v16  ;;  %v1826_v12 = vadd.f32 %v9967_v45, %v10034_v0 }
 0x29e   : > { %v2369_v36 = vadd.f32 %v2337_v21, %v2305_v23  ;;  %v2145_v7 = vadd.f32 %v2111_v9, %v1983_v44  ;;  %v2306_v31 = vadd.f32 %v2271_v22, %v2144_v18  ;;  %vm2385_vm14 = vcmp.gt.f32.partialorder %v2368_v52, 0.0  ;;  %v2352_v44 = vpop.permute.xlu0 %2351 }
 0x29f   : > { %v2115_v47 = vpop.f32.mrf.mxu1  ;;  %v2417_v11 = vsel %vm2384_vm13, %v2367_v46, %v2401_v24  ;;  %v2277_v15 = vpop.f32.mrf.mxu0  ;;  %v2402_v19 = vmul.f32 %v9997_v30, %v2368_v52  ;;  %v1827_v34 = vadd.f32 %v9983_v51, %v10038_v41  ;;  %v1987_v21 = vadd.f32 %v9959_v13, %v1825_v4 }
 0x2a0   : > { %v2370_v26 = vadd.f32 %v2342_v38, %v2306_v31  ;;  %v2146_v40 = vadd.f32 %v2115_v47, %v1984_v48  ;;  %v2307_v59 = vadd.f32 %v2273_v39, %v2145_v7  ;;  %2531 = vmatprep.mubr.f32.mxu1 %v2417_v11  ;;  %vm2386_vm15 = vcmp.gt.f32.partialorder %v2369_v36, 0.0 }
 0x2a1   : > { %2532 = vmatmul.mubr.f32.gmra.mxu1 %v2416_v14  ;;  %v2117_v27 = vpop.f32.mrf.mxu1  ;;  %v2279_v54 = vpop.f32.mrf.mxu0  ;;  %v2403_v62 = vmul.f32 %v9997_v30, %v2369_v36  ;;  %v2418_v43 = vsel %vm2385_vm14, %v2368_v52, %v2402_v19  ;;  %v1988_v49 = vadd.f32 %v9969_v29, %v1826_v12  ;;  %v1989_v13 = vadd.f32 %v9985_v28, %v1827_v34 }
 0x2a2   : > { %v2371_v10 = vadd.f32 %v2342_v38, %v2307_v59  ;;  %v2147_v6 = vadd.f32 %v2117_v27, %v1985_v25  ;;  %v2308_v37 = vadd.f32 %v2277_v15, %v2146_v40  ;;  %vm2387_vm1 = vcmp.gt.f32.partialorder %v2370_v26, 0.0  ;;  %v2357_v25 = vpop.permute.xlu1 %2356  ;;  %v2362_v40 = vpop.permute.xlu0 %2361 }
 0x2a3   : > { %v2121_v2 = vpop.f32.mrf.mxu1  ;;  %v2419_v42 = vsel %vm2386_vm15, %v2369_v36, %v2403_v62  ;;  %v2283_v50 = vpop.f32.mrf.mxu0  ;;  %v2404_v45 = vmul.f32 %v9997_v30, %v2370_v26  ;;  %v1828_v46 = vadd.f32 %v9993_v57, %v10041_v33  ;;  %v1829_v5 = vadd.f32 %v10006_v1, %v10044_v55 }
 0x2a4   : > { %v2372_v51 = vadd.f32 %v2347_v63, %v2308_v37  ;;  %v2148_v0 = vadd.f32 %v2121_v2, %v1986_v20  ;;  %v2309_v41 = vadd.f32 %v2279_v54, %v2147_v6  ;;  %2536 = vmatprep.mubr.f32.mxu1 %v2419_v42  ;;  %vm2388_vm2 = vcmp.gt.f32.partialorder %v2371_v10, 0.0 }
 0x2a5   : > { %2537 = vmatmul.mubr.f32.gmra.mxu1 %v2418_v43  ;;  %v2123_v60 = vpop.f32.mrf.mxu1  ;;  %v2285_v61 = vpop.f32.mrf.mxu0  ;;  %v2405_v56 = vmul.f32 %v9997_v30, %v2371_v10  ;;  %v2420_v29 = vsel %vm2387_vm1, %v2370_v26, %v2404_v45  ;;  %v1990_v3 = vadd.f32 %v9995_v58, %v1828_v46  ;;  %v1991_v53 = vadd.f32 %v10008_v17, %v1829_v5 }
 0x2a6   : > { %v2373_v8 = vadd.f32 %v2347_v63, %v2309_v41  ;;  %v2149_v32 = vadd.f32 %v2123_v60, %v1987_v21  ;;  %v2310_v22 = vadd.f32 %v2283_v50, %v2148_v0  ;;  %vm2389_vm3 = vcmp.gt.f32.partialorder %v2372_v51, 0.0 }
 0x2a7   : > { %v2127_v35 = vpop.f32.mrf.mxu1  ;;  %v2421_v52 = vsel %vm2388_vm2, %v2371_v10, %v2405_v56  ;;  %v2289_v28 = vpop.f32.mrf.mxu0  ;;  %v2406_v57 = vmul.f32 %v9997_v30, %v2372_v51  ;;  %vm2629_vm12 = vcmask 457728   ;;  %vm2686_vm13 = vcmask 64512  }
 0x2a8   : > { %v2374_v33 = vadd.f32 %v2352_v44, %v2310_v22  ;;  %v2150_v18 = vadd.f32 %v2127_v35, %v1988_v49  ;;  %v2311_v23 = vadd.f32 %v2285_v61, %v2149_v32  ;;  %2541 = vmatprep.mubr.f32.mxu1 %v2421_v52  ;;  %vm2390_vm4 = vcmp.gt.f32.partialorder %v2373_v8, 0.0 }
 0x2a9   : > { %2542 = vmatmul.mubr.f32.gmra.mxu1 %v2420_v29  ;;  %v2129_v1 = vpop.f32.mrf.mxu1  ;;  %v2291_v55 = vpop.f32.mrf.mxu0  ;;  %v2407_v48 = vmul.f32 %v9997_v30, %v2373_v8  ;;  %v2422_v38 = vsel %vm2389_vm3, %v2372_v51, %v2406_v57  ;;  %vm3137_vm1 = vcmask 523264   ;;  %vm2771_vm3 = vcmask 515072  }
 0x2aa   : > { %v2375_v16 = vadd.f32 %v2352_v44, %v2311_v23  ;;  %v2151_v9 = vadd.f32 %v2129_v1, %v1989_v13  ;;  %v2312_v39 = vadd.f32 %v2289_v28, %v2150_v18  ;;  %vm2391_vm6 = vcmp.gt.f32.partialorder %v2374_v33, 0.0 }
 0x2ab   : > { %v2133_v24 = vpop.f32.mrf.mxu1  ;;  %v2423_v4 = vsel %vm2390_vm4, %v2373_v8, %v2407_v48  ;;  %v2295_v36 = vpop.f32.mrf.mxu0  ;;  %v2408_v7 = vmul.f32 %v9997_v30, %v2374_v33 }
 0x2ac   : > { %v2376_v58 = vadd.f32 %v2357_v25, %v2312_v39  ;;  %v2152_v31 = vadd.f32 %v2133_v24, %v1990_v3  ;;  %v2313_v47 = vadd.f32 %v2291_v55, %v2151_v9  ;;  %2546 = vmatprep.mubr.f32.mxu1 %v2423_v4  ;;  %vm2392_vm7 = vcmp.gt.f32.partialorder %v2375_v16, 0.0 }
 0x2ad   : > { %2547 = vmatmul.mubr.f32.gmra.mxu1 %v2422_v38  ;;  %v2135_v11 = vpop.f32.mrf.mxu1  ;;  %v2297_v17 = vpop.f32.mrf.mxu0  ;;  %v2409_v14 = vmul.f32 %v9997_v30, %v2375_v16  ;;  %v2424_v20 = vsel %vm2391_vm6, %v2374_v33, %v2408_v7  ;;  %v12497_v33 = vld [vmem:[#allocation16_spill] sm:$0xff] }
 0x2ae   : > { %v2377_v15 = vadd.f32 %v2357_v25, %v2313_v47  ;;  %v2153_v19 = vadd.f32 %v2135_v11, %v1991_v53  ;;  %v2314_v26 = vadd.f32 %v2295_v36, %v2152_v31  ;;  %v2410_v12 = vmul.f32 %v9997_v30, %v2376_v58 }
 0x2af   : > { %v2425_v59 = vsel %vm2392_vm7, %v2375_v16, %v2409_v14  ;;  %vm2393_vm9 = vcmp.gt.f32.partialorder %v2376_v58, 0.0  ;;  %v2567_v18 = vshrl.u32 %v12497_v33, 3 }
 0x2b0   : > { %v2378_v34 = vadd.f32 %v2362_v40, %v2314_v26  ;;  %v2315_v27 = vadd.f32 %v2297_v17, %v2153_v19  ;;  %2551 = vmatprep.mubr.f32.mxu1 %v2425_v59  ;;  %vm2394_vm8 = vcmp.gt.f32.partialorder %v2377_v15, 0.0  ;;  %v2411_v54 = vmul.f32 %v9997_v30, %v2377_v15 }
 0x2b1   : > { %2552 = vmatmul.mubr.f32.gmra.mxu1 %v2424_v20  ;;  %v2426_v10 = vsel %vm2393_vm9, %v2376_v58, %v2410_v12  ;;  %vm10231_vm14 = vcmp.eq.s32.totalorder %v2567_v18, 7  ;;  %vm10249_vm15 = vcmp.eq.s32.totalorder %v2567_v18, 0 }
 0x2b2   : > { %v2379_v62 = vadd.f32 %v2362_v40, %v2315_v27  ;;  %v2427_v21 = vsel %vm2394_vm8, %v2377_v15, %v2411_v54  ;;  %v2412_v6 = vmul.f32 %v9997_v30, %v2378_v34  ;;  %vm2395_vm11 = vcmp.gt.f32.partialorder %v2378_v34, 0.0 }
 0x2b3   : > { %2556 = vmatprep.mubr.f32.mxu1 %v2427_v21 }
 0x2b4   : > { %vm2396_vm10 = vcmp.gt.f32.partialorder %v2379_v62, 0.0  ;;  %v2413_v63 = vmul.f32 %v9997_v30, %v2379_v62  ;;  %v2428_v2 = vsel %vm2395_vm11, %v2378_v34, %v2412_v6 }
 0x2b5   : > { %2557 = vmatmul.mubr.f32.gmra.mxu1 %v2426_v10 }
 0x2b6   : > { %v2429_v37 = vsel %vm2396_vm10, %v2379_v62, %v2413_v63 }
 0x2b7   : > { %2561 = vmatprep.mubr.f32.mxu1 %v2429_v37 }
 0x2b9   : > { %2562 = vmatmul.mubr.f32.gmra.mxu1 %v2428_v2 }
 0x35c   : > { %v7605_v42 = vpop.f32.mrf.mxu1 }
 0x35e   : > { %v7606_v43 = vpop.f32.mrf.mxu1 }
 0x35f   : > { %v10094_v50 = vadd.f32 %v7606_v43, %v7605_v42 }
 0x361   : > { %12492 = vst [vmem:[#allocation22_spill] sm:$0xff] %v10094_v50  ;;  %2605 = vrot.lane.b32.xlu0 %v10094_v50, %s8849_s26  ;;  %2581 = vrot.lane.b32.xlu1 %v10094_v50, %s8850_s30  ;;  %v7608_v30 = vpop.f32.mrf.mxu1 }
 0x363   : > { %v7609_v45 = vpop.f32.mrf.mxu1 }
 0x364   : > { %v10112_v51 = vadd.f32 %v7609_v45, %v7608_v30 }
 0x365   : > { %2662 = vrot.lane.b32.xlu0 %v10094_v50, %s8851_s21  ;;  %2638 = vrot.lane.b32.xlu1 %v10094_v50, %s8852_s23  ;;  %v7611_v0 = vpop.f32.mrf.mxu1 }
 0x366   : > { %12493 = vst [vmem:[#allocation17_spill] sm:$0xff] %v10112_v51 }
 0x367   : > { %v7612_v41 = vpop.f32.mrf.mxu1 }
 0x368   : > { %v10130_v49 = vadd.f32 %v7612_v41, %v7611_v0 }
 0x369   : > { %2880 = vrot.lane.b32.xlu0 %v10094_v50, %s8853_s27  ;;  %2856 = vrot.lane.b32.xlu1 %v10094_v50, %s8846_s1  ;;  %v7614_v13 = vpop.f32.mrf.mxu1 }
 0x36a   : > { %12494 = vst [vmem:[#allocation24_spill] sm:$0xff] %v10130_v49 }
 0x36b   : > { %v7615_v46 = vpop.f32.mrf.mxu1 }
 0x36c   : > { %v10148_v60 = vadd.f32 %v7615_v46, %v7614_v13 }
 0x36d   : > { %2936 = vrot.lane.b32.xlu0 %v10094_v50, %s8847_s0  ;;  %2912 = vrot.lane.b32.xlu1 %v10094_v50, %s8854_s28  ;;  %v7617_v61 = vpop.f32.mrf.mxu1 }
 0x36e   : > { %12495 = vst [vmem:[#allocation19_spill] sm:$0xff] %v10148_v60 }
 0x36f   : > { %v7618_v56 = vpop.f32.mrf.mxu1 }
 0x370   : > { %v10166_v5 = vadd.f32 %v7618_v56, %v7617_v61 }
 0x371   : > { %2607 = vrot.lane.b32.xlu0 %v10112_v51, %s8849_s26  ;;  %2583 = vrot.lane.b32.xlu1 %v10112_v51, %s8850_s30  ;;  %v7620_v44 = vpop.f32.mrf.mxu1 }
 0x372   : > { %12496 = vst [vmem:[#allocation32_spill] sm:$0xff] %v10166_v5 }
 0x373   : > { %v7621_v8 = vpop.f32.mrf.mxu1 }
 0x374   : > { %v10184_v32 = vadd.f32 %v7621_v8, %v7620_v44 }
 0x375   : > { %2664 = vrot.lane.b32.xlu0 %v10112_v51, %s8851_s21  ;;  %2640 = vrot.lane.b32.xlu1 %v10112_v51, %s8852_s23  ;;  %v7623_v22 = vpop.f32.mrf.mxu1 }
 0x377   : > { %v7624_v35 = vpop.f32.mrf.mxu1 }
 0x378   : > { %v10202_v52 = vadd.f32 %v7624_v35, %v7623_v22 }
 0x379   : > { %2882 = vrot.lane.b32.xlu0 %v10112_v51, %s8853_s27  ;;  %2858 = vrot.lane.b32.xlu1 %v10112_v51, %s8846_s1  ;;  %v7626_v29 = vpop.f32.mrf.mxu1 }
 0x37b   : > { %v7627_v28 = vpop.f32.mrf.mxu1 }
 0x37c   : > { %v10220_v57 = vadd.f32 %v7627_v28, %v7626_v29 }
 0x37d   : > { %2938 = vrot.lane.b32.xlu0 %v10112_v51, %s8847_s0  ;;  %2914 = vrot.lane.b32.xlu1 %v10112_v51, %s8854_s28 }
 0x381   : > { %2609 = vrot.lane.b32.xlu0 %v10130_v49, %s8849_s26  ;;  %2585 = vrot.lane.b32.xlu1 %v10130_v49, %s8850_s30 }
 0x385   : > { %2666 = vrot.lane.b32.xlu0 %v10130_v49, %s8851_s21  ;;  %2642 = vrot.lane.b32.xlu1 %v10130_v49, %s8852_s23 }
 0x389   : > { %2884 = vrot.lane.b32.xlu0 %v10130_v49, %s8853_s27  ;;  %2860 = vrot.lane.b32.xlu1 %v10130_v49, %s8846_s1 }
 0x38d   : > { %2940 = vrot.lane.b32.xlu0 %v10130_v49, %s8847_s0  ;;  %2916 = vrot.lane.b32.xlu1 %v10130_v49, %s8854_s28 }
 0x391   : > { %2611 = vrot.lane.b32.xlu0 %v10148_v60, %s8849_s26  ;;  %2587 = vrot.lane.b32.xlu1 %v10148_v60, %s8850_s30 }
 0x395   : > { %2668 = vrot.lane.b32.xlu0 %v10148_v60, %s8851_s21  ;;  %2644 = vrot.lane.b32.xlu1 %v10148_v60, %s8852_s23 }
 0x399   : > { %2886 = vrot.lane.b32.xlu0 %v10148_v60, %s8853_s27  ;;  %2862 = vrot.lane.b32.xlu1 %v10148_v60, %s8846_s1 }
 0x39d   : > { %2942 = vrot.lane.b32.xlu0 %v10148_v60, %s8847_s0  ;;  %2918 = vrot.lane.b32.xlu1 %v10148_v60, %s8854_s28 }
 0x3a1   : > { %2613 = vrot.lane.b32.xlu0 %v10166_v5, %s8849_s26  ;;  %2589 = vrot.lane.b32.xlu1 %v10166_v5, %s8850_s30 }
 0x3a5   : > { %2670 = vrot.lane.b32.xlu0 %v10166_v5, %s8851_s21  ;;  %2646 = vrot.lane.b32.xlu1 %v10166_v5, %s8852_s23 }
 0x3a9   : > { %2888 = vrot.lane.b32.xlu0 %v10166_v5, %s8853_s27  ;;  %2864 = vrot.lane.b32.xlu1 %v10166_v5, %s8846_s1 }
 0x3ad   : > { %2944 = vrot.lane.b32.xlu0 %v10166_v5, %s8847_s0  ;;  %2920 = vrot.lane.b32.xlu1 %v10166_v5, %s8854_s28 }
 0x3b1   : > { %2615 = vrot.lane.b32.xlu0 %v10184_v32, %s8849_s26  ;;  %2591 = vrot.lane.b32.xlu1 %v10184_v32, %s8850_s30 }
 0x3b5   : > { %2672 = vrot.lane.b32.xlu0 %v10184_v32, %s8851_s21  ;;  %2648 = vrot.lane.b32.xlu1 %v10184_v32, %s8852_s23 }
 0x3b9   : > { %2890 = vrot.lane.b32.xlu0 %v10184_v32, %s8853_s27  ;;  %2866 = vrot.lane.b32.xlu1 %v10184_v32, %s8846_s1 }
 0x3bd   : > { %2946 = vrot.lane.b32.xlu0 %v10184_v32, %s8847_s0  ;;  %2922 = vrot.lane.b32.xlu1 %v10184_v32, %s8854_s28 }
 0x3c1   : > { %2617 = vrot.lane.b32.xlu0 %v10202_v52, %s8849_s26  ;;  %2593 = vrot.lane.b32.xlu1 %v10202_v52, %s8850_s30 }
 0x3c5   : > { %2674 = vrot.lane.b32.xlu0 %v10202_v52, %s8851_s21  ;;  %2650 = vrot.lane.b32.xlu1 %v10202_v52, %s8852_s23 }
 0x3c9   : > { %2892 = vrot.lane.b32.xlu0 %v10202_v52, %s8853_s27  ;;  %2868 = vrot.lane.b32.xlu1 %v10202_v52, %s8846_s1 }
 0x3cd   : > { %2948 = vrot.lane.b32.xlu0 %v10202_v52, %s8847_s0  ;;  %2924 = vrot.lane.b32.xlu1 %v10202_v52, %s8854_s28 }
 0x3d1   : > { %2619 = vrot.lane.b32.xlu0 %v10220_v57, %s8849_s26  ;;  %2595 = vrot.lane.b32.xlu1 %v10220_v57, %s8850_s30  ;;  %s7466_s26 = sld [smem:[#allocation11 + $0x1]]  ;;  %s8855_s30 = smov 12  }
 0x3d3   : > { %v2582_v23 = vpop.permute.xlu1 %2581  ;;  %v2606_v3 = vpop.permute.xlu0 %2605 }
 0x3d4   : > { %v2630_v53 = vsel %vm2629_vm12, %v2582_v23, %v2606_v3 }
 0x3d5   : > { %2676 = vrot.lane.b32.xlu0 %v10220_v57, %s8851_s21  ;;  %2652 = vrot.lane.b32.xlu1 %v10220_v57, %s8852_s23  ;;  %s8856_s21 = smov 124   ;;  %s8857_s23 = smov 4  }
 0x3d7   : > { %v2639_v55 = vpop.permute.xlu1 %2638  ;;  %v2663_v48 = vpop.permute.xlu0 %2662 }
 0x3d8   : > { %v2687_v25 = vsel %vm2686_vm13, %v2639_v55, %v2663_v48 }
 0x3d9   : > { %v10239_v16 = vsel %vm10231_vm14, %v2687_v25, %v2630_v53  ;;  %2894 = vrot.lane.b32.xlu0 %v10220_v57, %s8853_s27  ;;  %2870 = vrot.lane.b32.xlu1 %v10220_v57, %s8846_s1  ;;  %v10263_v36 = vsel %vm10249_vm15, %v2630_v53, %v2687_v25 }
 0x3da   : > { %12500 = vst [vmem:[#allocation26_spill] sm:$0xff] %v10239_v16 }
 0x3db   : > { %v10245_v9 = vpop.permute.xlu1 %2856  ;;  %v10247_v39 = vpop.permute.xlu0 %2880 }
 0x3dc   : > { %12501 = vst [vmem:[#allocation18_spill] sm:$0xff] %v10245_v9  ;;  %12502 = vst [vmem:[#allocation28_spill] sm:$0xff] %v10247_v39 }
 0x3dd   : > { %2950 = vrot.lane.b32.xlu0 %v10220_v57, %s8847_s0  ;;  %2926 = vrot.lane.b32.xlu1 %v10220_v57, %s8854_s28 }
 0x3df   : > { %v10257_v4 = vpop.permute.xlu1 %2912  ;;  %v10259_v38 = vpop.permute.xlu0 %2936 }
 0x3e0   : > { %12505 = vst [vmem:[#allocation30_spill] sm:$0xff] %v10257_v4  ;;  %12506 = vst [vmem:[#allocation33_spill] sm:$0xff] %v10259_v38 }
 0x3e1   : > { %2747 = vrot.lane.b32.xlu0 %v10263_v36, %s8853_s27  ;;  %2723 = vrot.lane.b32.xlu1 %v10263_v36, %s8846_s1 }
 0x3e3   : > { %v2584_v7 = vpop.permute.xlu1 %2583  ;;  %v2608_v58 = vpop.permute.xlu0 %2607 }
 0x3e4   : > { %v2631_v11 = vsel %vm2629_vm12, %v2584_v7, %v2608_v58 }
 0x3e5   : > { %2804 = vrot.lane.b32.xlu0 %v10263_v36, %s8847_s0  ;;  %2780 = vrot.lane.b32.xlu1 %v10263_v36, %s8854_s28 }
 0x3e7   : > { %v2641_v31 = vpop.permute.xlu1 %2640  ;;  %v2665_v47 = vpop.permute.xlu0 %2664 }
 0x3e8   : > { %v2688_v17 = vsel %vm2686_vm13, %v2641_v31, %v2665_v47 }
 0x3e9   : > { %v10277_v14 = vsel %vm10249_vm15, %v2631_v11, %v2688_v17  ;;  %v10281_v15 = vsel %vm10231_vm14, %v2688_v17, %v2631_v11 }
 0x3ea   : > { %12507 = vst [vmem:[#allocation35_spill] sm:$0xff] %v10281_v15  ;;  %2749 = vrot.lane.b32.xlu0 %v10277_v14, %s8853_s27  ;;  %2725 = vrot.lane.b32.xlu1 %v10277_v14, %s8846_s1 }
 0x3eb   : > { %v10287_v19 = vpop.permute.xlu1 %2858  ;;  %v10289_v26 = vpop.permute.xlu0 %2882 }
 0x3ec   : > { %12508 = vst [vmem:[#allocation37_spill] sm:$0xff] %v10287_v19  ;;  %12509 = vst [vmem:[#allocation20_spill] sm:$0xff] %v10289_v26 }
 0x3ee   : > { %2806 = vrot.lane.b32.xlu0 %v10277_v14, %s8847_s0  ;;  %2782 = vrot.lane.b32.xlu1 %v10277_v14, %s8854_s28 }
 0x3ef   : > { %v10295_v40 = vpop.permute.xlu1 %2914  ;;  %v10297_v59 = vpop.permute.xlu0 %2938 }
 0x3f0   : > { %12510 = vst [vmem:[#allocation21_spill] sm:$0xff] %v10295_v40  ;;  %12511 = vst [vmem:[#allocation23_spill] sm:$0xff] %v10297_v59 }
 0x3f3   : > { %v2586_v20 = vpop.permute.xlu1 %2585  ;;  %v2610_v12 = vpop.permute.xlu0 %2609 }
 0x3f4   : > { %v2632_v54 = vsel %vm2629_vm12, %v2586_v20, %v2610_v12 }
 0x3f7   : > { %v2643_v34 = vpop.permute.xlu1 %2642  ;;  %v2667_v27 = vpop.permute.xlu0 %2666 }
 0x3f8   : > { %v2689_v62 = vsel %vm2686_vm13, %v2643_v34, %v2667_v27 }
 0x3f9   : > { %v10303_v21 = vsel %vm10249_vm15, %v2632_v54, %v2689_v62  ;;  %v10307_v10 = vsel %vm10231_vm14, %v2689_v62, %v2632_v54 }
 0x3fa   : > { %12512 = vst [vmem:[#allocation25_spill] sm:$0xff] %v10307_v10  ;;  %2751 = vrot.lane.b32.xlu0 %v10303_v21, %s8853_s27  ;;  %2727 = vrot.lane.b32.xlu1 %v10303_v21, %s8846_s1 }
 0x3fb   : > { %v10313_v63 = vpop.permute.xlu1 %2860  ;;  %v10315_v6 = vpop.permute.xlu0 %2884 }
 0x3fc   : > { %12513 = vst [vmem:[#allocation34_spill] sm:$0xff] %v10313_v63  ;;  %12514 = vst [vmem:[#allocation27_spill] sm:$0xff] %v10315_v6 }
 0x3fe   : > { %2808 = vrot.lane.b32.xlu0 %v10303_v21, %s8847_s0  ;;  %2784 = vrot.lane.b32.xlu1 %v10303_v21, %s8854_s28 }
 0x3ff   : > { %v10321_v37 = vpop.permute.xlu1 %2916  ;;  %v10323_v2 = vpop.permute.xlu0 %2940 }
 0x400   : > { %12515 = vst [vmem:[#allocation29_spill] sm:$0xff] %v10321_v37  ;;  %12516 = vst [vmem:[#allocation31_spill] sm:$0xff] %v10323_v2  ;;  %v7438_v2 = vld [vmem:[%s12348_s3 + $0x1e0] sm:$0xff] }
 0x403   : > { %v2588_v42 = vpop.permute.xlu1 %2587  ;;  %v2612_v43 = vpop.permute.xlu0 %2611 }
 0x404   : > { %v2633_v0 = vsel %vm2629_vm12, %v2588_v42, %v2612_v43 }
 0x407   : > { %v2645_v30 = vpop.permute.xlu1 %2644  ;;  %v2669_v45 = vpop.permute.xlu0 %2668 }
 0x408   : > { %v2690_v41 = vsel %vm2686_vm13, %v2645_v30, %v2669_v45 }
 0x409   : > { %v10329_v13 = vsel %vm10249_vm15, %v2633_v0, %v2690_v41  ;;  %v10333_v46 = vsel %vm10231_vm14, %v2690_v41, %v2633_v0 }
 0x40a   : > { %12517 = vst [vmem:[#allocation39_spill] sm:$0xff] %v10333_v46  ;;  %2753 = vrot.lane.b32.xlu0 %v10329_v13, %s8853_s27  ;;  %2729 = vrot.lane.b32.xlu1 %v10329_v13, %s8846_s1 }
 0x40b   : > { %v10339_v61 = vpop.permute.xlu1 %2862  ;;  %v10341_v56 = vpop.permute.xlu0 %2886 }
 0x40c   : > { %12518 = vst [vmem:[#allocation36_spill] sm:$0xff] %v10339_v61  ;;  %12519 = vst [vmem:[#allocation38_spill] sm:$0xff] %v10341_v56 }
 0x40e   : > { %2810 = vrot.lane.b32.xlu0 %v10329_v13, %s8847_s0  ;;  %2786 = vrot.lane.b32.xlu1 %v10329_v13, %s8854_s28 }
 0x40f   : > { %v10347_v44 = vpop.permute.xlu1 %2918  ;;  %v10349_v8 = vpop.permute.xlu0 %2942 }
 0x413   : > { %v2590_v22 = vpop.permute.xlu1 %2589  ;;  %v2614_v35 = vpop.permute.xlu0 %2613 }
 0x414   : > { %v10352_v18 = vsel %vm2629_vm12, %v2590_v22, %v2614_v35 }
 0x417   : > { %v2647_v29 = vpop.permute.xlu1 %2646  ;;  %v2671_v28 = vpop.permute.xlu0 %2670 }
 0x418   : > { %v10355_v23 = vsel %vm2686_vm13, %v2647_v29, %v2671_v28 }
 0x419   : > { %v10361_v3 = vsel %vm10249_vm15, %v10352_v18, %v10355_v23  ;;  %v10451_v24 = vsel %vm10231_vm14, %v10355_v23, %v10352_v18  ;;  %v7333_v23 = vld [vmem:[%s12348_s3 + $0x58] sm:$0xff] }
 0x41a   : > { %2755 = vrot.lane.b32.xlu0 %v10361_v3, %s8853_s27  ;;  %2731 = vrot.lane.b32.xlu1 %v10361_v3, %s8846_s1  ;;  %12522 = vst [vmem:[#allocation42_spill] sm:$0xff] %v10451_v24 }
 0x41b   : > { %v10367_v55 = vpop.permute.xlu1 %2864  ;;  %v10369_v48 = vpop.permute.xlu0 %2888 }
 0x41e   : > { %2812 = vrot.lane.b32.xlu0 %v10361_v3, %s8847_s0  ;;  %2788 = vrot.lane.b32.xlu1 %v10361_v3, %s8854_s28 }
 0x41f   : > { %v10375_v53 = vpop.permute.xlu1 %2920  ;;  %v10377_v25 = vpop.permute.xlu0 %2944 }
 0x423   : > { %v2592_v7 = vpop.permute.xlu1 %2591  ;;  %v2616_v58 = vpop.permute.xlu0 %2615 }
 0x424   : > { %v2635_v11 = vsel %vm2629_vm12, %v2592_v7, %v2616_v58 }
 0x427   : > { %v2649_v31 = vpop.permute.xlu1 %2648  ;;  %v2673_v47 = vpop.permute.xlu0 %2672 }
 0x428   : > { %v2692_v17 = vsel %vm2686_vm13, %v2649_v31, %v2673_v47  ;;  %v7330_v31 = vld [vmem:[%s12348_s3 + $0x40] sm:$0xff] }
 0x429   : > { %v2702_v20 = vsel %vm10249_vm15, %v2635_v11, %v2692_v17  ;;  %v10397_v62 = vsel %vm10231_vm14, %v2692_v17, %v2635_v11  ;;  %7986 = vmatprep.mubr.msk.f32.mxu0 %vm3137_vm1, %v7330_v31  ;;  %v7337_v31 = vld [vmem:[%s12348_s3 + $0x78] sm:$0xff] }
 0x42a   : > { %2757 = vrot.lane.b32.xlu0 %v2702_v20, %s8853_s27  ;;  %2733 = vrot.lane.b32.xlu1 %v2702_v20, %s8846_s1  ;;  %12520 = vst [vmem:[#allocation41_spill] sm:$0xff] %v10397_v62 }
 0x42b   : > { %v10385_v12 = vpop.permute.xlu1 %2866  ;;  %v10387_v34 = vpop.permute.xlu0 %2890 }
 0x42e   : > { %2814 = vrot.lane.b32.xlu0 %v2702_v20, %s8847_s0  ;;  %2790 = vrot.lane.b32.xlu1 %v2702_v20, %s8854_s28 }
 0x42f   : > { %v10391_v27 = vpop.permute.xlu1 %2922  ;;  %v10393_v54 = vpop.permute.xlu0 %2946 }
 0x432   : > { %3026 = vrot.lane.b32.xlu0 %v10397_v62, %s8853_s27  ;;  %3002 = vrot.lane.b32.xlu1 %v10397_v62, %s8846_s1 }
 0x433   : > { %v2594_v42 = vpop.permute.xlu1 %2593  ;;  %v2618_v43 = vpop.permute.xlu0 %2617 }
 0x434   : > { %v2636_v0 = vsel %vm2629_vm12, %v2594_v42, %v2618_v43 }
 0x436   : > { %3082 = vrot.lane.b32.xlu0 %v10397_v62, %s8847_s0  ;;  %3058 = vrot.lane.b32.xlu1 %v10397_v62, %s8854_s28  ;;  %v4423_v62 = vld [vmem:[#allocation7 + $0x60] sm:$0xff] }
 0x437   : > { %v2651_v30 = vpop.permute.xlu1 %2650  ;;  %v2675_v45 = vpop.permute.xlu0 %2674 }
 0x438   : > { %v2693_v41 = vsel %vm2686_vm13, %v2651_v30, %v2675_v45 }
 0x439   : > { %v2703_v22 = vsel %vm10249_vm15, %v2636_v0, %v2693_v41  ;;  %v10425_v58 = vsel %vm10231_vm14, %v2693_v41, %v2636_v0  ;;  %v3120_v0 = vld [vmem:[%s12348_s3] sm:$0xff] }
 0x43a   : > { %2759 = vrot.lane.b32.xlu0 %v2703_v22, %s8853_s27  ;;  %2735 = vrot.lane.b32.xlu1 %v2703_v22, %s8846_s1  ;;  %12521 = vst [vmem:[#allocation40_spill] sm:$0xff] %v10425_v58 }
 0x43b   : > { %v10413_v35 = vpop.permute.xlu1 %2868  ;;  %v10415_v29 = vpop.permute.xlu0 %2892  ;;  %8014 = vmatprep.mubr.msk.f32.mxu1 %vm3137_vm1, %v3120_v0 }
 0x43e   : > { %2816 = vrot.lane.b32.xlu0 %v2703_v22, %s8847_s0  ;;  %2792 = vrot.lane.b32.xlu1 %v2703_v22, %s8854_s28 }
 0x43f   : > { %v10419_v28 = vpop.permute.xlu1 %2924  ;;  %v10421_v7 = vpop.permute.xlu0 %2948 }
 0x442   : > { %3028 = vrot.lane.b32.xlu0 %v10425_v58, %s8853_s27  ;;  %3004 = vrot.lane.b32.xlu1 %v10425_v58, %s8846_s1 }
 0x443   : > { %v2596_v47 = vpop.permute.xlu1 %2595  ;;  %v2620_v11 = vpop.permute.xlu0 %2619 }
 0x444   : > { %v2637_v43 = vsel %vm2629_vm12, %v2596_v47, %v2620_v11  ;;  %v7354_v47 = vld [vmem:[%s12348_s3 + $0x80] sm:$0xff] }
 0x446   : > { %3084 = vrot.lane.b32.xlu0 %v10425_v58, %s8847_s0  ;;  %3060 = vrot.lane.b32.xlu1 %v10425_v58, %s8854_s28  ;;  %v4425_v58 = vld [vmem:[#allocation7 + $0x70] sm:$0xff] }
 0x447   : > { %v2653_v17 = vpop.permute.xlu1 %2652  ;;  %v2677_v42 = vpop.permute.xlu0 %2676 }
 0x448   : > { %v2694_v30 = vsel %vm2686_vm13, %v2653_v17, %v2677_v42 }
 0x449   : > { %v2704_v45 = vsel %vm10249_vm15, %v2637_v43, %v2694_v30  ;;  %v10537_v42 = vsel %vm10231_vm14, %v2694_v30, %v2637_v43  ;;  %vm4700_vm14 = vcmask 97280   ;;  %vm4757_vm15 = vcmask 31744  }
 0x44a   : > { %2761 = vrot.lane.b32.xlu0 %v2704_v45, %s8853_s27  ;;  %2737 = vrot.lane.b32.xlu1 %v2704_v45, %s8846_s1  ;;  %12523 = vst [vmem:[#allocation43_spill] sm:$0xff] %v10537_v42 }
 0x44b   : > { %7970 = vmatprep.subr.mxu0 %v2704_v45  ;;  %v10488_v18 = vpop.permute.xlu0 %2894 }
 0x44c   : > { %7971 = vmatpush3.msra.mxu0 %v2704_v45 }
 0x44d   : > { %7972 = vmatprep.subr.mxu0 %v2703_v22 }
 0x44e   : > { %7973 = vmatpush3.msra.mxu0 %v2703_v22  ;;  %2818 = vrot.lane.b32.xlu0 %v2704_v45, %s8847_s0 }
 0x44f   : > { %2794 = vrot.lane.b32.xlu1 %v2704_v45, %s8854_s28  ;;  %7974 = vmatprep.subr.mxu0 %v2702_v20  ;;  %v10511_v22 = vpop.permute.xlu0 %2950 }
 0x450   : > { %7975 = vmatpush3.msra.mxu0 %v2702_v20  ;;  %v7336_v20 = vld [vmem:[%s12348_s3 + $0x70] sm:$0xff] }
 0x451   : > { %7976 = vmatprep.subr.mxu0 %v10361_v3 }
 0x452   : > { %7977 = vmatpush3.msra.mxu0 %v10361_v3  ;;  %3024 = vrot.lane.b32.xlu0 %v10451_v24, %s8853_s27  ;;  %v7335_v3 = vld [vmem:[%s12348_s3 + $0x68] sm:$0xff] }
 0x453   : > { %3000 = vrot.lane.b32.xlu1 %v10451_v24, %s8846_s1  ;;  %7978 = vmatprep.subr.mxu0 %v10329_v13  ;;  %v10532_v17 = vpop.permute.xlu0 %2747 }
 0x454   : > { %7979 = vmatpush3.msra.mxu0 %v10329_v13  ;;  %v7331_v13 = vld [vmem:[%s12348_s3 + $0x48] sm:$0xff] }
 0x455   : > { %7980 = vmatprep.subr.mxu0 %v10303_v21 }
 0x456   : > { %7981 = vmatpush3.msra.mxu0 %v10303_v21  ;;  %3080 = vrot.lane.b32.xlu0 %v10451_v24, %s8847_s0  ;;  %v7332_v21 = vld [vmem:[%s12348_s3 + $0x50] sm:$0xff] }
 0x457   : > { %3056 = vrot.lane.b32.xlu1 %v10451_v24, %s8854_s28  ;;  %7982 = vmatprep.subr.mxu0 %v10277_v14  ;;  %v10545_v0 = vpop.permute.xlu0 %2804 }
 0x458   : > { %7983 = vmatpush3.msra.mxu0 %v10277_v14  ;;  %v10486_v14 = vpop.permute.xlu1 %2870 }
 0x459   : > { %7984 = vmatprep.subr.mxu0 %v10263_v36 }
 0x45a   : > { %7985 = vmatpush3.msra.mxu0 %v10263_v36  ;;  %3022 = vrot.lane.b32.xlu0 %v10333_v46, %s8853_s27  ;;  %v7334_v36 = vld [vmem:[%s12348_s3 + $0x60] sm:$0xff] }
 0x45b   : > { %2998 = vrot.lane.b32.xlu1 %v10333_v46, %s8846_s1  ;;  %7987 = vmatmul.mubr.msk.f32.vlgmr.msra.gmra.mxu0 %vm3137_vm1, %v7331_v13 }
 0x45c   : > { %7989 = vmatprep.mubr.msk.f32.mxu0 %vm3137_vm1, %v7332_v21  ;;  %v10509_v41 = vpop.permute.xlu1 %2926  ;;  %v10557_v43 = vpop.permute.xlu0 %2749 }
 0x45e   : > { %3078 = vrot.lane.b32.xlu0 %v10333_v46, %s8847_s0 }
 0x45f   : > { %3054 = vrot.lane.b32.xlu1 %v10333_v46, %s8854_s28  ;;  %7990 = vmatmul.mubr.msk.f32.gmra.mxu0 %vm3137_vm1, %v7333_v23 }
 0x460   : > { %7992 = vmatprep.mubr.msk.f32.mxu0 %vm3137_vm1, %v7334_v36  ;;  %v10530_v11 = vpop.permute.xlu1 %2723  ;;  %v10565_v13 = vpop.permute.xlu0 %2806  ;;  %v4420_v36 = vld [vmem:[#allocation7 + $0x48] sm:$0xff] }
 0x462   : > { %3020 = vrot.lane.b32.xlu0 %v10307_v10, %s8853_s27 }
 0x463   : > { %2996 = vrot.lane.b32.xlu1 %v10307_v10, %s8846_s1  ;;  %7993 = vmatmul.mubr.msk.f32.gmra.mxu0 %vm3137_vm1, %v7335_v3  ;;  %v4419_v3 = vld [vmem:[#allocation7 + $0x40] sm:$0xff] }
 0x464   : > { %7995 = vmatprep.mubr.msk.f32.mxu0 %vm3137_vm1, %v7336_v20  ;;  %v10543_v45 = vpop.permute.xlu1 %2780  ;;  %v4422_v20 = vld [vmem:[#allocation7 + $0x58] sm:$0xff] }
 0x466   : > { %3076 = vrot.lane.b32.xlu0 %v10307_v10, %s8847_s0 }
 0x467   : > { %3052 = vrot.lane.b32.xlu1 %v10307_v10, %s8854_s28  ;;  %7996 = vmatmul.mubr.msk.f32.gmra.mxu0 %vm3137_vm1, %v7337_v31  ;;  %v4424_v10 = vld [vmem:[#allocation7 + $0x68] sm:$0xff] }
 0x468   : > { %8042 = vmatprep.mubr.msk.f32.mxu0 %vm3137_vm1, %v7354_v47  ;;  %v10555_v1 = vpop.permute.xlu1 %2725 }
 0x46a   : > { %3030 = vrot.lane.b32.xlu0 %v10537_v42, %s8853_s27 }
 0x46b   : > { %3006 = vrot.lane.b32.xlu1 %v10537_v42, %s8846_s1 }
 0x46c   : > { %v10563_v30 = vpop.permute.xlu1 %2782  ;;  %v10573_v23 = vpop.permute.xlu0 %2751 }
 0x46e   : > { %3086 = vrot.lane.b32.xlu0 %v10537_v42, %s8847_s0 }
 0x46f   : > { %3062 = vrot.lane.b32.xlu1 %v10537_v42, %s8854_s28 }
 0x470   : > { %v10571_v21 = vpop.permute.xlu1 %2727  ;;  %v10581_v47 = vpop.permute.xlu0 %2808 }
 0x472   : > { %3018 = vrot.lane.b32.xlu0 %v10281_v15, %s8853_s27 }
 0x473   : > { %2994 = vrot.lane.b32.xlu1 %v10281_v15, %s8846_s1 }
 0x474   : > { %v10579_v31 = vpop.permute.xlu1 %2784 }
 0x476   : > { %3074 = vrot.lane.b32.xlu0 %v10281_v15, %s8847_s0 }
 0x477   : > { %3050 = vrot.lane.b32.xlu1 %v10281_v15, %s8854_s28  ;;  %v4421_v15 = vld [vmem:[#allocation7 + $0x50] sm:$0xff] }
 0x47a   : > { %3016 = vrot.lane.b32.xlu0 %v10239_v16, %s8853_s27  ;;  %s8858_s27 = smov 116  }
 0x47b   : > { %2992 = vrot.lane.b32.xlu1 %v10239_v16, %s8846_s1 }
 0x47c   : > { %v10583_v46 = vpop.permute.xlu1 %2729  ;;  %v10585_v24 = vpop.permute.xlu0 %2753 }
 0x47e   : > { %3072 = vrot.lane.b32.xlu0 %v10239_v16, %s8847_s0 }
 0x47f   : > { %3048 = vrot.lane.b32.xlu1 %v10239_v16, %s8854_s28  ;;  %v4426_v16 = vld [vmem:[#allocation7 + $0x78] sm:$0xff]  ;;  %s8859_s28 = smov 15  }
 0x482   : > { %4434 = vperm.xlu0 %8664, %v4420_v36   ;;  %v2787_v36 = vpop.permute.xlu1 %2786 }
 0x483   : > { %4429 = vperm.xlu1 %8665, %v4419_v3   ;;  %v2811_v3 = vpop.permute.xlu0 %2810 }
 0x486   : > { %4444 = vperm.xlu0 %8664, %v4422_v20  }
 0x487   : > { %4439 = vperm.xlu1 %8665, %v4421_v15  }
 0x48a   : > { %4454 = vperm.xlu0 %8664, %v4424_v10  }
 0x48b   : > { %4449 = vperm.xlu1 %8665, %v4423_v62  }
 0x48c   : > { %v2732_v42 = vpop.permute.xlu1 %2731  ;;  %v2756_v50 = vpop.permute.xlu0 %2755 }
 0x48e   : > { %4464 = vperm.xlu0 %8664, %v4426_v16  }
 0x48f   : > { %4459 = vperm.xlu1 %8665, %v4425_v58  }
 0x490   : > { %v2789_v51 = vpop.permute.xlu1 %2788  ;;  %v2813_v9 = vpop.permute.xlu0 %2812 }
 0x49c   : > { %v2734_v20 = vpop.permute.xlu1 %2733  ;;  %v2758_v15 = vpop.permute.xlu0 %2757 }
 0x4a0   : > { %v2791_v39 = vpop.permute.xlu1 %2790  ;;  %v2815_v4 = vpop.permute.xlu0 %2814 }
 0x4a1   : > { %v2833_v61 = vsel %vm774_vm5, %v2791_v39, %v2815_v4  ;;  %v2777_v39 = vsel %vm2771_vm3, %v2734_v20, %v2758_v15  ;;  %v2831_v4 = vsel %vm774_vm5, %v2787_v36, %v2811_v3  ;;  %v10682_v36 = vsel %vm774_vm5, %v10509_v41, %v10511_v22  ;;  %v3121_v41 = vld [vmem:[%s12348_s3 + $0x8] sm:$0xff] }
 0x4a2   : > { %v10701_v22 = vsel %vm2771_vm3, %v10486_v14, %v10488_v18  ;;  %v10721_v18 = vsel %vm2771_vm3, %v10413_v35, %v10415_v29  ;;  %v10733_v15 = vsel %vm774_vm5, %v10391_v27, %v10393_v54  ;;  %v3123_v29 = vld [vmem:[%s12348_s3 + $0x18] sm:$0xff]  ;;  %v7356_v27 = vld [vmem:[%s12348_s3 + $0x90] sm:$0xff] }
 0x4a3   : > { %v7357_v54 = vld [vmem:[%s12348_s3 + $0x98] sm:$0xff] }
 0x4a4   : > { %v10587_v38 = vpop.permute.xlu1 %3002  ;;  %v10589_v19 = vpop.permute.xlu0 %3026 }
 0x4a5   : > { %12524 = vst [vmem:[#allocation44_spill] sm:$0xff] %v10587_v38  ;;  %12525 = vst [vmem:[#allocation45_spill] sm:$0xff] %v10589_v19  ;;  %v2568_v19 = vand.u32 7, %v12497_v33 }
 0x4a7   : > { %vm10604_vm2 = vcmp.eq.s32.totalorder %v2568_v19, 0  ;;  %vm10608_vm4 = vcmp.eq.s32.totalorder %v2568_v19, 7 }
 0x4a8   : > { %v10591_v10 = vpop.permute.xlu1 %3058  ;;  %v10593_v62 = vpop.permute.xlu0 %3082  ;;  %v2975_v20 = vsel %vm10604_vm2, %v10701_v22, %v10682_v36 }
 0x4a9   : > { %12526 = vst [vmem:[#allocation46_spill] sm:$0xff] %v10591_v10  ;;  %12527 = vst [vmem:[#allocation47_spill] sm:$0xff] %v10593_v62  ;;  %v7419_v10 = vld [vmem:[%s12348_s3 + $0x188] sm:$0xff] }
 0x4ac   : > { %v2736_v26 = vpop.permute.xlu1 %2735  ;;  %v2760_v49 = vpop.permute.xlu0 %2759 }
 0x4ad   : > { %v2778_v56 = vsel %vm2771_vm3, %v2736_v26, %v2760_v49  ;;  %v2843_v49 = vsel %vm10604_vm2, %v2777_v39, %v2833_v61  ;;  %v2776_v26 = vsel %vm2771_vm3, %v2732_v42, %v2756_v50  ;;  %v2775_v50 = vsel %vm2771_vm3, %v10583_v46, %v10585_v24 }
 0x4ae   : > { %v2774_v42 = vsel %vm2771_vm3, %v10571_v21, %v10573_v23 }
 0x4b0   : > { %v2793_v16 = vpop.permute.xlu1 %2792  ;;  %v2817_v58 = vpop.permute.xlu0 %2816 }
 0x4b4   : > { %v10595_v40 = vpop.permute.xlu1 %3004  ;;  %v10597_v59 = vpop.permute.xlu0 %3028 }
 0x4b5   : > { %12528 = vst [vmem:[#allocation48_spill] sm:$0xff] %v10595_v40  ;;  %12529 = vst [vmem:[#allocation49_spill] sm:$0xff] %v10597_v59  ;;  %v2834_v40 = vsel %vm774_vm5, %v2793_v16, %v2817_v58  ;;  %v10761_v16 = vsel %vm774_vm5, %v10375_v53, %v10377_v25  ;;  %v10775_v58 = vsel %vm2771_vm3, %v10367_v55, %v10369_v48  ;;  %v3125_v48 = vld [vmem:[%s12348_s3 + $0x28] sm:$0xff] }
 0x4b6   : > { %v10785_v53 = vsel %vm774_vm5, %v10347_v44, %v10349_v8  ;;  %v2972_v55 = vsel %vm10604_vm2, %v10775_v58, %v10761_v16  ;;  %v7358_v44 = vld [vmem:[%s12348_s3 + $0xa0] sm:$0xff] }
 0x4b8   : > { %v10599_v60 = vpop.permute.xlu1 %3060  ;;  %v10601_v63 = vpop.permute.xlu0 %3084 }
 0x4b9   : > { %12530 = vst [vmem:[#allocation50_spill] sm:$0xff] %v10599_v60  ;;  %12531 = vst [vmem:[#allocation51_spill] sm:$0xff] %v10601_v63 }
 0x4bc   : > { %v2738_v6 = vpop.permute.xlu1 %2737  ;;  %v2762_v38 = vpop.permute.xlu0 %2761 }
 0x4bd   : > { %v2779_v59 = vsel %vm2771_vm3, %v2738_v6, %v2762_v38  ;;  %v2844_v38 = vsel %vm10604_vm2, %v2778_v56, %v2834_v40  ;;  %v2854_v6 = vsel %vm10608_vm4, %v2834_v40, %v2778_v56  ;;  %v2829_v56 = vsel %vm774_vm5, %v10563_v30, %v10565_v13 }
 0x4be   : > { %v2828_v30 = vsel %vm774_vm5, %v10543_v45, %v10545_v0  ;;  %v2773_v13 = vsel %vm2771_vm3, %v10555_v1, %v10557_v43  ;;  %v2772_v45 = vsel %vm2771_vm3, %v10530_v11, %v10532_v17  ;;  %v7355_v11 = vld [vmem:[%s12348_s3 + $0x88] sm:$0xff]  ;;  %v10709_v17 = vsel %vm774_vm5, %v10419_v28, %v10421_v7  ;;  %v3122_v7 = vld [vmem:[%s12348_s3 + $0x10] sm:$0xff] }
 0x4bf   : > { %v2839_v21 = vsel %vm10604_vm2, %v2773_v13, %v2829_v56  ;;  %v2849_v23 = vsel %vm10608_vm4, %v2829_v56, %v2773_v13  ;;  %v2838_v43 = vsel %vm10604_vm2, %v2772_v45, %v2828_v30  ;;  %v2848_v3 = vsel %vm10608_vm4, %v2828_v30, %v2772_v45  ;;  %v3127_v13 = vld [vmem:[%s12348_s3 + $0x38] sm:$0xff]  ;;  %v12547_v45 = vld [vmem:[#allocation20_spill] sm:$0xff] }
 0x4c0   : > { %v2819_v37 = vpop.permute.xlu0 %2818  ;;  %v2974_v35 = vsel %vm10604_vm2, %v10721_v18, %v10709_v17 }
 0x4c1   : > { %v2795_v62 = vpop.permute.xlu1 %2794 }
 0x4c2   : > { %v2835_v60 = vsel %vm774_vm5, %v2795_v62, %v2819_v37  ;;  %v2841_v37 = vsel %vm10604_vm2, %v2775_v50, %v2831_v4 }
 0x4c3   : > { %v2845_v33 = vsel %vm10604_vm2, %v2779_v59, %v2835_v60  ;;  %v2855_v63 = vsel %vm10608_vm4, %v2835_v60, %v2779_v59  ;;  %v2832_v60 = vsel %vm774_vm5, %v2789_v51, %v2813_v9 }
 0x4c4   : > { %7998 = vmatprep.subr.mxu1 %v2845_v33  ;;  %8026 = vmatprep.subr.mxu0 %v2855_v63  ;;  %v10621_v19 = vpop.permute.xlu0 %3024  ;;  %v2842_v9 = vsel %vm10604_vm2, %v2776_v26, %v2832_v60  ;;  %v2852_v59 = vsel %vm10608_vm4, %v2832_v60, %v2776_v26 }
 0x4c5   : > { %v10623_v5 = vpop.permute.xlu1 %3000  ;;  %7999 = vmatpush3.msra.mxu1 %v2845_v33  ;;  %8027 = vmatpush3.msra.mxu0 %v2855_v63  ;;  %v2853_v33 = vsel %vm10608_vm4, %v2833_v61, %v2777_v39  ;;  %v2830_v63 = vsel %vm774_vm5, %v10579_v31, %v10581_v47  ;;  %v2851_v61 = vsel %vm10608_vm4, %v2831_v4, %v2775_v50  ;;  %v7359_v39 = vld [vmem:[%s12348_s3 + $0xa8] sm:$0xff] }
 0x4c6   : > { %8000 = vmatprep.subr.mxu1 %v2844_v38  ;;  %8028 = vmatprep.subr.mxu0 %v2854_v6  ;;  %v2840_v31 = vsel %vm10604_vm2, %v2774_v42, %v2830_v63  ;;  %v2850_v47 = vsel %vm10608_vm4, %v2830_v63, %v2774_v42  ;;  %v12543_v50 = vld [vmem:[#allocation19_spill] sm:$0xff] }
 0x4c7   : > { %8001 = vmatpush3.msra.mxu1 %v2844_v38  ;;  %8029 = vmatpush3.msra.mxu0 %v2854_v6  ;;  %v12536_v38 = vld [vmem:[#allocation32_spill] sm:$0xff]  ;;  %v12537_v6 = vld [vmem:[#allocation38_spill] sm:$0xff]  ;;  %v12544_v42 = vld [vmem:[#allocation23_spill] sm:$0xff] }
 0x4c8   : > { %8002 = vmatprep.subr.mxu1 %v2843_v49  ;;  %8030 = vmatprep.subr.mxu0 %v2853_v33  ;;  %v10637_v40 = vpop.permute.xlu0 %3080 }
 0x4c9   : > { %v10639_v51 = vpop.permute.xlu1 %3056  ;;  %8003 = vmatpush3.msra.mxu1 %v2843_v49  ;;  %8031 = vmatpush3.msra.mxu0 %v2853_v33  ;;  %v12539_v49 = vld [vmem:[#allocation31_spill] sm:$0xff]  ;;  %v12540_v33 = vld [vmem:[#allocation29_spill] sm:$0xff] }
 0x4ca   : > { %8004 = vmatprep.subr.mxu1 %v2842_v9  ;;  %8032 = vmatprep.subr.mxu0 %v2852_v59  ;;  %v10811_v4 = vsel %vm774_vm5, %v12540_v33, %v12539_v49  ;;  %v7386_v49 = vld [vmem:[%s12348_s3 + $0x100] sm:$0xff] }
 0x4cb   : > { %8005 = vmatpush3.msra.mxu1 %v2842_v9  ;;  %8033 = vmatpush3.msra.mxu0 %v2852_v59  ;;  %v12541_v9 = vld [vmem:[#allocation27_spill] sm:$0xff]  ;;  %v12542_v59 = vld [vmem:[#allocation34_spill] sm:$0xff] }
 0x4cc   : > { %8006 = vmatprep.subr.mxu1 %v2841_v37  ;;  %8034 = vmatprep.subr.mxu0 %v2851_v61  ;;  %v10661_v46 = vpop.permute.xlu0 %3022  ;;  %v10823_v63 = vsel %vm2771_vm3, %v12542_v59, %v12541_v9  ;;  %v2983_v59 = vsel %vm10608_vm4, %v10682_v36, %v10701_v22  ;;  %v2982_v22 = vsel %vm10608_vm4, %v10709_v17, %v10721_v18  ;;  %v7388_v17 = vld [vmem:[%s12348_s3 + $0x110] sm:$0xff] }
 0x4cd   : > { %v10663_v24 = vpop.permute.xlu1 %2998  ;;  %8007 = vmatpush3.msra.mxu1 %v2841_v37  ;;  %8035 = vmatpush3.msra.mxu0 %v2851_v61  ;;  %v3126_v37 = vld [vmem:[%s12348_s3 + $0x30] sm:$0xff]  ;;  %v2970_v30 = vsel %vm10604_vm2, %v10823_v63, %v10811_v4  ;;  %v10957_v18 = vsel %vm774_vm5, %v10639_v51, %v10637_v40  ;;  %v7389_v40 = vld [vmem:[%s12348_s3 + $0x118] sm:$0xff]  ;;  %v10974_v51 = vsel %vm2771_vm3, %v10623_v5, %v10621_v19  ;;  %v7375_v19 = vld [vmem:[%s12348_s3 + $0xe8] sm:$0xff] }
 0x4ce   : > { %8008 = vmatprep.subr.mxu1 %v2840_v31  ;;  %8036 = vmatprep.subr.mxu0 %v2850_v47  ;;  %v3108_v5 = vsel %vm10604_vm2, %v10974_v51, %v10957_v18 }
 0x4cf   : > { %8009 = vmatpush3.msra.mxu1 %v2840_v31  ;;  %8037 = vmatpush3.msra.mxu0 %v2850_v47  ;;  %v12545_v31 = vld [vmem:[#allocation21_spill] sm:$0xff] }
 0x4d0   : > { %8010 = vmatprep.subr.mxu1 %v2839_v21  ;;  %8038 = vmatprep.subr.mxu0 %v2849_v23  ;;  %v10687_v0 = vpop.permute.xlu0 %3078  ;;  %v10833_v47 = vsel %vm774_vm5, %v12545_v31, %v12544_v42 }
 0x4d1   : > { %v10689_v1 = vpop.permute.xlu1 %3054  ;;  %8011 = vmatpush3.msra.mxu1 %v2839_v21  ;;  %8039 = vmatpush3.msra.mxu0 %v2849_v23  ;;  %v12546_v21 = vld [vmem:[#allocation24_spill] sm:$0xff] }
 0x4d2   : > { %8012 = vmatprep.subr.mxu1 %v2838_v43  ;;  %8040 = vmatprep.subr.mxu0 %v2848_v3  ;;  %v7360_v23 = vld [vmem:[%s12348_s3 + $0xb0] sm:$0xff] }
 0x4d3   : > { %8013 = vmatpush3.msra.mxu1 %v2838_v43  ;;  %8041 = vmatpush3.msra.mxu0 %v2848_v3  ;;  %v12548_v43 = vld [vmem:[#allocation37_spill] sm:$0xff] }
 0x4d4   : > { %8015 = vmatmul.mubr.msk.f32.vlgmr.msra.gmra.mxu1 %vm3137_vm1, %v3121_v41  ;;  %8054 = vmatprep.subr.mxu1 %v2975_v20  ;;  %v10716_v14 = vpop.permute.xlu0 %3020  ;;  %v10850_v3 = vsel %vm2771_vm3, %v12548_v43, %v12547_v45  ;;  %v7361_v41 = vld [vmem:[%s12348_s3 + $0xb8] sm:$0xff]  ;;  %v12562_v43 = vld [vmem:[#allocation44_spill] sm:$0xff] }
 0x4d5   : > { %8082 = vmatprep.subr.mxu0 %v10220_v57  ;;  %v10724_v28 = vpop.permute.xlu1 %2996  ;;  %8043 = vmatmul.mubr.msk.f32.vlgmr.msra.gmra.mxu0 %vm3137_vm1, %v7355_v11  ;;  %v12549_v11 = vld [vmem:[#allocation33_spill] sm:$0xff] }
 0x4d6   : > { %8055 = vmatpush3.msra.mxu1 %v2975_v20  ;;  %8083 = vmatpush3.msra.mxu0 %v10220_v57  ;;  %v10750_v57 = vsel %vm2771_vm3, %v10385_v12, %v10387_v34  ;;  %v12550_v20 = vld [vmem:[#allocation30_spill] sm:$0xff]  ;;  %v12561_v45 = vld [vmem:[#allocation45_spill] sm:$0xff] }
 0x4d7   : > { %8056 = vmatprep.subr.mxu1 %v2974_v35  ;;  %8084 = vmatprep.subr.mxu0 %v10202_v52  ;;  %v2973_v12 = vsel %vm10604_vm2, %v10750_v57, %v10733_v15 }
 0x4d8   : > { %8017 = vmatprep.mubr.msk.f32.mxu1 %vm3137_vm1, %v3122_v7  ;;  %8057 = vmatpush3.msra.mxu1 %v2974_v35  ;;  %v10756_v62 = vpop.permute.xlu0 %3076  ;;  %v10859_v7 = vsel %vm774_vm5, %v12550_v20, %v12549_v11  ;;  %v2969_v35 = vsel %vm10604_vm2, %v10850_v3, %v10833_v47  ;;  %v2981_v11 = vsel %vm10608_vm4, %v10733_v15, %v10750_v57  ;;  %v7374_v57 = vld [vmem:[%s12348_s3 + $0xe0] sm:$0xff] }
 0x4d9   : > { %8085 = vmatpush3.msra.mxu0 %v10202_v52  ;;  %8018 = vmatmul.mubr.msk.f32.gmra.mxu1 %vm3137_vm1, %v3123_v29  ;;  %v10769_v34 = vpop.permute.xlu1 %3052  ;;  %v3124_v52 = vld [vmem:[%s12348_s3 + $0x20] sm:$0xff]  ;;  %v12551_v29 = vld [vmem:[#allocation28_spill] sm:$0xff]  ;;  %v2980_v15 = vsel %vm10608_vm4, %v10761_v16, %v10775_v58  ;;  %v11000_v16 = vsel %vm2771_vm3, %v10663_v24, %v10661_v46  ;;  %v2978_v58 = vsel %vm10608_vm4, %v10811_v4, %v10823_v63 }
 0x4da   : > { %8045 = vmatprep.mubr.msk.f32.mxu0 %vm3137_vm1, %v7356_v27  ;;  %8058 = vmatprep.subr.mxu1 %v2973_v12  ;;  %v12552_v27 = vld [vmem:[#allocation18_spill] sm:$0xff]  ;;  %v7392_v63 = vld [vmem:[%s12348_s3 + $0x130] sm:$0xff] }
 0x4db   : > { %8086 = vmatprep.subr.mxu0 %v10184_v32  ;;  %8046 = vmatmul.mubr.msk.f32.gmra.mxu0 %vm3137_vm1, %v7357_v54  ;;  %v10871_v54 = vsel %vm2771_vm3, %v12552_v27, %v12551_v29  ;;  %v10987_v27 = vsel %vm774_vm5, %v10689_v1, %v10687_v0  ;;  %v7390_v0 = vld [vmem:[%s12348_s3 + $0x120] sm:$0xff]  ;;  %v11009_v1 = vsel %vm774_vm5, %v10769_v34, %v10756_v62  ;;  %v7391_v62 = vld [vmem:[%s12348_s3 + $0x128] sm:$0xff] }
 0x4dc   : > { %8059 = vmatpush3.msra.mxu1 %v2973_v12  ;;  %8087 = vmatpush3.msra.mxu0 %v10184_v32  ;;  %v3031_v25 = vpop.permute.xlu0 %3030  ;;  %v12538_v32 = vld [vmem:[#allocation36_spill] sm:$0xff]  ;;  %v12553_v12 = vld [vmem:[#allocation17_spill] sm:$0xff]  ;;  %v3107_v24 = vsel %vm10604_vm2, %v11000_v16, %v10987_v27  ;;  %v11026_v34 = vsel %vm2771_vm3, %v10724_v28, %v10716_v14 }
 0x4dd   : > { %8060 = vmatprep.subr.mxu1 %v2972_v55  ;;  %8088 = vmatprep.subr.mxu0 %v12536_v38  ;;  %v3007_v8 = vpop.permute.xlu1 %3006  ;;  %v10802_v60 = vsel %vm2771_vm3, %v12538_v32, %v12537_v6  ;;  %v7371_v6 = vld [vmem:[%s12348_s3 + $0xc8] sm:$0xff]  ;;  %v3106_v14 = vsel %vm10604_vm2, %v11026_v34, %v11009_v1  ;;  %v7377_v28 = vld [vmem:[%s12348_s3 + $0xf8] sm:$0xff] }
 0x4de   : > { %8020 = vmatprep.mubr.msk.f32.mxu1 %vm3137_vm1, %v3124_v52  ;;  %8061 = vmatpush3.msra.mxu1 %v2972_v55  ;;  %v2971_v26 = vsel %vm10604_vm2, %v10802_v60, %v10785_v53  ;;  %v7370_v55 = vld [vmem:[%s12348_s3 + $0xc0] sm:$0xff]  ;;  %v10894_v32 = vsel %vm2771_vm3, %v3007_v8, %v3031_v25  ;;  %v7387_v25 = vld [vmem:[%s12348_s3 + $0x108] sm:$0xff]  ;;  %v2979_v46 = vsel %vm10608_vm4, %v10785_v53, %v10802_v60  ;;  %v7376_v53 = vld [vmem:[%s12348_s3 + $0xf0] sm:$0xff] }
 0x4df   : > { %8089 = vmatpush3.msra.mxu0 %v12536_v38  ;;  %8021 = vmatmul.mubr.msk.f32.gmra.mxu1 %vm3137_vm1, %v3125_v48  ;;  %v12555_v8 = vld [vmem:[#allocation51_spill] sm:$0xff] }
 0x4e0   : > { %8048 = vmatprep.mubr.msk.f32.mxu0 %vm3137_vm1, %v7358_v44  ;;  %8062 = vmatprep.subr.mxu1 %v2971_v26  ;;  %v3087_v56 = vpop.permute.xlu0 %3086  ;;  %v2968_v44 = vsel %vm10604_vm2, %v10871_v54, %v10859_v7 }
 0x4e1   : > { %8090 = vmatprep.subr.mxu0 %v12543_v50  ;;  %8049 = vmatmul.mubr.msk.f32.gmra.mxu0 %vm3137_vm1, %v7359_v39  ;;  %v3063_v61 = vpop.permute.xlu1 %3062  ;;  %v12554_v39 = vld [vmem:[#allocation22_spill] sm:$0xff] }
 0x4e2   : > { %8063 = vmatpush3.msra.mxu1 %v2971_v26  ;;  %8091 = vmatpush3.msra.mxu0 %v12543_v50  ;;  %v10876_v52 = vsel %vm774_vm5, %v3063_v61, %v3087_v56  ;;  %v12556_v26 = vld [vmem:[#allocation50_spill] sm:$0xff]  ;;  %v12557_v50 = vld [vmem:[#allocation49_spill] sm:$0xff]  ;;  %v7372_v56 = vld [vmem:[%s12348_s3 + $0xd0] sm:$0xff] }
 0x4e3   : > { %8064 = vmatprep.subr.mxu1 %v2970_v30  ;;  %8092 = vmatprep.subr.mxu0 %v12546_v21  ;;  %v3111_v33 = vsel %vm10604_vm2, %v10894_v32, %v10876_v52  ;;  %v10911_v9 = vsel %vm774_vm5, %v12556_v26, %v12555_v8  ;;  %v3119_v8 = vsel %vm10608_vm4, %v10876_v52, %v10894_v32  ;;  %v7405_v26 = vld [vmem:[%s12348_s3 + $0x158] sm:$0xff] }
 0x4e4   : > { %8023 = vmatprep.mubr.msk.f32.mxu1 %vm3137_vm1, %v3126_v37  ;;  %8065 = vmatpush3.msra.mxu1 %v2970_v30  ;;  %v10883_v38 = vpop.permute.xlu0 %3018  ;;  %v12558_v37 = vld [vmem:[#allocation48_spill] sm:$0xff]  ;;  %v12559_v30 = vld [vmem:[#allocation47_spill] sm:$0xff]  ;;  %v12565_v32 = vld [vmem:[#allocation41_spill] sm:$0xff] }
 0x4e5   : > { %8093 = vmatpush3.msra.mxu0 %v12546_v21  ;;  %8024 = vmatmul.mubr.msk.f32.gmra.mxu1 %vm3137_vm1, %v3127_v13  ;;  %v10881_v48 = vpop.permute.xlu1 %2994  ;;  %v10923_v61 = vsel %vm2771_vm3, %v12558_v37, %v12557_v50  ;;  %v12560_v13 = vld [vmem:[#allocation46_spill] sm:$0xff]  ;;  %v7420_v50 = vld [vmem:[%s12348_s3 + $0x190] sm:$0xff]  ;;  %v7421_v37 = vld [vmem:[%s12348_s3 + $0x198] sm:$0xff] }
 0x4e6   : > { %8051 = vmatprep.mubr.msk.f32.mxu0 %vm3137_vm1, %v7360_v23  ;;  %8066 = vmatprep.subr.mxu1 %v2969_v35  ;;  %v10932_v36 = vsel %vm774_vm5, %v12560_v13, %v12559_v30  ;;  %v3110_v21 = vsel %vm10604_vm2, %v10923_v61, %v10911_v9  ;;  %v7373_v23 = vld [vmem:[%s12348_s3 + $0xd8] sm:$0xff]  ;;  %v11050_v4 = vsel %vm2771_vm3, %v10881_v48, %v10883_v38  ;;  %v12567_v13 = vld [vmem:[#allocation39_spill] sm:$0xff] }
 0x4e7   : > { %8094 = vmatprep.subr.mxu0 %v12553_v12  ;;  %8052 = vmatmul.mubr.msk.f32.gmra.mxu0 %vm3137_vm1, %v7361_v41  ;;  %v10948_v41 = vsel %vm2771_vm3, %v12562_v43, %v12561_v45  ;;  %v3118_v52 = vsel %vm10608_vm4, %v10911_v9, %v10923_v61  ;;  %v7407_v61 = vld [vmem:[%s12348_s3 + $0x168] sm:$0xff]  ;;  %v3116_v30 = vsel %vm10608_vm4, %v10957_v18, %v10974_v51  ;;  %v7409_v45 = vld [vmem:[%s12348_s3 + $0x178] sm:$0xff]  ;;  %v7424_v43 = vld [vmem:[%s12348_s3 + $0x1b0] sm:$0xff] }
 0x4e8   : > { %8067 = vmatpush3.msra.mxu1 %v2969_v35  ;;  %8095 = vmatpush3.msra.mxu0 %v12553_v12  ;;  %v3075_v31 = vpop.permute.xlu0 %3074  ;;  %v3109_v20 = vsel %vm10604_vm2, %v10948_v41, %v10932_v36  ;;  %v3117_v9 = vsel %vm10608_vm4, %v10932_v36, %v10948_v41  ;;  %v7423_v36 = vld [vmem:[%s12348_s3 + $0x1a8] sm:$0xff]  ;;  %v3114_v41 = vsel %vm10608_vm4, %v11009_v1, %v11026_v34  ;;  %v7425_v18 = vld [vmem:[%s12348_s3 + $0x1b8] sm:$0xff]  ;;  %v7440_v1 = vld [vmem:[%s12348_s3 + $0x1f0] sm:$0xff] }
 0x4e9   : > { %8068 = vmatprep.subr.mxu1 %v2968_v44  ;;  %8096 = vmatprep.subr.mxu0 %v12554_v39  ;;  %v3051_v42 = vpop.permute.xlu1 %3050  ;;  %v7435_v51 = vld [vmem:[%s12348_s3 + $0x1c8] sm:$0xff]  ;;  %v7457_v34 = vld [vmem:[%s12348_s3 + $0x238] sm:$0xff] }
 0x4ea   : > { %8069 = vmatpush3.msra.mxu1 %v2968_v44  ;;  %8070 = vmatprep.mubr.msk.f32.mxu1 %vm3137_vm1, %v7370_v55  ;;  %v11037_v55 = vsel %vm774_vm5, %v3051_v42, %v3075_v31  ;;  %v12566_v42 = vld [vmem:[#allocation42_spill] sm:$0xff] }
 0x4eb   : > { %8097 = vmatpush3.msra.mxu0 %v12554_v39  ;;  %8071 = vmatmul.mubr.msk.f32.vlgmr.msra.gmra.mxu1 %vm3137_vm1, %v7371_v6  ;;  %v2977_v6 = vsel %vm10608_vm4, %v10833_v47, %v10850_v3  ;;  %v3105_v48 = vsel %vm10604_vm2, %v11050_v4, %v11037_v55  ;;  %v7393_v39 = vld [vmem:[%s12348_s3 + $0x138] sm:$0xff]  ;;  %v2976_v47 = vsel %vm10608_vm4, %v10859_v7, %v10871_v54  ;;  %v7402_v3 = vld [vmem:[%s12348_s3 + $0x140] sm:$0xff]  ;;  %v12563_v54 = vld [vmem:[#allocation43_spill] sm:$0xff] }
 0x4ec   : > { %8098 = vmatprep.mubr.msk.f32.mxu0 %vm3137_vm1, %v7386_v49  ;;  %8110 = vmatprep.subr.mxu1 %v2983_v59  ;;  %v3017_v29 = vpop.permute.xlu0 %3016  ;;  %v7418_v7 = vld [vmem:[%s12348_s3 + $0x180] sm:$0xff] }
 0x4ed   : > { %8138 = vmatprep.subr.mxu0 %v3111_v33  ;;  %8099 = vmatmul.mubr.msk.f32.vlgmr.msra.gmra.mxu0 %vm3137_vm1, %v7387_v25  ;;  %v2993_v35 = vpop.permute.xlu1 %2992  ;;  %v7404_v25 = vld [vmem:[%s12348_s3 + $0x150] sm:$0xff]  ;;  %v7422_v31 = vld [vmem:[%s12348_s3 + $0x1a0] sm:$0xff] }
 0x4ee   : > { %8111 = vmatpush3.msra.mxu1 %v2983_v59  ;;  %8139 = vmatpush3.msra.mxu0 %v3111_v33  ;;  %v11069_v38 = vsel %vm2771_vm3, %v2993_v35, %v3017_v29  ;;  %v7403_v33 = vld [vmem:[%s12348_s3 + $0x148] sm:$0xff]  ;;  %v12564_v59 = vld [vmem:[#allocation40_spill] sm:$0xff] }
 0x4ef   : > { %8112 = vmatprep.subr.mxu1 %v2982_v22  ;;  %8140 = vmatprep.subr.mxu0 %v3110_v21  ;;  %v7451_v29 = vld [vmem:[%s12348_s3 + $0x208] sm:$0xff] }
 0x4f0   : > { %8073 = vmatprep.mubr.msk.f32.mxu1 %vm3137_vm1, %v7372_v56  ;;  %8113 = vmatpush3.msra.mxu1 %v2982_v22  ;;  %v3073_v12 = vpop.permute.xlu0 %3072  ;;  %v7406_v56 = vld [vmem:[%s12348_s3 + $0x160] sm:$0xff]  ;;  %v7408_v22 = vld [vmem:[%s12348_s3 + $0x170] sm:$0xff] }
 0x4f1   : > { %8141 = vmatpush3.msra.mxu0 %v3110_v21  ;;  %8074 = vmatmul.mubr.msk.f32.gmra.mxu1 %vm3137_vm1, %v7373_v23  ;;  %v3049_v60 = vpop.permute.xlu1 %3048  ;;  %v12568_v21 = vld [vmem:[#allocation25_spill] sm:$0xff]  ;;  %v3115_v23 = vsel %vm10608_vm4, %v10987_v27, %v11000_v16  ;;  %v7439_v16 = vld [vmem:[%s12348_s3 + $0x1e8] sm:$0xff] }
 0x4f2   : > { %8114 = vmatprep.subr.mxu1 %v2981_v11  ;;  %8142 = vmatprep.subr.mxu0 %v3109_v20  ;;  %v11057_v44 = vsel %vm774_vm5, %v3049_v60, %v3073_v12  ;;  %v7437_v27 = vld [vmem:[%s12348_s3 + $0x1d8] sm:$0xff]  ;;  %v4506_v60 = vld [vmem:[%s12351_s6 + $0x28] sm:$0xff]  ;;  %v4505_v12 = vld [vmem:[%s12351_s6 + $0x20] sm:$0xff] }
 0x4f3   : > { %8101 = vmatprep.mubr.msk.f32.mxu0 %vm3137_vm1, %v7388_v17  ;;  %8115 = vmatpush3.msra.mxu1 %v2981_v11  ;;  %v3104_v49 = vsel %vm10604_vm2, %v11069_v38, %v11057_v44  ;;  %v12569_v17 = vld [vmem:[#allocation35_spill] sm:$0xff]  ;;  %v7434_v11 = vld [vmem:[%s12348_s3 + $0x1c0] sm:$0xff]  ;;  %v3112_v35 = vsel %vm10608_vm4, %v11057_v44, %v11069_v38 }
 0x4f4   : > { %8143 = vmatpush3.msra.mxu0 %v3109_v20  ;;  %8116 = vmatprep.subr.mxu1 %v2980_v15  ;;  %v12570_v20 = vld [vmem:[#allocation26_spill] sm:$0xff] }
 0x4f5   : > { %8102 = vmatmul.mubr.msk.f32.gmra.mxu0 %vm3137_vm1, %v7389_v40  ;;  %8144 = vmatprep.subr.mxu0 %v3108_v5  ;;  %v3113_v40 = vsel %vm10608_vm4, %v11037_v55, %v11050_v4  ;;  %v4504_v55 = vld [vmem:[%s12351_s6 + $0x18] sm:$0xff]  ;;  %v4501_v4 = vld [vmem:[%s12351_s6] sm:$0xff]  ;;  %vm4842_vm4 = vcmask 121856  }
 0x4f6   : > { %8076 = vmatprep.mubr.msk.f32.mxu1 %vm3137_vm1, %v7374_v57  ;;  %8117 = vmatpush3.msra.mxu1 %v2980_v15  ;;  %v7450_v15 = vld [vmem:[%s12348_s3 + $0x200] sm:$0xff]  ;;  %v7436_v57 = vld [vmem:[%s12348_s3 + $0x1d0] sm:$0xff] }
 0x4f7   : > { %8145 = vmatpush3.msra.mxu0 %v3108_v5  ;;  %8077 = vmatmul.mubr.msk.f32.gmra.mxu1 %vm3137_vm1, %v7375_v19  ;;  %v7452_v5 = vld [vmem:[%s12348_s3 + $0x210] sm:$0xff]  ;;  %v7453_v19 = vld [vmem:[%s12348_s3 + $0x218] sm:$0xff] }
 0x4f8   : > { %8118 = vmatprep.subr.mxu1 %v2979_v46  ;;  %8146 = vmatprep.subr.mxu0 %v3107_v24 }
 0x4f9   : > { %8104 = vmatprep.mubr.msk.f32.mxu0 %vm3137_vm1, %v7390_v0  ;;  %8119 = vmatpush3.msra.mxu1 %v2979_v46  ;;  %v7454_v0 = vld [vmem:[%s12348_s3 + $0x220] sm:$0xff]  ;;  %v7455_v46 = vld [vmem:[%s12348_s3 + $0x228] sm:$0xff] }
 0x4fa   : > { %8147 = vmatpush3.msra.mxu0 %v3107_v24  ;;  %8120 = vmatprep.subr.mxu1 %v2978_v58  ;;  %v7441_v24 = vld [vmem:[%s12348_s3 + $0x1f8] sm:$0xff] }
 0x4fb   : > { %8105 = vmatmul.mubr.msk.f32.gmra.mxu0 %vm3137_vm1, %v7391_v62  ;;  %8148 = vmatprep.subr.mxu0 %v3106_v14  ;;  %v7456_v62 = vld [vmem:[%s12348_s3 + $0x230] sm:$0xff] }
 0x4fc   : > { %8079 = vmatprep.mubr.msk.f32.mxu1 %vm3137_vm1, %v7376_v53  ;;  %8121 = vmatpush3.msra.mxu1 %v2978_v58  ;;  %v4508_v58 = vld [vmem:[%s12351_s6 + $0x38] sm:$0xff]  ;;  %v4507_v53 = vld [vmem:[%s12351_s6 + $0x30] sm:$0xff] }
 0x4fd   : > { %8149 = vmatpush3.msra.mxu0 %v3106_v14  ;;  %8080 = vmatmul.mubr.msk.f32.gmra.mxu1 %vm3137_vm1, %v7377_v28  ;;  %v4503_v14 = vld [vmem:[%s12351_s6 + $0x10] sm:$0xff]  ;;  %v4502_v28 = vld [vmem:[%s12351_s6 + $0x8] sm:$0xff] }
 0x4fe   : > { %8122 = vmatprep.subr.mxu1 %v2977_v6  ;;  %8150 = vmatprep.subr.mxu0 %v3105_v48 }
 0x4ff   : > { %8107 = vmatprep.mubr.msk.f32.mxu0 %vm3137_vm1, %v7392_v63  ;;  %8123 = vmatpush3.msra.mxu1 %v2977_v6 }
 0x500   : > { %8151 = vmatpush3.msra.mxu0 %v3105_v48  ;;  %8124 = vmatprep.subr.mxu1 %v2976_v47 }
 0x501   : > { %8108 = vmatmul.mubr.msk.f32.gmra.mxu0 %vm3137_vm1, %v7393_v39  ;;  %8125 = vmatpush3.msra.mxu1 %v2976_v47 }
 0x502   : > { %8126 = vmatprep.mubr.msk.f32.mxu1 %vm3137_vm1, %v7402_v3  ;;  %8152 = vmatprep.subr.mxu0 %v3104_v49 }
 0x503   : > { %8127 = vmatmul.mubr.msk.f32.vlgmr.msra.gmra.mxu1 %vm3137_vm1, %v7403_v33  ;;  %8166 = vmatprep.subr.mxu1 %v12563_v54 }
 0x504   : > { %8153 = vmatpush3.msra.mxu0 %v3104_v49  ;;  %8154 = vmatprep.mubr.msk.f32.mxu0 %vm3137_vm1, %v7418_v7 }
 0x505   : > { %8167 = vmatpush3.msra.mxu1 %v12563_v54  ;;  %8155 = vmatmul.mubr.msk.f32.vlgmr.msra.gmra.mxu0 %vm3137_vm1, %v7419_v10 }
 0x506   : > { %8168 = vmatprep.subr.mxu1 %v12564_v59  ;;  %8194 = vmatprep.subr.mxu0 %v3119_v8 }
 0x507   : > { %8129 = vmatprep.mubr.msk.f32.mxu1 %vm3137_vm1, %v7404_v25  ;;  %8169 = vmatpush3.msra.mxu1 %v12564_v59 }
 0x508   : > { %8195 = vmatpush3.msra.mxu0 %v3119_v8  ;;  %8130 = vmatmul.mubr.msk.f32.gmra.mxu1 %vm3137_vm1, %v7405_v26 }
 0x509   : > { %8170 = vmatprep.subr.mxu1 %v12565_v32  ;;  %8196 = vmatprep.subr.mxu0 %v3118_v52 }
 0x50a   : > { %8157 = vmatprep.mubr.msk.f32.mxu0 %vm3137_vm1, %v7420_v50  ;;  %8171 = vmatpush3.msra.mxu1 %v12565_v32 }
 0x50b   : > { %8197 = vmatpush3.msra.mxu0 %v3118_v52  ;;  %8172 = vmatprep.subr.mxu1 %v12566_v42 }
 0x50c   : > { %8158 = vmatmul.mubr.msk.f32.gmra.mxu0 %vm3137_vm1, %v7421_v37  ;;  %8198 = vmatprep.subr.mxu0 %v3117_v9 }
 0x50d   : > { %8132 = vmatprep.mubr.msk.f32.mxu1 %vm3137_vm1, %v7406_v56  ;;  %8173 = vmatpush3.msra.mxu1 %v12566_v42 }
 0x50e   : > { %8199 = vmatpush3.msra.mxu0 %v3117_v9  ;;  %8133 = vmatmul.mubr.msk.f32.gmra.mxu1 %vm3137_vm1, %v7407_v61 }
 0x50f   : > { %8174 = vmatprep.subr.mxu1 %v12567_v13  ;;  %8200 = vmatprep.subr.mxu0 %v3116_v30 }
 0x510   : > { %8160 = vmatprep.mubr.msk.f32.mxu0 %vm3137_vm1, %v7422_v31  ;;  %8175 = vmatpush3.msra.mxu1 %v12567_v13 }
 0x511   : > { %8201 = vmatpush3.msra.mxu0 %v3116_v30  ;;  %8176 = vmatprep.subr.mxu1 %v12568_v21 }
 0x512   : > { %8161 = vmatmul.mubr.msk.f32.gmra.mxu0 %vm3137_vm1, %v7423_v36  ;;  %8202 = vmatprep.subr.mxu0 %v3115_v23 }
 0x513   : > { %8135 = vmatprep.mubr.msk.f32.mxu1 %vm3137_vm1, %v7408_v22  ;;  %8177 = vmatpush3.msra.mxu1 %v12568_v21 }
 0x514   : > { %8203 = vmatpush3.msra.mxu0 %v3115_v23  ;;  %8136 = vmatmul.mubr.msk.f32.gmra.mxu1 %vm3137_vm1, %v7409_v45 }
 0x515   : > { %8178 = vmatprep.subr.mxu1 %v12569_v17  ;;  %8204 = vmatprep.subr.mxu0 %v3114_v41 }
 0x516   : > { %8163 = vmatprep.mubr.msk.f32.mxu0 %vm3137_vm1, %v7424_v43  ;;  %8179 = vmatpush3.msra.mxu1 %v12569_v17 }
 0x517   : > { %8205 = vmatpush3.msra.mxu0 %v3114_v41  ;;  %8180 = vmatprep.subr.mxu1 %v12570_v20 }
 0x518   : > { %8164 = vmatmul.mubr.msk.f32.gmra.mxu0 %vm3137_vm1, %v7425_v18  ;;  %8206 = vmatprep.subr.mxu0 %v3113_v40 }
 0x519   : > { %8181 = vmatpush3.msra.mxu1 %v12570_v20  ;;  %8182 = vmatprep.mubr.msk.f32.mxu1 %vm3137_vm1, %v7434_v11 }
 0x51a   : > { %8207 = vmatpush3.msra.mxu0 %v3113_v40  ;;  %8183 = vmatmul.mubr.msk.f32.vlgmr.msra.gmra.mxu1 %vm3137_vm1, %v7435_v51 }
 0x51b   : > { %8208 = vmatprep.subr.mxu0 %v3112_v35  ;;  %8210 = vmatprep.mubr.msk.f32.mxu0 %vm3137_vm1, %v7450_v15  ;;  %v7988_v63 = vpop.f32.mrf.mxu0 }
 0x51c   : > { %8209 = vmatpush3.msra.mxu0 %v3112_v35  ;;  %8185 = vmatprep.mubr.msk.f32.mxu1 %vm3137_vm1, %v7436_v57 }
 0x51d   : > { %8211 = vmatmul.mubr.msk.f32.vlgmr.msra.gmra.mxu0 %vm3137_vm1, %v7451_v29  ;;  %8222 = vmatprep.subr.mxu1 %v4508_v58  ;;  %v3228_v44 = vpop.f32.mrf.mxu0 }
 0x51e   : > { %8186 = vmatmul.mubr.msk.f32.gmra.mxu1 %vm3137_vm1, %v7437_v27  ;;  %8213 = vmatprep.mubr.msk.f32.mxu0 %vm3137_vm1, %v7452_v5 }
 0x51f   : > { %8188 = vmatprep.mubr.msk.f32.mxu1 %vm3137_vm1, %v7438_v2  ;;  %8223 = vmatpush3.msra.mxu1 %v4508_v58  ;;  %v7991_v6 = vpop.f32.mrf.mxu0 }
 0x520   : > { %8224 = vmatprep.subr.mxu1 %v4507_v53 }
 0x521   : > { %8214 = vmatmul.mubr.msk.f32.gmra.mxu0 %vm3137_vm1, %v7453_v19  ;;  %8225 = vmatpush3.msra.mxu1 %v4507_v53  ;;  %v3238_v48 = vpop.f32.mrf.mxu0 }
 0x522   : > { %8189 = vmatmul.mubr.msk.f32.gmra.mxu1 %vm3137_vm1, %v7439_v16  ;;  %8216 = vmatprep.mubr.msk.f32.mxu0 %vm3137_vm1, %v7454_v0 }
 0x523   : > { %8191 = vmatprep.mubr.msk.f32.mxu1 %vm3137_vm1, %v7440_v1  ;;  %8226 = vmatprep.subr.mxu1 %v4506_v60  ;;  %v7994_v38 = vpop.f32.mrf.mxu0 }
 0x524   : > { %8227 = vmatpush3.msra.mxu1 %v4506_v60 }
 0x525   : > { %8217 = vmatmul.mubr.msk.f32.gmra.mxu0 %vm3137_vm1, %v7455_v46  ;;  %8228 = vmatprep.subr.mxu1 %v4505_v12  ;;  %v3248_v39 = vpop.f32.mrf.mxu0 }
 0x526   : > { %8192 = vmatmul.mubr.msk.f32.gmra.mxu1 %vm3137_vm1, %v7441_v24  ;;  %8219 = vmatprep.mubr.msk.f32.mxu0 %vm3137_vm1, %v7456_v62 }
 0x527   : > { %8229 = vmatpush3.msra.mxu1 %v4505_v12  ;;  %v7997_v47 = vpop.f32.mrf.mxu0 }
 0x528   : > { %8230 = vmatprep.subr.mxu1 %v4504_v55 }
 0x529   : > { %8220 = vmatmul.mubr.msk.f32.gmra.mxu0 %vm3137_vm1, %v7457_v34  ;;  %8231 = vmatpush3.msra.mxu1 %v4504_v55  ;;  %v11284_v3 = vpop.f32.mrf.mxu0 }
 0x52a   : > { %8232 = vmatprep.subr.mxu1 %v4503_v14 }
 0x52b   : > { %8233 = vmatpush3.msra.mxu1 %v4503_v14 }
 0x52c   : > { %8234 = vmatprep.subr.mxu1 %v4502_v28 }
 0x52d   : > { %8235 = vmatpush3.msra.mxu1 %v4502_v28 }
 0x52e   : > { %8236 = vmatprep.subr.mxu1 %v4501_v4 }
 0x52f   : > { %8237 = vmatpush3.msra.mxu1 %v4501_v4 }
 0x594   : > { %v8016_v49 = vpop.f32.mrf.mxu1 }
 0x595   : > { %v8044_v33 = vpop.f32.mrf.mxu0  ;;  %v3363_v27 = vadd.f32 %v8016_v49, %v7988_v63 }
 0x596   : > { %v3357_v7 = vpop.f32.mrf.mxu1 }
 0x597   : > { %v3495_v10 = vpop.f32.mrf.mxu0  ;;  %v3358_v2 = vadd.f32 %v3357_v7, %v3228_v44  ;;  %v3535_v16 = vadd.f32 %v8044_v33, %v3363_v27 }
 0x599   : > { %v8019_v54 = vpop.f32.mrf.mxu1  ;;  %v3534_v24 = vadd.f32 %v3495_v10, %v3358_v2 }
 0x59a   : > { %v3373_v0 = vadd.f32 %v8019_v54, %v7991_v6 }
 0x59b   : > { %v3367_v25 = vpop.f32.mrf.mxu1  ;;  %v8047_v8 = vpop.f32.mrf.mxu0 }
 0x59c   : > { %v3368_v62 = vadd.f32 %v3367_v25, %v3238_v48  ;;  %v3537_v60 = vadd.f32 %v8047_v8, %v3373_v0 }
 0x59d   : > { %v3505_v26 = vpop.f32.mrf.mxu0 }
 0x59e   : > { %v3536_v14 = vadd.f32 %v3505_v26, %v3368_v62 }
 0x59f   : > { %v8022_v59 = vpop.f32.mrf.mxu1 }
 0x5a0   : > { %v3383_v58 = vadd.f32 %v8022_v59, %v7994_v38 }
 0x5a1   : > { %v3377_v50 = vpop.f32.mrf.mxu1  ;;  %v8050_v52 = vpop.f32.mrf.mxu0 }
 0x5a2   : > { %v3378_v28 = vadd.f32 %v3377_v50, %v3248_v39  ;;  %v3539_v63 = vadd.f32 %v8050_v52, %v3383_v58  ;;  %v4435_v39 = vpop.permute.xlu0 %4434 }
 0x5a3   : > { %v3515_v32 = vpop.f32.mrf.mxu0 }
 0x5a4   : > { %v3538_v38 = vadd.f32 %v3515_v32, %v3378_v28 }
 0x5a5   : > { %v8025_v37 = vpop.f32.mrf.mxu1 }
 0x5a6   : > { %v3393_v49 = vadd.f32 %v8025_v37, %v7997_v47 }
 0x5a7   : > { %v3387_v56 = vpop.f32.mrf.mxu1  ;;  %v8053_v42 = vpop.f32.mrf.mxu0 }
 0x5a8   : > { %v3388_v10 = vadd.f32 %v3387_v56, %v11284_v3 }
 0x5a9   : > { %v11286_v9 = vpop.f32.mrf.mxu0 }
 0x5aa   : > { %v3540_v37 = vadd.f32 %v11286_v9, %v3388_v10  ;;  %v4445_v9 = vpop.permute.xlu0 %4444 }
 0x5ab   : > { %v8072_v61 = vpop.f32.mrf.mxu1 }
 0x5ac   : > { %v3681_v34 = vadd.f32 %v8072_v61, %v3535_v16  ;;  %v3541_v61 = vadd.f32 %v8053_v42, %v3393_v49 }
 0x5ad   : > { %v3641_v31 = vpop.f32.mrf.mxu1  ;;  %v8100_v30 = vpop.f32.mrf.mxu0 }
 0x5ae   : > { %v3680_v12 = vadd.f32 %v3641_v31, %v3534_v24  ;;  %v3827_v4 = vadd.f32 %v8100_v30, %v3681_v34 }
 0x5af   : > { %v3787_v36 = vpop.f32.mrf.mxu0 }
 0x5b0   : > { %v3826_v33 = vadd.f32 %v3787_v36, %v3680_v12 }
 0x5b1   : > { %v8075_v13 = vpop.f32.mrf.mxu1 }
 0x5b3   : > { %v3651_v22 = vpop.f32.mrf.mxu1 }
 0x5b4   : > { %v3682_v6 = vadd.f32 %v3651_v22, %v3536_v14  ;;  %v4430_v22 = vpop.permute.xlu1 %4429 }
 0x5b5   : > { %v8103_v21 = vpop.f32.mrf.mxu0 }
 0x5b7   : > { %v8078_v23 = vpop.f32.mrf.mxu1  ;;  %v3797_v45 = vpop.f32.mrf.mxu0 }
 0x5b8   : > { %v3685_v48 = vadd.f32 %v8078_v23, %v3539_v63  ;;  %v3828_v50 = vadd.f32 %v3797_v45, %v3682_v6 }
 0x5b9   : > { %v3661_v43 = vpop.f32.mrf.mxu1 }
 0x5ba   : > { %v3684_v31 = vadd.f32 %v3661_v43, %v3538_v38 }
 0x5bb   : > { %v8106_v41 = vpop.f32.mrf.mxu0 }
 0x5bc   : > { %v3831_v30 = vadd.f32 %v8106_v41, %v3685_v48 }
 0x5bd   : > { %v8081_v17 = vpop.f32.mrf.mxu1  ;;  %v3807_v18 = vpop.f32.mrf.mxu0 }
 0x5be   : > { %v3687_v3 = vadd.f32 %v8081_v17, %v3541_v61 }
 0x5bf   : > { %v3671_v11 = vpop.f32.mrf.mxu1 }
 0x5c0   : > { %v3686_v32 = vadd.f32 %v3671_v11, %v3540_v37 }
 0x5c1   : > { %v11288_v20 = vpop.f32.mrf.mxu0 }
 0x5c2   : > { %v3833_v41 = vadd.f32 %v11288_v20, %v3687_v3 }
 0x5c3   : > { %v11290_v40 = vpop.f32.mrf.mxu0  ;;  %v8128_v51 = vpop.f32.mrf.mxu1 }
 0x5c4   : > { %12571 = vst [vmem:[#allocation32_spill] sm:$0xff] %v11290_v40  ;;  %v3683_v40 = vadd.f32 %v8075_v13, %v3537_v60  ;;  %v3973_v54 = vadd.f32 %v8128_v51, %v3827_v4 }
 0x5c5   : > { %v3933_v15 = vpop.f32.mrf.mxu1  ;;  %v8156_v57 = vpop.f32.mrf.mxu0 }
 0x5c6   : > { %v3829_v8 = vadd.f32 %v8103_v21, %v3683_v40  ;;  %v3972_v59 = vadd.f32 %v3933_v15, %v3826_v33  ;;  %v4119_v52 = vadd.f32 %v8156_v57, %v3973_v54  ;;  %v3830_v40 = vadd.f32 %v3807_v18, %v3684_v31  ;;  %v4455_v54 = vpop.permute.xlu0 %4454 }
 0x5c7   : > { %v4079_v29 = vpop.f32.mrf.mxu0  ;;  %v11294_v57 = vstv %s7466_s26 }
 0x5c8   : > { %v8131_v35 = vpop.f32.mrf.mxu1  ;;  %v4118_v56 = vadd.f32 %v4079_v29, %v3972_v59 }
 0x5c9   : > { %v3975_v47 = vadd.f32 %v8131_v35, %v3829_v8 }
 0x5ca   : > { %v3943_v5 = vpop.f32.mrf.mxu1  ;;  %v4465_v3 = vpop.permute.xlu0 %4464 }
 0x5cb   : > { %v3974_v23 = vadd.f32 %v3943_v5, %v3828_v50  ;;  %v12572_v5 = vld [vmem:[#allocation32_spill] sm:$0xff] }
 0x5cc   : > { %v8159_v19 = vpop.f32.mrf.mxu0  ;;  %v3832_v0 = vadd.f32 %v12572_v5, %v3686_v32 }
 0x5cd   : > { %v4121_v42 = vadd.f32 %v8159_v19, %v3975_v47  ;;  %v4440_v19 = vpop.permute.xlu1 %4439 }
 0x5ce   : > { %v8134_v1 = vpop.f32.mrf.mxu1  ;;  %v4089_v46 = vpop.f32.mrf.mxu0 }
 0x5cf   : > { %v3977_v15 = vadd.f32 %v8134_v1, %v3831_v30  ;;  %v4120_v2 = vadd.f32 %v4089_v46, %v3974_v23 }
 0x5d0   : > { %v3953_v53 = vpop.f32.mrf.mxu1 }
 0x5d1   : > { %v3976_v16 = vadd.f32 %v3953_v53, %v3830_v40  ;;  %v4450_v61 = vpop.permute.xlu1 %4449 }
 0x5d2   : > { %v8162_v55 = vpop.f32.mrf.mxu0 }
 0x5d3   : > { %v4123_v1 = vadd.f32 %v8162_v55, %v3977_v15 }
 0x5d4   : > { %v8137_v44 = vpop.f32.mrf.mxu1  ;;  %v4099_v7 = vpop.f32.mrf.mxu0 }
 0x5d5   : > { %v3979_v62 = vadd.f32 %v8137_v44, %v3833_v41  ;;  %v4122_v46 = vadd.f32 %v4099_v7, %v3976_v16  ;;  %v4460_v15 = vpop.permute.xlu1 %4459 }
 0x5d6   : > { %v3963_v25 = vpop.f32.mrf.mxu1 }
 0x5d7   : > { %v3978_v60 = vadd.f32 %v3963_v25, %v3832_v0 }
 0x5d8   : > { %v8165_v26 = vpop.f32.mrf.mxu0 }
 0x5d9   : > { %v4125_v55 = vadd.f32 %v8165_v26, %v3979_v62 }
 0x5da   : > { %v4109_v13 = vpop.f32.mrf.mxu0  ;;  %v8184_v36 = vpop.f32.mrf.mxu1 }
 0x5db   : > { %v4265_v51 = vadd.f32 %v8184_v36, %v4119_v52  ;;  %v4124_v48 = vadd.f32 %v4109_v13, %v3978_v60 }
 0x5dc   : > { %v4225_v21 = vpop.f32.mrf.mxu1 }
 0x5dd   : > { %v4264_v27 = vadd.f32 %v4225_v21, %v4118_v56  ;;  %v8212_v45 = vpop.f32.mrf.mxu0 }
 0x5de   : > { %v4411_v43 = vadd.f32 %v8212_v45, %v4265_v51  ;;  %v8187_v35 = vpop.f32.mrf.mxu1 }
 0x5df   : > { %v4267_v17 = vadd.f32 %v8187_v35, %v4121_v42  ;;  %v4371_v29 = vpop.f32.mrf.mxu0 }
 0x5e0   : > { %v4468_v11 = vadd.f32 %v4435_v39, %v4411_v43  ;;  %v4410_v24 = vadd.f32 %v4371_v29, %v4264_v27  ;;  %v4235_v18 = vpop.f32.mrf.mxu1 }
 0x5e1   : > { %v4266_v34 = vadd.f32 %v4235_v18, %v4120_v2  ;;  %v8215_v58 = vpop.f32.mrf.mxu0  ;;  %v12574_v18 = vld [vmem:[#allocation16_spill] sm:$0xff] }
 0x5e2   : > { %v4486_v12 = vmul.f32 %v11294_v57, %v4468_v11  ;;  %v4467_v14 = vadd.f32 %v4430_v22, %v4410_v24  ;;  %v4413_v28 = vadd.f32 %v8215_v58, %v4267_v17  ;;  %v8190_v20 = vpop.f32.mrf.mxu1  ;;  %vm4477_vm6 = vcmp.gt.f32.partialorder %v4468_v11, 0.0 }
 0x5e3   : > { %v4269_v53 = vadd.f32 %v8190_v20, %v4123_v1  ;;  %v4381_v4 = vpop.f32.mrf.mxu0 }
 0x5e4   : > { %v4485_v63 = vmul.f32 %v11294_v57, %v4467_v14  ;;  %v4470_v49 = vadd.f32 %v4445_v9, %v4413_v28  ;;  %v4412_v33 = vadd.f32 %v4381_v4, %v4266_v34  ;;  %v4245_v6 = vpop.f32.mrf.mxu1  ;;  %vm4476_vm7 = vcmp.gt.f32.partialorder %v4467_v14, 0.0 }
 0x5e5   : > { %v4268_v44 = vadd.f32 %v4245_v6, %v4122_v46  ;;  %v8218_v10 = vpop.f32.mrf.mxu0  ;;  %v4494_v25 = vsel %vm4477_vm6, %v4468_v11, %v4486_v12 }
 0x5e6   : > { %v4469_v38 = vadd.f32 %v4440_v19, %v4412_v33  ;;  %v4415_v8 = vadd.f32 %v8218_v10, %v4269_v53  ;;  %v8193_v59 = vpop.f32.mrf.mxu1  ;;  %vm4479_vm8 = vcmp.gt.f32.partialorder %v4470_v49, 0.0  ;;  %v4488_v7 = vmul.f32 %v11294_v57, %v4470_v49 }
 0x5e7   : > { %v4271_v39 = vadd.f32 %v8193_v59, %v4125_v55  ;;  %v4391_v50 = vpop.f32.mrf.mxu0  ;;  %v4493_v31 = vsel %vm4476_vm7, %v4467_v14, %v4485_v63  ;;  %v4638_v19 = vshrl.u32 %v12574_v18, 2 }
 0x5e8   : > { %v4487_v52 = vmul.f32 %v11294_v57, %v4469_v38  ;;  %v4472_v47 = vadd.f32 %v4455_v54, %v4415_v8  ;;  %v4414_v37 = vadd.f32 %v4391_v50, %v4268_v44  ;;  %8238 = vmatprep.mubr.msk.f32.mxu1 %vm3137_vm1, %v4493_v31  ;;  %v4255_v26 = vpop.f32.mrf.mxu1  ;;  %vm4478_vm9 = vcmp.gt.f32.partialorder %v4469_v38, 0.0 }
 0x5e9   : > { %8239 = vmatmul.mubr.msk.f32.vlgmr.msra.gmra.mxu1 %vm3137_vm1, %v4494_v25  ;;  %v4270_v30 = vadd.f32 %v4255_v26, %v4124_v48  ;;  %v8221_v13 = vpop.f32.mrf.mxu0  ;;  %v4496_v32 = vsel %vm4479_vm8, %v4470_v49, %v4488_v7  ;;  %vm11452_vm2 = vcmp.eq.s32.totalorder %v4638_v19, 3  ;;  %vm11470_vm3 = vcmp.eq.s32.totalorder %v4638_v19, 0 }
 0x5ea   : > { %v4471_v36 = vadd.f32 %v4450_v61, %v4414_v37  ;;  %v4417_v22 = vadd.f32 %v8221_v13, %v4271_v39  ;;  %v4490_v56 = vmul.f32 %v11294_v57, %v4472_v47  ;;  %v4495_v51 = vsel %vm4478_vm9, %v4469_v38, %v4487_v52 }
 0x5eb   : > { %v4401_v23 = vpop.f32.mrf.mxu0  ;;  %8241 = vmatprep.mubr.msk.f32.mxu1 %vm3137_vm1, %v4495_v51  ;;  %vm4481_vm11 = vcmp.gt.f32.partialorder %v4472_v47, 0.0 }
 0x5ec   : > { %v4489_v21 = vmul.f32 %v11294_v57, %v4471_v36  ;;  %v4474_v40 = vadd.f32 %v4465_v3, %v4417_v22  ;;  %v4416_v42 = vadd.f32 %v4401_v23, %v4270_v30  ;;  %vm4480_vm10 = vcmp.gt.f32.partialorder %v4471_v36, 0.0 }
 0x5ed   : > { %8242 = vmatmul.mubr.msk.f32.gmra.mxu1 %vm3137_vm1, %v4496_v32  ;;  %v4498_v9 = vsel %vm4481_vm11, %v4472_v47, %v4490_v56 }
 0x5ee   : > { %v4473_v27 = vadd.f32 %v4460_v15, %v4416_v42  ;;  %v4497_v45 = vsel %vm4480_vm10, %v4471_v36, %v4489_v21  ;;  %v4492_v43 = vmul.f32 %v11294_v57, %v4474_v40  ;;  %vm4483_vm13 = vcmp.gt.f32.partialorder %v4474_v40, 0.0 }
 0x5ef   : > { %8244 = vmatprep.mubr.msk.f32.mxu1 %vm3137_vm1, %v4497_v45 }
 0x5f0   : > { %v4491_v35 = vmul.f32 %v11294_v57, %v4473_v27  ;;  %vm4482_vm12 = vcmp.gt.f32.partialorder %v4473_v27, 0.0  ;;  %v4500_v2 = vsel %vm4483_vm13, %v4474_v40, %v4492_v43 }
 0x5f1   : > { %8245 = vmatmul.mubr.msk.f32.gmra.mxu1 %vm3137_vm1, %v4498_v9 }
 0x5f2   : > { %v4499_v41 = vsel %vm4482_vm12, %v4473_v27, %v4491_v35 }
 0x5f3   : > { %8247 = vmatprep.mubr.msk.f32.mxu1 %vm3137_vm1, %v4499_v41 }
 0x5f5   : > { %8248 = vmatmul.mubr.msk.f32.gmra.mxu1 %vm3137_vm1, %v4500_v2 }
 0x6a9   : > { %v11315_v16 = vpop.f32.mrf.mxu1 }
 0x6aa   : > { %4678 = vrot.lane.b32.xlu0 %v11315_v16, %s8855_s30  ;;  %4654 = vrot.lane.b32.xlu1 %v11315_v16, %s8856_s21 }
 0x6ab   : > { %v11333_v57 = vpop.f32.mrf.mxu1 }
 0x6ac   : > { %12573 = vst [vmem:[#allocation38_spill] sm:$0xff] %v11333_v57 }
 0x6ad   : > { %v11351_v17 = vpop.f32.mrf.mxu1 }
 0x6ae   : > { %4735 = vrot.lane.b32.xlu0 %v11315_v16, %s8857_s23  ;;  %4711 = vrot.lane.b32.xlu1 %v11315_v16, %s8858_s27 }
 0x6af   : > { %v11369_v29 = vpop.f32.mrf.mxu1 }
 0x6b1   : > { %v11387_v5 = vpop.f32.mrf.mxu1 }
 0x6b2   : > { %4953 = vrot.lane.b32.xlu0 %v11315_v16, %s8859_s28  ;;  %4929 = vrot.lane.b32.xlu1 %v11315_v16, %s8846_s1 }
 0x6b3   : > { %v11405_v0 = vpop.f32.mrf.mxu1 }
 0x6b5   : > { %v11423_v11 = vpop.f32.mrf.mxu1 }
 0x6b6   : > { %5009 = vrot.lane.b32.xlu0 %v11315_v16, %s8847_s0  ;;  %4985 = vrot.lane.b32.xlu1 %v11315_v16, %s8860_s18 }
 0x6b7   : > { %v11441_v24 = vpop.f32.mrf.mxu1 }
 0x6ba   : > { %4676 = vrot.lane.b32.xlu0 %v11333_v57, %s8855_s30  ;;  %4652 = vrot.lane.b32.xlu1 %v11333_v57, %s8856_s21 }
 0x6be   : > { %4733 = vrot.lane.b32.xlu0 %v11333_v57, %s8857_s23  ;;  %4709 = vrot.lane.b32.xlu1 %v11333_v57, %s8858_s27 }
 0x6c2   : > { %4951 = vrot.lane.b32.xlu0 %v11333_v57, %s8859_s28  ;;  %4927 = vrot.lane.b32.xlu1 %v11333_v57, %s8846_s1 }
 0x6c6   : > { %5007 = vrot.lane.b32.xlu0 %v11333_v57, %s8847_s0  ;;  %4983 = vrot.lane.b32.xlu1 %v11333_v57, %s8860_s18 }
 0x6ca   : > { %4682 = vrot.lane.b32.xlu0 %v11351_v17, %s8855_s30  ;;  %4658 = vrot.lane.b32.xlu1 %v11351_v17, %s8856_s21 }
 0x6ce   : > { %4739 = vrot.lane.b32.xlu0 %v11351_v17, %s8857_s23  ;;  %4715 = vrot.lane.b32.xlu1 %v11351_v17, %s8858_s27 }
 0x6d2   : > { %4957 = vrot.lane.b32.xlu0 %v11351_v17, %s8859_s28  ;;  %4933 = vrot.lane.b32.xlu1 %v11351_v17, %s8846_s1 }
 0x6d6   : > { %5013 = vrot.lane.b32.xlu0 %v11351_v17, %s8847_s0  ;;  %4989 = vrot.lane.b32.xlu1 %v11351_v17, %s8860_s18 }
 0x6da   : > { %4680 = vrot.lane.b32.xlu0 %v11369_v29, %s8855_s30  ;;  %4656 = vrot.lane.b32.xlu1 %v11369_v29, %s8856_s21 }
 0x6de   : > { %4737 = vrot.lane.b32.xlu0 %v11369_v29, %s8857_s23  ;;  %4713 = vrot.lane.b32.xlu1 %v11369_v29, %s8858_s27 }
 0x6e2   : > { %4955 = vrot.lane.b32.xlu0 %v11369_v29, %s8859_s28  ;;  %4931 = vrot.lane.b32.xlu1 %v11369_v29, %s8846_s1 }
 0x6e6   : > { %5011 = vrot.lane.b32.xlu0 %v11369_v29, %s8847_s0  ;;  %4987 = vrot.lane.b32.xlu1 %v11369_v29, %s8860_s18 }
 0x6ea   : > { %4686 = vrot.lane.b32.xlu0 %v11387_v5, %s8855_s30  ;;  %4662 = vrot.lane.b32.xlu1 %v11387_v5, %s8856_s21 }
 0x6ee   : > { %4743 = vrot.lane.b32.xlu0 %v11387_v5, %s8857_s23  ;;  %4719 = vrot.lane.b32.xlu1 %v11387_v5, %s8858_s27 }
 0x6f2   : > { %4961 = vrot.lane.b32.xlu0 %v11387_v5, %s8859_s28  ;;  %4937 = vrot.lane.b32.xlu1 %v11387_v5, %s8846_s1 }
 0x6f6   : > { %5017 = vrot.lane.b32.xlu0 %v11387_v5, %s8847_s0  ;;  %4993 = vrot.lane.b32.xlu1 %v11387_v5, %s8860_s18 }
 0x6fa   : > { %4684 = vrot.lane.b32.xlu0 %v11405_v0, %s8855_s30  ;;  %4660 = vrot.lane.b32.xlu1 %v11405_v0, %s8856_s21 }
 0x6fe   : > { %4741 = vrot.lane.b32.xlu0 %v11405_v0, %s8857_s23  ;;  %4717 = vrot.lane.b32.xlu1 %v11405_v0, %s8858_s27 }
 0x702   : > { %4959 = vrot.lane.b32.xlu0 %v11405_v0, %s8859_s28  ;;  %4935 = vrot.lane.b32.xlu1 %v11405_v0, %s8846_s1 }
 0x706   : > { %5015 = vrot.lane.b32.xlu0 %v11405_v0, %s8847_s0  ;;  %4991 = vrot.lane.b32.xlu1 %v11405_v0, %s8860_s18 }
 0x70a   : > { %4690 = vrot.lane.b32.xlu0 %v11423_v11, %s8855_s30  ;;  %4666 = vrot.lane.b32.xlu1 %v11423_v11, %s8856_s21 }
 0x70e   : > { %4747 = vrot.lane.b32.xlu0 %v11423_v11, %s8857_s23  ;;  %4723 = vrot.lane.b32.xlu1 %v11423_v11, %s8858_s27 }
 0x712   : > { %4965 = vrot.lane.b32.xlu0 %v11423_v11, %s8859_s28  ;;  %4941 = vrot.lane.b32.xlu1 %v11423_v11, %s8846_s1 }
 0x716   : > { %5021 = vrot.lane.b32.xlu0 %v11423_v11, %s8847_s0  ;;  %4997 = vrot.lane.b32.xlu1 %v11423_v11, %s8860_s18 }
 0x71a   : > { %4688 = vrot.lane.b32.xlu0 %v11441_v24, %s8855_s30  ;;  %4664 = vrot.lane.b32.xlu1 %v11441_v24, %s8856_s21 }
 0x71c   : > { %v4655_v1 = vpop.permute.xlu1 %4654  ;;  %v4679_v62 = vpop.permute.xlu0 %4678 }
 0x71d   : > { %v4702_v12 = vsel %vm4700_vm14, %v4655_v1, %v4679_v62 }
 0x71e   : > { %4745 = vrot.lane.b32.xlu0 %v11441_v24, %s8857_s23  ;;  %4721 = vrot.lane.b32.xlu1 %v11441_v24, %s8858_s27 }
 0x720   : > { %v4712_v58 = vpop.permute.xlu1 %4711  ;;  %v4736_v60 = vpop.permute.xlu0 %4735 }
 0x721   : > { %v4759_v14 = vsel %vm4757_vm15, %v4712_v58, %v4736_v60 }
 0x722   : > { %v11460_v28 = vsel %vm11452_vm2, %v4759_v14, %v4702_v12  ;;  %4963 = vrot.lane.b32.xlu0 %v11441_v24, %s8859_s28  ;;  %4939 = vrot.lane.b32.xlu1 %v11441_v24, %s8846_s1  ;;  %v11484_v49 = vsel %vm11470_vm3, %v4702_v12, %v4759_v14 }
 0x723   : > { %12577 = vst [vmem:[#allocation36_spill] sm:$0xff] %v11460_v28 }
 0x724   : > { %v11466_v20 = vpop.permute.xlu1 %4929  ;;  %v11468_v46 = vpop.permute.xlu0 %4953 }
 0x726   : > { %5019 = vrot.lane.b32.xlu0 %v11441_v24, %s8847_s0  ;;  %4995 = vrot.lane.b32.xlu1 %v11441_v24, %s8860_s18 }
 0x728   : > { %v11478_v4 = vpop.permute.xlu1 %4985  ;;  %v11480_v63 = vpop.permute.xlu0 %5009 }
 0x72a   : > { %4820 = vrot.lane.b32.xlu0 %v11484_v49, %s8859_s28  ;;  %4796 = vrot.lane.b32.xlu1 %v11484_v49, %s8846_s1 }
 0x72c   : > { %v4653_v33 = vpop.permute.xlu1 %4652  ;;  %v4677_v6 = vpop.permute.xlu0 %4676 }
 0x72d   : > { %v4701_v44 = vsel %vm4700_vm14, %v4653_v33, %v4677_v6 }
 0x72e   : > { %4877 = vrot.lane.b32.xlu0 %v11484_v49, %s8847_s0  ;;  %4853 = vrot.lane.b32.xlu1 %v11484_v49, %s8860_s18 }
 0x730   : > { %v4710_v54 = vpop.permute.xlu1 %4709  ;;  %v4734_v55 = vpop.permute.xlu0 %4733 }
 0x731   : > { %v4758_v10 = vsel %vm4757_vm15, %v4710_v54, %v4734_v55 }
 0x732   : > { %v11498_v48 = vsel %vm11470_vm3, %v4701_v44, %v4758_v10  ;;  %v11502_v25 = vsel %vm11452_vm2, %v4758_v10, %v4701_v44 }
 0x733   : > { %12580 = vst [vmem:[#allocation31_spill] sm:$0xff] %v11502_v25  ;;  %4818 = vrot.lane.b32.xlu0 %v11498_v48, %s8859_s28  ;;  %4794 = vrot.lane.b32.xlu1 %v11498_v48, %s8846_s1 }
 0x734   : > { %v11508_v38 = vpop.permute.xlu1 %4927  ;;  %v11510_v8 = vpop.permute.xlu0 %4951 }
 0x737   : > { %4875 = vrot.lane.b32.xlu0 %v11498_v48, %s8847_s0  ;;  %4851 = vrot.lane.b32.xlu1 %v11498_v48, %s8860_s18 }
 0x738   : > { %v11516_v59 = vpop.permute.xlu1 %4983  ;;  %v11518_v61 = vpop.permute.xlu0 %5007 }
 0x73c   : > { %v4659_v7 = vpop.permute.xlu1 %4658  ;;  %v4683_v39 = vpop.permute.xlu0 %4682 }
 0x73d   : > { %v4704_v52 = vsel %vm4700_vm14, %v4659_v7, %v4683_v39 }
 0x740   : > { %v4716_v50 = vpop.permute.xlu1 %4715  ;;  %v4740_v31 = vpop.permute.xlu0 %4739 }
 0x741   : > { %v4761_v47 = vsel %vm4757_vm15, %v4716_v50, %v4740_v31 }
 0x742   : > { %v11524_v37 = vsel %vm11470_vm3, %v4704_v52, %v4761_v47  ;;  %v11528_v26 = vsel %vm11452_vm2, %v4761_v47, %v4704_v52  ;;  %v4639_v52 = vand.u32 3, %v12574_v18 }
 0x743   : > { %12581 = vst [vmem:[#allocation29_spill] sm:$0xff] %v11528_v26  ;;  %4824 = vrot.lane.b32.xlu0 %v11524_v37, %s8859_s28  ;;  %4800 = vrot.lane.b32.xlu1 %v11524_v37, %s8846_s1 }
 0x744   : > { %v11534_v30 = vpop.permute.xlu1 %4933  ;;  %v11536_v13 = vpop.permute.xlu0 %4957  ;;  %vm11628_vm6 = vcmp.eq.s32.totalorder %v4639_v52, 0  ;;  %vm11632_vm7 = vcmp.eq.s32.totalorder %v4639_v52, 3 }
 0x747   : > { %4881 = vrot.lane.b32.xlu0 %v11524_v37, %s8847_s0  ;;  %4857 = vrot.lane.b32.xlu1 %v11524_v37, %s8860_s18 }
 0x748   : > { %v11542_v36 = vpop.permute.xlu1 %4989  ;;  %v11544_v22 = vpop.permute.xlu0 %5013 }
 0x74c   : > { %v4657_v3 = vpop.permute.xlu1 %4656  ;;  %v4681_v56 = vpop.permute.xlu0 %4680 }
 0x74d   : > { %v4703_v32 = vsel %vm4700_vm14, %v4657_v3, %v4681_v56 }
 0x750   : > { %v4714_v23 = vpop.permute.xlu1 %4713  ;;  %v4738_v51 = vpop.permute.xlu0 %4737 }
 0x751   : > { %v4760_v21 = vsel %vm4757_vm15, %v4714_v23, %v4738_v51  ;;  %v6347_v51 = vld [vmem:[#allocation2 + $0x220] sm:$0xff] }
 0x752   : > { %v11550_v40 = vsel %vm11470_vm3, %v4703_v32, %v4760_v21  ;;  %v11554_v42 = vsel %vm11452_vm2, %v4760_v21, %v4703_v32  ;;  %v5200_v32 = vld [vmem:[#allocation2 + $0x40] sm:$0xff] }
 0x753   : > { %12582 = vst [vmem:[#allocation27_spill] sm:$0xff] %v11554_v42  ;;  %4822 = vrot.lane.b32.xlu0 %v11550_v40, %s8859_s28  ;;  %4798 = vrot.lane.b32.xlu1 %v11550_v40, %s8846_s1 }
 0x754   : > { %v11560_v15 = vpop.permute.xlu1 %4931  ;;  %v11562_v27 = vpop.permute.xlu0 %4955  ;;  %8266 = vmatprep.mubr.msk.f32.mxu0 %vm3137_vm1, %v5200_v32 }
 0x757   : > { %4879 = vrot.lane.b32.xlu0 %v11550_v40, %s8847_s0  ;;  %4855 = vrot.lane.b32.xlu1 %v11550_v40, %s8860_s18 }
 0x758   : > { %v11568_v45 = vpop.permute.xlu1 %4987  ;;  %v11570_v43 = vpop.permute.xlu0 %5011 }
 0x75c   : > { %v4663_v35 = vpop.permute.xlu1 %4662  ;;  %v4687_v9 = vpop.permute.xlu0 %4686 }
 0x75d   : > { %v4706_v19 = vsel %vm4700_vm14, %v4663_v35, %v4687_v9 }
 0x760   : > { %v4720_v41 = vpop.permute.xlu1 %4719  ;;  %v4744_v2 = vpop.permute.xlu0 %4743 }
 0x761   : > { %v4763_v1 = vsel %vm4757_vm15, %v4720_v41, %v4744_v2 }
 0x762   : > { %v11576_v62 = vsel %vm11470_vm3, %v4706_v19, %v4763_v1  ;;  %v11596_v33 = vsel %vm11452_vm2, %v4763_v1, %v4706_v19 }
 0x763   : > { %4828 = vrot.lane.b32.xlu0 %v11576_v62, %s8859_s28  ;;  %4804 = vrot.lane.b32.xlu1 %v11576_v62, %s8846_s1  ;;  %12583 = vst [vmem:[#allocation34_spill] sm:$0xff] %v11596_v33 }
 0x764   : > { %v11582_v58 = vpop.permute.xlu1 %4937  ;;  %v11584_v60 = vpop.permute.xlu0 %4961 }
 0x767   : > { %4885 = vrot.lane.b32.xlu0 %v11576_v62, %s8847_s0  ;;  %4861 = vrot.lane.b32.xlu1 %v11576_v62, %s8860_s18 }
 0x768   : > { %v11590_v12 = vpop.permute.xlu1 %4993  ;;  %v11592_v14 = vpop.permute.xlu0 %5017 }
 0x76b   : > { %5097 = vrot.lane.b32.xlu0 %v11596_v33, %s8859_s28  ;;  %5073 = vrot.lane.b32.xlu1 %v11596_v33, %s8846_s1 }
 0x76c   : > { %v4661_v6 = vpop.permute.xlu1 %4660  ;;  %v4685_v54 = vpop.permute.xlu0 %4684 }
 0x76d   : > { %v11607_v10 = vsel %vm4700_vm14, %v4661_v6, %v4685_v54 }
 0x76f   : > { %5153 = vrot.lane.b32.xlu0 %v11596_v33, %s8847_s0  ;;  %5129 = vrot.lane.b32.xlu1 %v11596_v33, %s8860_s18 }
 0x770   : > { %v4718_v55 = vpop.permute.xlu1 %4717  ;;  %v4742_v44 = vpop.permute.xlu0 %4741 }
 0x771   : > { %v11610_v7 = vsel %vm4757_vm15, %v4718_v55, %v4742_v44 }
 0x772   : > { %v11616_v39 = vsel %vm11470_vm3, %v11607_v10, %v11610_v7 }
 0x773   : > { %4826 = vrot.lane.b32.xlu0 %v11616_v39, %s8859_s28  ;;  %4802 = vrot.lane.b32.xlu1 %v11616_v39, %s8846_s1 }
 0x774   : > { %v4936_v50 = vpop.permute.xlu1 %4935  ;;  %v4960_v31 = vpop.permute.xlu0 %4959 }
 0x775   : > { %v4979_v47 = vsel %vm4842_vm4, %v4936_v50, %v4960_v31 }
 0x777   : > { %4883 = vrot.lane.b32.xlu0 %v11616_v39, %s8847_s0  ;;  %4859 = vrot.lane.b32.xlu1 %v11616_v39, %s8860_s18 }
 0x778   : > { %v4992_v3 = vpop.permute.xlu1 %4991  ;;  %v5016_v56 = vpop.permute.xlu0 %5015 }
 0x779   : > { %v5035_v18 = vsel %vm774_vm5, %v4992_v3, %v5016_v56 }
 0x77a   : > { %v11639_v21 = vsel %vm11628_vm6, %v4979_v47, %v5035_v18  ;;  %v11643_v35 = vsel %vm11632_vm7, %v5035_v18, %v4979_v47 }
 0x77b   : > { %12588 = vst [vmem:[#allocation19_spill] sm:$0xff] %v11643_v35 }
 0x77c   : > { %v4667_v9 = vpop.permute.xlu1 %4666  ;;  %v4691_v41 = vpop.permute.xlu0 %4690 }
 0x77d   : > { %v4708_v1 = vsel %vm4700_vm14, %v4667_v9, %v4691_v41 }
 0x780   : > { %v4724_v2 = vpop.permute.xlu1 %4723  ;;  %v4748_v19 = vpop.permute.xlu0 %4747 }
 0x781   : > { %v4765_v6 = vsel %vm4757_vm15, %v4724_v2, %v4748_v19 }
 0x782   : > { %v4775_v54 = vsel %vm11470_vm3, %v4708_v1, %v4765_v6  ;;  %v11658_v3 = vsel %vm11452_vm2, %v4765_v6, %v4708_v1 }
 0x783   : > { %4832 = vrot.lane.b32.xlu0 %v4775_v54, %s8859_s28  ;;  %4808 = vrot.lane.b32.xlu1 %v4775_v54, %s8846_s1  ;;  %12589 = vst [vmem:[#allocation23_spill] sm:$0xff] %v11658_v3 }
 0x784   : > { %8250 = vmatprep.subr.mxu0 %v4775_v54  ;;  %v4942_v55 = vpop.permute.xlu1 %4941  ;;  %v4966_v44 = vpop.permute.xlu0 %4965 }
 0x785   : > { %8251 = vmatpush3.msra.mxu0 %v4775_v54  ;;  %v4982_v50 = vsel %vm4842_vm4, %v4942_v55, %v4966_v44 }
 0x787   : > { %4889 = vrot.lane.b32.xlu0 %v4775_v54, %s8847_s0  ;;  %4865 = vrot.lane.b32.xlu1 %v4775_v54, %s8860_s18 }
 0x788   : > { %v4998_v31 = vpop.permute.xlu1 %4997  ;;  %v5022_v52 = vpop.permute.xlu0 %5021 }
 0x789   : > { %v5038_v47 = vsel %vm774_vm5, %v4998_v31, %v5022_v52  ;;  %v5191_v52 = vld [vmem:[#allocation2] sm:$0xff] }
 0x78a   : > { %v11662_v56 = vsel %vm11628_vm6, %v4982_v50, %v5038_v47  ;;  %v11666_v18 = vsel %vm11632_vm7, %v5038_v47, %v4982_v50  ;;  %v11700_v47 = vsel %vm11452_vm2, %v11610_v7, %v11607_v10  ;;  %8294 = vmatprep.mubr.msk.f32.mxu1 %vm3137_vm1, %v5191_v52 }
 0x78b   : > { %12590 = vst [vmem:[#allocation21_spill] sm:$0xff] %v11666_v18  ;;  %5101 = vrot.lane.b32.xlu0 %v11658_v3, %s8859_s28  ;;  %5077 = vrot.lane.b32.xlu1 %v11658_v3, %s8846_s1  ;;  %12591 = vst [vmem:[#allocation24_spill] sm:$0xff] %v11700_v47 }
 0x78c   : > { %v4665_v32 = vpop.permute.xlu1 %4664  ;;  %v4689_v9 = vpop.permute.xlu0 %4688 }
 0x78d   : > { %v11677_v19 = vsel %vm4700_vm14, %v4665_v32, %v4689_v9 }
 0x78f   : > { %5157 = vrot.lane.b32.xlu0 %v11658_v3, %s8847_s0  ;;  %5133 = vrot.lane.b32.xlu1 %v11658_v3, %s8860_s18 }
 0x790   : > { %v4722_v41 = vpop.permute.xlu1 %4721  ;;  %v4746_v2 = vpop.permute.xlu0 %4745 }
 0x791   : > { %v11680_v1 = vsel %vm4757_vm15, %v4722_v41, %v4746_v2  ;;  %v5202_v2 = vld [vmem:[#allocation2 + $0x50] sm:$0xff] }
 0x792   : > { %v4774_v6 = vsel %vm11470_vm3, %v11677_v19, %v11680_v1 }
 0x793   : > { %4830 = vrot.lane.b32.xlu0 %v4774_v6, %s8859_s28  ;;  %4806 = vrot.lane.b32.xlu1 %v4774_v6, %s8846_s1 }
 0x794   : > { %8252 = vmatprep.subr.mxu0 %v4774_v6  ;;  %v4940_v54 = vpop.permute.xlu1 %4939  ;;  %v4964_v55 = vpop.permute.xlu0 %4963 }
 0x795   : > { %8253 = vmatpush3.msra.mxu0 %v4774_v6  ;;  %v4981_v44 = vsel %vm4842_vm4, %v4940_v54, %v4964_v55  ;;  %v5203_v54 = vld [vmem:[#allocation2 + $0x58] sm:$0xff] }
 0x796   : > { %8254 = vmatprep.subr.mxu0 %v11576_v62 }
 0x797   : > { %8255 = vmatpush3.msra.mxu0 %v11576_v62  ;;  %4887 = vrot.lane.b32.xlu0 %v4774_v6, %s8847_s0 }
 0x798   : > { %4863 = vrot.lane.b32.xlu1 %v4774_v6, %s8860_s18  ;;  %8256 = vmatprep.subr.mxu0 %v11616_v39  ;;  %v4996_v53 = vpop.permute.xlu1 %4995  ;;  %v5020_v50 = vpop.permute.xlu0 %5019 }
 0x799   : > { %8257 = vmatpush3.msra.mxu0 %v11616_v39  ;;  %v5037_v31 = vsel %vm774_vm5, %v4996_v53, %v5020_v50  ;;  %v5205_v50 = vld [vmem:[#allocation2 + $0x68] sm:$0xff] }
 0x79a   : > { %8258 = vmatprep.subr.mxu0 %v11524_v37  ;;  %v11706_v62 = vsel %vm11628_vm6, %v4981_v44, %v5037_v31  ;;  %v11710_v39 = vsel %vm11632_vm7, %v5037_v31, %v4981_v44  ;;  %v5206_v31 = vld [vmem:[#allocation2 + $0x70] sm:$0xff] }
 0x79b   : > { %12592 = vst [vmem:[#allocation20_spill] sm:$0xff] %v11710_v39  ;;  %8259 = vmatpush3.msra.mxu0 %v11524_v37  ;;  %5095 = vrot.lane.b32.xlu0 %v11700_v47, %s8859_s28  ;;  %v5201_v37 = vld [vmem:[#allocation2 + $0x48] sm:$0xff] }
 0x79c   : > { %5071 = vrot.lane.b32.xlu1 %v11700_v47, %s8846_s1  ;;  %8260 = vmatprep.subr.mxu0 %v11550_v40  ;;  %v4797_v10 = vpop.permute.xlu1 %4796  ;;  %v4821_v7 = vpop.permute.xlu0 %4820 }
 0x79d   : > { %8261 = vmatpush3.msra.mxu0 %v11550_v40  ;;  %v4844_v32 = vsel %vm4842_vm4, %v4797_v10, %v4821_v7 }
 0x79e   : > { %8262 = vmatprep.subr.mxu0 %v11484_v49 }
 0x79f   : > { %8263 = vmatpush3.msra.mxu0 %v11484_v49  ;;  %5151 = vrot.lane.b32.xlu0 %v11700_v47, %s8847_s0 }
 0x7a0   : > { %5127 = vrot.lane.b32.xlu1 %v11700_v47, %s8860_s18  ;;  %8264 = vmatprep.subr.mxu0 %v11498_v48  ;;  %v4854_v9 = vpop.permute.xlu1 %4853  ;;  %v4878_v41 = vpop.permute.xlu0 %4877 }
 0x7a1   : > { %8265 = vmatpush3.msra.mxu0 %v11498_v48  ;;  %v4900_v40 = vsel %vm774_vm5, %v4854_v9, %v4878_v41  ;;  %v5204_v48 = vld [vmem:[#allocation2 + $0x60] sm:$0xff] }
 0x7a2   : > { %8267 = vmatmul.mubr.msk.f32.vlgmr.msra.gmra.mxu0 %vm3137_vm1, %v5201_v37  ;;  %v11732_v49 = vsel %vm11628_vm6, %v4844_v32, %v4900_v40  ;;  %v11736_v6 = vsel %vm11632_vm7, %v4900_v40, %v4844_v32  ;;  %v5207_v32 = vld [vmem:[#allocation2 + $0x78] sm:$0xff]  ;;  %v5467_v41 = vld [vmem:[#allocation2 + $0x80] sm:$0xff] }
 0x7a3   : > { %5093 = vrot.lane.b32.xlu0 %v11528_v26, %s8859_s28  ;;  %8269 = vmatprep.mubr.msk.f32.mxu0 %vm3137_vm1, %v5202_v2 }
 0x7a4   : > { %5069 = vrot.lane.b32.xlu1 %v11528_v26, %s8846_s1 }
 0x7a5   : > { %v4795_v55 = vpop.permute.xlu1 %4794  ;;  %v4819_v44 = vpop.permute.xlu0 %4818 }
 0x7a6   : > { %v4843_v53 = vsel %vm4842_vm4, %v4795_v55, %v4819_v44  ;;  %8270 = vmatmul.mubr.msk.f32.gmra.mxu0 %vm3137_vm1, %v5203_v54  ;;  %v11779_v54 = vsel %vm11452_vm2, %v11680_v1, %v11677_v19  ;;  %v6490_v1 = vld [vmem:[#allocation7 + $0x88] sm:$0xff]  ;;  %v6489_v55 = vld [vmem:[#allocation7 + $0x80] sm:$0xff]  ;;  %vm6727_vm2 = vcmask 1043456  }
 0x7a7   : > { %5149 = vrot.lane.b32.xlu0 %v11528_v26, %s8847_s0  ;;  %8272 = vmatprep.mubr.msk.f32.mxu0 %vm3137_vm1, %v5204_v48  ;;  %12593 = vst [vmem:[#allocation37_spill] sm:$0xff] %v11779_v54 }
 0x7a8   : > { %5125 = vrot.lane.b32.xlu1 %v11528_v26, %s8860_s18 }
 0x7a9   : > { %v4852_v52 = vpop.permute.xlu1 %4851  ;;  %v4876_v10 = vpop.permute.xlu0 %4875 }
 0x7aa   : > { %v4899_v7 = vsel %vm774_vm5, %v4852_v52, %v4876_v10  ;;  %8273 = vmatmul.mubr.msk.f32.gmra.mxu0 %vm3137_vm1, %v5205_v50  ;;  %v6492_v50 = vld [vmem:[#allocation7 + $0x98] sm:$0xff]  ;;  %v6494_v52 = vld [vmem:[#allocation7 + $0xa8] sm:$0xff] }
 0x7ab   : > { %5091 = vrot.lane.b32.xlu0 %v11554_v42, %s8859_s28  ;;  %8275 = vmatprep.mubr.msk.f32.mxu0 %vm3137_vm1, %v5206_v31  ;;  %v11757_v37 = vsel %vm11628_vm6, %v4843_v53, %v4899_v7  ;;  %v11761_v9 = vsel %vm11632_vm7, %v4899_v7, %v4843_v53  ;;  %v6491_v31 = vld [vmem:[#allocation7 + $0x90] sm:$0xff] }
 0x7ac   : > { %5067 = vrot.lane.b32.xlu1 %v11554_v42, %s8846_s1 }
 0x7ae   : > { %8276 = vmatmul.mubr.msk.f32.gmra.mxu0 %vm3137_vm1, %v5207_v32  ;;  %v6493_v32 = vld [vmem:[#allocation7 + $0xa0] sm:$0xff] }
 0x7af   : > { %5147 = vrot.lane.b32.xlu0 %v11554_v42, %s8847_s0  ;;  %8322 = vmatprep.mubr.msk.f32.mxu0 %vm3137_vm1, %v5467_v41  ;;  %v6496_v41 = vld [vmem:[#allocation7 + $0xb8] sm:$0xff] }
 0x7b0   : > { %5123 = vrot.lane.b32.xlu1 %v11554_v42, %s8860_s18 }
 0x7b3   : > { %5089 = vrot.lane.b32.xlu0 %v11460_v28, %s8859_s28 }
 0x7b4   : > { %5065 = vrot.lane.b32.xlu1 %v11460_v28, %s8846_s1 }
 0x7b5   : > { %v4801_v2 = vpop.permute.xlu1 %4800  ;;  %v4825_v40 = vpop.permute.xlu0 %4824 }
 0x7b6   : > { %v11782_v48 = vsel %vm4842_vm4, %v4801_v2, %v4825_v40 }
 0x7b7   : > { %5099 = vrot.lane.b32.xlu0 %v11779_v54, %s8859_s28 }
 0x7b8   : > { %5075 = vrot.lane.b32.xlu1 %v11779_v54, %s8846_s1 }
 0x7b9   : > { %v11800_v34 = vpop.permute.xlu1 %4857  ;;  %v11802_v19 = vpop.permute.xlu0 %4881 }
 0x7bb   : > { %5155 = vrot.lane.b32.xlu0 %v11779_v54, %s8847_s0 }
 0x7bc   : > { %5131 = vrot.lane.b32.xlu1 %v11779_v54, %s8860_s18 }
 0x7bf   : > { %5145 = vrot.lane.b32.xlu0 %v11460_v28, %s8847_s0 }
 0x7c0   : > { %5121 = vrot.lane.b32.xlu1 %v11460_v28, %s8860_s18 }
 0x7c3   : > { %5087 = vrot.lane.b32.xlu0 %v11502_v25, %s8859_s28 }
 0x7c4   : > { %5063 = vrot.lane.b32.xlu1 %v11502_v25, %s8846_s1  ;;  %s7188_s1 = sshll.u32 %s12626_s25, 2 }
 0x7c5   : > { %v11808_v44 = vpop.permute.xlu1 %4798  ;;  %v11810_v53 = vpop.permute.xlu0 %4822  ;;  %s651_s29 = scalar_lea.vmem %s12594_s22, %s7188_s1 }
 0x7c7   : > { %5143 = vrot.lane.b32.xlu0 %v11502_v25, %s8847_s0 }
 0x7c8   : > { %5119 = vrot.lane.b32.xlu1 %v11502_v25, %s8860_s18 }
 0x7c9   : > { %v11816_v10 = vpop.permute.xlu1 %4855  ;;  %v11818_v7 = vpop.permute.xlu0 %4879 }
 0x7cb   : > { %6504 = vperm.xlu0 %8664, %v6490_v1   ;;  %v6495_v1 = vld [vmem:[#allocation7 + $0xb0] sm:$0xff] }
 0x7cc   : > { %6499 = vperm.xlu1 %8665, %v6489_v55  }
 0x7cf   : > { %6514 = vperm.xlu0 %8664, %v6492_v50  }
 0x7d0   : > { %6509 = vperm.xlu1 %8665, %v6491_v31   ;;  %v6926_v31 = vld [vmem:[%s651_s29] sm:$0xf] }
 0x7d3   : > { %6524 = vperm.xlu0 %8664, %v6494_v52  }
 0x7d4   : > { %6519 = vperm.xlu1 %8665, %v6493_v32  }
 0x7d5   : > { %v4805_v2 = vpop.permute.xlu1 %4804  ;;  %v4829_v40 = vpop.permute.xlu0 %4828 }
 0x7d7   : > { %6534 = vperm.xlu0 %8664, %v6496_v41  }
 0x7d8   : > { %6529 = vperm.xlu1 %8665, %v6495_v1  }
 0x7d9   : > { %v4862_v55 = vpop.permute.xlu1 %4861  ;;  %v4886_v50 = vpop.permute.xlu0 %4885 }
 0x7da   : > { %v4904_v57 = vsel %vm774_vm5, %v4862_v55, %v4886_v50 }
 0x7dc   : > { %6938 = vperm.xlu1 %8665, %v6926_v31  }
 0x7dd   : > { %v5074_v25 = vpop.permute.xlu1 %5073  ;;  %v5098_v28 = vpop.permute.xlu0 %5097 }
 0x7de   : > { %v5116_v52 = vsel %vm4842_vm4, %v5074_v25, %v5098_v28 }
 0x7e1   : > { %v5130_v32 = vpop.permute.xlu1 %5129  ;;  %v5154_v42 = vpop.permute.xlu0 %5153 }
 0x7e2   : > { %v5172_v26 = vsel %vm774_vm5, %v5130_v32, %v5154_v42 }
 0x7e3   : > { %v11830_v47 = vsel %vm11628_vm6, %v5116_v52, %v5172_v26  ;;  %v11834_v41 = vsel %vm11632_vm7, %v5172_v26, %v5116_v52 }
 0x7e4   : > { %12595 = vst [vmem:[#allocation33_spill] sm:$0xff] %v11830_v47  ;;  %12596 = vst [vmem:[#allocation30_spill] sm:$0xff] %v11834_v41 }
 0x7e5   : > { %v4803_v1 = vpop.permute.xlu1 %4802  ;;  %v4827_v33 = vpop.permute.xlu0 %4826 }
 0x7e9   : > { %v4860_v54 = vpop.permute.xlu1 %4859  ;;  %v4884_v31 = vpop.permute.xlu0 %4883 }
 0x7f5   : > { %v4809_v3 = vpop.permute.xlu1 %4808  ;;  %v4833_v35 = vpop.permute.xlu0 %4832 }
 0x7f6   : > { %v4850_v25 = vsel %vm4842_vm4, %v4809_v3, %v4833_v35 }
 0x7f9   : > { %v4866_v39 = vpop.permute.xlu1 %4865  ;;  %v4890_v28 = vpop.permute.xlu0 %4889 }
 0x7fa   : > { %v4906_v42 = vsel %vm774_vm5, %v4866_v39, %v4890_v28 }
 0x7fb   : > { %v4916_v32 = vsel %vm11628_vm6, %v4850_v25, %v4906_v42  ;;  %v4926_v47 = vsel %vm11632_vm7, %v4906_v42, %v4850_v25 }
 0x7fc   : > { %8278 = vmatprep.subr.mxu1 %v4916_v32  ;;  %8306 = vmatprep.subr.mxu0 %v4926_v47 }
 0x7fd   : > { %v11842_v26 = vpop.permute.xlu1 %5077  ;;  %8279 = vmatpush3.msra.mxu1 %v4916_v32  ;;  %8307 = vmatpush3.msra.mxu0 %v4926_v47  ;;  %v11844_v52 = vpop.permute.xlu0 %5101 }
 0x7fe   : > { %12597 = vst [vmem:[#allocation28_spill] sm:$0xff] %v11842_v26  ;;  %12598 = vst [vmem:[#allocation18_spill] sm:$0xff] %v11844_v52  ;;  %v4848_v26 = vsel %vm4842_vm4, %v4805_v2, %v4829_v40  ;;  %v4903_v52 = vsel %vm774_vm5, %v4860_v54, %v4884_v31  ;;  %v4902_v2 = vsel %vm774_vm5, %v11800_v34, %v11802_v19 }
 0x7ff   : > { %v4914_v55 = vsel %vm11628_vm6, %v4848_v26, %v4904_v57  ;;  %v4924_v50 = vsel %vm11632_vm7, %v4904_v57, %v4848_v26  ;;  %v4847_v54 = vsel %vm4842_vm4, %v4803_v1, %v4827_v33  ;;  %v4901_v57 = vsel %vm774_vm5, %v11816_v10, %v11818_v7 }
 0x800   : > { %v4913_v40 = vsel %vm11628_vm6, %v4847_v54, %v4903_v52  ;;  %v4923_v31 = vsel %vm11632_vm7, %v4903_v52, %v4847_v54  ;;  %v4912_v33 = vsel %vm11628_vm6, %v11782_v48, %v4902_v2  ;;  %v4922_v19 = vsel %vm11632_vm7, %v4902_v2, %v11782_v48  ;;  %v5192_v48 = vld [vmem:[#allocation2 + $0x8] sm:$0xff] }
 0x801   : > { %v11846_v41 = vpop.permute.xlu1 %5133  ;;  %v11848_v18 = vpop.permute.xlu0 %5157  ;;  %v4845_v10 = vsel %vm4842_vm4, %v11808_v44, %v11810_v53  ;;  %v5468_v53 = vld [vmem:[#allocation2 + $0x88] sm:$0xff] }
 0x802   : > { %12599 = vst [vmem:[#allocation17_spill] sm:$0xff] %v11846_v41  ;;  %12600 = vst [vmem:[#allocation22_spill] sm:$0xff] %v11848_v18  ;;  %v4911_v7 = vsel %vm11628_vm6, %v4845_v10, %v4901_v57  ;;  %v4921_v1 = vsel %vm11632_vm7, %v4901_v57, %v4845_v10 }
 0x805   : > { %v4807_v35 = vpop.permute.xlu1 %4806  ;;  %v4831_v3 = vpop.permute.xlu0 %4830  ;;  %v12605_v57 = vld [vmem:[#allocation28_spill] sm:$0xff] }
 0x806   : > { %v4849_v25 = vsel %vm4842_vm4, %v4807_v35, %v4831_v3 }
 0x809   : > { %v4888_v39 = vpop.permute.xlu0 %4887 }
 0x80a   : > { %v4864_v28 = vpop.permute.xlu1 %4863 }
 0x80b   : > { %v4905_v42 = vsel %vm774_vm5, %v4864_v28, %v4888_v39  ;;  %v5469_v28 = vld [vmem:[#allocation2 + $0x90] sm:$0xff] }
 0x80c   : > { %v4915_v32 = vsel %vm11628_vm6, %v4849_v25, %v4905_v42  ;;  %v4925_v47 = vsel %vm11632_vm7, %v4905_v42, %v4849_v25  ;;  %v11931_v25 = vsel %vm4842_vm4, %v11582_v58, %v11584_v60  ;;  %v5195_v60 = vld [vmem:[#allocation2 + $0x20] sm:$0xff]  ;;  %v11959_v42 = vsel %vm4842_vm4, %v11534_v30, %v11536_v13 }
 0x80d   : > { %8280 = vmatprep.subr.mxu1 %v4915_v32  ;;  %8308 = vmatprep.subr.mxu0 %v4925_v47  ;;  %v11859_v41 = vpop.permute.xlu0 %5095 }
 0x80e   : > { %v11861_v18 = vpop.permute.xlu1 %5071  ;;  %8281 = vmatpush3.msra.mxu1 %v4915_v32  ;;  %8309 = vmatpush3.msra.mxu0 %v4925_v47 }
 0x80f   : > { %8282 = vmatprep.subr.mxu1 %v4914_v55  ;;  %8310 = vmatprep.subr.mxu0 %v4924_v50 }
 0x810   : > { %8283 = vmatpush3.msra.mxu1 %v4914_v55  ;;  %8311 = vmatpush3.msra.mxu0 %v4924_v50  ;;  %v12602_v50 = vld [vmem:[#allocation17_spill] sm:$0xff] }
 0x811   : > { %8284 = vmatprep.subr.mxu1 %v4913_v40  ;;  %8312 = vmatprep.subr.mxu0 %v4923_v31  ;;  %v11878_v26 = vpop.permute.xlu0 %5151 }
 0x812   : > { %v11880_v34 = vpop.permute.xlu1 %5127  ;;  %8285 = vmatpush3.msra.mxu1 %v4913_v40  ;;  %8313 = vmatpush3.msra.mxu0 %v4923_v31  ;;  %v12604_v31 = vld [vmem:[#allocation18_spill] sm:$0xff] }
 0x813   : > { %8286 = vmatprep.subr.mxu1 %v4912_v33  ;;  %8314 = vmatprep.subr.mxu0 %v4922_v19 }
 0x814   : > { %8287 = vmatpush3.msra.mxu1 %v4912_v33  ;;  %8315 = vmatpush3.msra.mxu0 %v4922_v19  ;;  %v12037_v33 = vsel %vm4842_vm4, %v12605_v57, %v12604_v31  ;;  %v12606_v19 = vld [vmem:[#allocation21_spill] sm:$0xff]  ;;  %v12613_v31 = vld [vmem:[#allocation24_spill] sm:$0xff]  ;;  %v5910_v57 = vld [vmem:[#allocation2 + $0x168] sm:$0xff] }
 0x815   : > { %8288 = vmatprep.subr.mxu1 %v4911_v7  ;;  %8316 = vmatprep.subr.mxu0 %v4921_v1  ;;  %v11895_v52 = vpop.permute.xlu0 %5093 }
 0x816   : > { %v11897_v35 = vpop.permute.xlu1 %5069  ;;  %8289 = vmatpush3.msra.mxu1 %v4911_v7  ;;  %8317 = vmatpush3.msra.mxu0 %v4921_v1  ;;  %v5615_v7 = vld [vmem:[#allocation2 + $0xd0] sm:$0xff] }
 0x817   : > { %8290 = vmatprep.subr.mxu1 %v11732_v49  ;;  %8318 = vmatprep.subr.mxu0 %v11736_v6 }
 0x818   : > { %8291 = vmatpush3.msra.mxu1 %v11732_v49  ;;  %8319 = vmatpush3.msra.mxu0 %v11736_v6  ;;  %v5193_v49 = vld [vmem:[#allocation2 + $0x10] sm:$0xff]  ;;  %v11918_v6 = vsel %vm774_vm5, %v11590_v12, %v11592_v14 }
 0x819   : > { %8292 = vmatprep.subr.mxu1 %v11757_v37  ;;  %8320 = vmatprep.subr.mxu0 %v11761_v9  ;;  %v11905_v44 = vpop.permute.xlu0 %5149  ;;  %v5044_v12 = vsel %vm11628_vm6, %v11931_v25, %v11918_v6 }
 0x81a   : > { %v11907_v3 = vpop.permute.xlu1 %5125  ;;  %8293 = vmatpush3.msra.mxu1 %v11757_v37  ;;  %8321 = vmatpush3.msra.mxu0 %v11761_v9  ;;  %v5194_v9 = vld [vmem:[#allocation2 + $0x18] sm:$0xff] }
 0x81b   : > { %8295 = vmatmul.mubr.msk.f32.vlgmr.msra.gmra.mxu1 %vm3137_vm1, %v5192_v48  ;;  %8334 = vmatprep.subr.mxu1 %v11662_v56  ;;  %v5761_v48 = vld [vmem:[#allocation2 + $0x110] sm:$0xff] }
 0x81c   : > { %8362 = vmatprep.subr.mxu0 %v11423_v11  ;;  %8323 = vmatmul.mubr.msk.f32.vlgmr.msra.gmra.mxu0 %vm3137_vm1, %v5468_v53  ;;  %v5616_v53 = vld [vmem:[#allocation2 + $0xd8] sm:$0xff] }
 0x81d   : > { %8335 = vmatpush3.msra.mxu1 %v11662_v56  ;;  %8363 = vmatpush3.msra.mxu0 %v11423_v11  ;;  %v11922_v37 = vpop.permute.xlu0 %5091  ;;  %v5470_v11 = vld [vmem:[#allocation2 + $0x98] sm:$0xff]  ;;  %v5196_v56 = vld [vmem:[#allocation2 + $0x28] sm:$0xff] }
 0x81e   : > { %8336 = vmatprep.subr.mxu1 %v11706_v62  ;;  %8364 = vmatprep.subr.mxu0 %v11441_v24  ;;  %v11926_v39 = vpop.permute.xlu1 %5067 }
 0x81f   : > { %8297 = vmatprep.mubr.msk.f32.mxu1 %vm3137_vm1, %v5193_v49  ;;  %8337 = vmatpush3.msra.mxu1 %v11706_v62  ;;  %v5471_v62 = vld [vmem:[#allocation2 + $0xa0] sm:$0xff] }
 0x820   : > { %8365 = vmatpush3.msra.mxu0 %v11441_v24  ;;  %8298 = vmatmul.mubr.msk.f32.gmra.mxu1 %vm3137_vm1, %v5194_v9  ;;  %v11951_v24 = vsel %vm774_vm5, %v11542_v36, %v11544_v22  ;;  %v5472_v36 = vld [vmem:[#allocation2 + $0xa8] sm:$0xff]  ;;  %v12607_v9 = vld [vmem:[#allocation20_spill] sm:$0xff] }
 0x821   : > { %8325 = vmatprep.mubr.msk.f32.mxu0 %vm3137_vm1, %v5469_v28  ;;  %8338 = vmatprep.subr.mxu1 %v5044_v12  ;;  %v11942_v14 = vpop.permute.xlu0 %5147  ;;  %v5042_v30 = vsel %vm11628_vm6, %v11959_v42, %v11951_v24  ;;  %v5762_v28 = vld [vmem:[#allocation2 + $0x118] sm:$0xff] }
 0x822   : > { %8366 = vmatprep.subr.mxu0 %v11387_v5  ;;  %8326 = vmatmul.mubr.msk.f32.gmra.mxu0 %vm3137_vm1, %v5470_v11  ;;  %v11946_v58 = vpop.permute.xlu1 %5123 }
 0x823   : > { %8339 = vmatpush3.msra.mxu1 %v5044_v12  ;;  %8367 = vmatpush3.msra.mxu0 %v11387_v5  ;;  %v11968_v5 = vsel %vm774_vm5, %v11568_v45, %v11570_v43  ;;  %v11989_v45 = vsel %vm774_vm5, %v11478_v4, %v11480_v63  ;;  %v12000_v4 = vsel %vm4842_vm4, %v11466_v20, %v11468_v46 }
 0x824   : > { %8340 = vmatprep.subr.mxu1 %v11639_v21  ;;  %8368 = vmatprep.subr.mxu0 %v11405_v0  ;;  %v12006_v63 = vsel %vm774_vm5, %v11516_v59, %v11518_v61  ;;  %v5040_v55 = vsel %vm11628_vm6, %v12000_v4, %v11989_v45  ;;  %v12018_v20 = vsel %vm4842_vm4, %v11508_v38, %v11510_v8  ;;  %v5614_v59 = vld [vmem:[#allocation2 + $0xc8] sm:$0xff]  ;;  %v12601_v61 = vld [vmem:[#allocation22_spill] sm:$0xff] }
 0x825   : > { %8300 = vmatprep.mubr.msk.f32.mxu1 %vm3137_vm1, %v5195_v60  ;;  %8341 = vmatpush3.msra.mxu1 %v11639_v21  ;;  %v11963_v22 = vpop.permute.xlu0 %5089  ;;  %v11982_v21 = vsel %vm4842_vm4, %v11560_v15, %v11562_v27  ;;  %v5198_v15 = vld [vmem:[#allocation2 + $0x38] sm:$0xff]  ;;  %v5473_v27 = vld [vmem:[#allocation2 + $0xb0] sm:$0xff]  ;;  %v5039_v46 = vsel %vm11628_vm6, %v12018_v20, %v12006_v63  ;;  %v12030_v2 = vsel %vm774_vm5, %v12602_v50, %v12601_v61  ;;  %v12603_v38 = vld [vmem:[#allocation38_spill] sm:$0xff] }
 0x826   : > { %8369 = vmatpush3.msra.mxu0 %v11405_v0  ;;  %8301 = vmatmul.mubr.msk.f32.gmra.mxu1 %vm3137_vm1, %v5196_v56  ;;  %v11976_v13 = vpop.permute.xlu1 %5065  ;;  %v5197_v0 = vld [vmem:[#allocation2 + $0x30] sm:$0xff]  ;;  %v5041_v43 = vsel %vm11628_vm6, %v11982_v21, %v11968_v5  ;;  %v5759_v8 = vld [vmem:[#allocation2 + $0x100] sm:$0xff]  ;;  %v5182_v10 = vsel %vm11628_vm6, %v12037_v33, %v12030_v2  ;;  %v5052_v60 = vsel %vm11632_vm7, %v11918_v6, %v11931_v25  ;;  %v12611_v61 = vld [vmem:[#allocation37_spill] sm:$0xff] }
 0x827   : > { %8328 = vmatprep.mubr.msk.f32.mxu0 %vm3137_vm1, %v5471_v62  ;;  %8342 = vmatprep.subr.mxu1 %v5042_v30  ;;  %v5617_v62 = vld [vmem:[#allocation2 + $0xe0] sm:$0xff]  ;;  %v12075_v25 = vsel %vm774_vm5, %v11880_v34, %v11878_v26  ;;  %v5049_v26 = vsel %vm11632_vm7, %v11968_v5, %v11982_v21  ;;  %v5619_v34 = vld [vmem:[#allocation2 + $0xf0] sm:$0xff]  ;;  %v5048_v5 = vsel %vm11632_vm7, %v11989_v45, %v12000_v4  ;;  %v5908_v50 = vld [vmem:[#allocation2 + $0x158] sm:$0xff] }
 0x828   : > { %8370 = vmatprep.subr.mxu0 %v11351_v17  ;;  %8329 = vmatmul.mubr.msk.f32.gmra.mxu0 %vm3137_vm1, %v5472_v36  ;;  %v5618_v36 = vld [vmem:[#allocation2 + $0xe8] sm:$0xff]  ;;  %v5763_v6 = vld [vmem:[#allocation2 + $0x120] sm:$0xff]  ;;  %v5190_v23 = vsel %vm11632_vm7, %v12030_v2, %v12037_v33  ;;  %v12614_v2 = vld [vmem:[#allocation29_spill] sm:$0xff] }
 0x829   : > { %8343 = vmatpush3.msra.mxu1 %v5042_v30  ;;  %8371 = vmatpush3.msra.mxu0 %v11351_v17  ;;  %v5100_v47 = vpop.permute.xlu0 %5099  ;;  %v5474_v17 = vld [vmem:[#allocation2 + $0xb8] sm:$0xff]  ;;  %v12608_v30 = vld [vmem:[#allocation19_spill] sm:$0xff]  ;;  %v5905_v45 = vld [vmem:[#allocation2 + $0x140] sm:$0xff] }
 0x82a   : > { %8344 = vmatprep.subr.mxu1 %v5041_v43  ;;  %8372 = vmatprep.subr.mxu0 %v11369_v29  ;;  %v5076_v32 = vpop.permute.xlu1 %5075  ;;  %v12615_v33 = vld [vmem:[#allocation30_spill] sm:$0xff] }
 0x82b   : > { %8303 = vmatprep.mubr.msk.f32.mxu1 %vm3137_vm1, %v5197_v0  ;;  %8345 = vmatpush3.msra.mxu1 %v5041_v43  ;;  %v12053_v49 = vsel %vm4842_vm4, %v5076_v32, %v5100_v47  ;;  %v5050_v0 = vsel %vm11632_vm7, %v11951_v24, %v11959_v42  ;;  %v5764_v32 = vld [vmem:[#allocation2 + $0x128] sm:$0xff]  ;;  %v12086_v47 = vsel %vm4842_vm4, %v11861_v18, %v11859_v41  ;;  %v5620_v41 = vld [vmem:[#allocation2 + $0xf8] sm:$0xff] }
 0x82c   : > { %8373 = vmatpush3.msra.mxu0 %v11369_v29  ;;  %8304 = vmatmul.mubr.msk.f32.gmra.mxu1 %vm3137_vm1, %v5198_v15  ;;  %v5613_v29 = vld [vmem:[#allocation2 + $0xc0] sm:$0xff]  ;;  %v12096_v24 = vsel %vm774_vm5, %v11907_v3, %v11905_v44  ;;  %v5179_v18 = vsel %vm11628_vm6, %v12086_v47, %v12075_v25  ;;  %v12107_v42 = vsel %vm4842_vm4, %v11897_v35, %v11895_v52  ;;  %v5765_v44 = vld [vmem:[#allocation2 + $0x130] sm:$0xff] }
 0x82d   : > { %8331 = vmatprep.mubr.msk.f32.mxu0 %vm3137_vm1, %v5473_v27  ;;  %8346 = vmatprep.subr.mxu1 %v5040_v55  ;;  %v5156_v40 = vpop.permute.xlu0 %5155  ;;  %v12609_v27 = vld [vmem:[#allocation33_spill] sm:$0xff]  ;;  %v12113_v3 = vsel %vm774_vm5, %v11946_v58, %v11942_v14  ;;  %v5178_v52 = vsel %vm11628_vm6, %v12107_v42, %v12096_v24  ;;  %v12127_v14 = vsel %vm4842_vm4, %v11926_v39, %v11922_v37 }
 0x82e   : > { %8374 = vmatprep.subr.mxu0 %v11315_v16  ;;  %8332 = vmatmul.mubr.msk.f32.gmra.mxu0 %vm3137_vm1, %v5474_v17  ;;  %v5132_v54 = vpop.permute.xlu1 %5131  ;;  %v5766_v17 = vld [vmem:[#allocation2 + $0x138] sm:$0xff]  ;;  %v5047_v58 = vsel %vm11632_vm7, %v12006_v63, %v12018_v20  ;;  %v5177_v37 = vsel %vm11628_vm6, %v12127_v14, %v12113_v3  ;;  %v12148_v63 = vsel %vm4842_vm4, %v11976_v13, %v11963_v22  ;;  %v12610_v13 = vld [vmem:[#allocation23_spill] sm:$0xff] }
 0x82f   : > { %8347 = vmatpush3.msra.mxu1 %v5040_v55  ;;  %8375 = vmatpush3.msra.mxu0 %v11315_v16  ;;  %v5760_v16 = vld [vmem:[#allocation2 + $0x108] sm:$0xff]  ;;  %v12049_v1 = vsel %vm774_vm5, %v5132_v54, %v5156_v40  ;;  %v5909_v54 = vld [vmem:[#allocation2 + $0x160] sm:$0xff]  ;;  %v6053_v40 = vld [vmem:[#allocation2 + $0x190] sm:$0xff] }
 0x830   : > { %8348 = vmatprep.subr.mxu1 %v5039_v46  ;;  %8376 = vmatprep.subr.mxu0 %v12603_v38  ;;  %v5181_v56 = vsel %vm11628_vm6, %v12053_v49, %v12049_v1  ;;  %v5906_v55 = vld [vmem:[#allocation2 + $0x148] sm:$0xff] }
 0x831   : > { %8349 = vmatpush3.msra.mxu1 %v5039_v46  ;;  %8350 = vmatprep.mubr.msk.f32.mxu1 %vm3137_vm1, %v5613_v29  ;;  %v5146_v12 = vpop.permute.xlu0 %5145  ;;  %v5907_v46 = vld [vmem:[#allocation2 + $0x150] sm:$0xff] }
 0x832   : > { %8377 = vmatpush3.msra.mxu0 %v12603_v38  ;;  %8351 = vmatmul.mubr.msk.f32.vlgmr.msra.gmra.mxu1 %vm3137_vm1, %v5614_v59  ;;  %v5122_v11 = vpop.permute.xlu1 %5121  ;;  %v6051_v59 = vld [vmem:[#allocation2 + $0x180] sm:$0xff]  ;;  %v6052_v38 = vld [vmem:[#allocation2 + $0x188] sm:$0xff] }
 0x833   : > { %8378 = vmatprep.mubr.msk.f32.mxu0 %vm3137_vm1, %v5759_v8  ;;  %8390 = vmatprep.subr.mxu1 %v12606_v19  ;;  %v12135_v4 = vsel %vm774_vm5, %v5122_v11, %v5146_v12  ;;  %v12612_v8 = vld [vmem:[#allocation34_spill] sm:$0xff]  ;;  %v6057_v11 = vld [vmem:[#allocation2 + $0x1b0] sm:$0xff]  ;;  %v5185_v12 = vsel %vm11632_vm7, %v12113_v3, %v12127_v14 }
 0x834   : > { %8418 = vmatprep.subr.mxu0 %v5182_v10  ;;  %8379 = vmatmul.mubr.msk.f32.vlgmr.msra.gmra.mxu0 %vm3137_vm1, %v5760_v16  ;;  %v5176_v29 = vsel %vm11628_vm6, %v12148_v63, %v12135_v4  ;;  %v5189_v16 = vsel %vm11632_vm7, %v12049_v1, %v12053_v49  ;;  %v5187_v1 = vsel %vm11632_vm7, %v12075_v25, %v12086_v47  ;;  %v6056_v49 = vld [vmem:[#allocation2 + $0x1a8] sm:$0xff]  ;;  %v6571_v3 = vld [vmem:[#allocation5] sm:$0xff] }
 0x835   : > { %8391 = vmatpush3.msra.mxu1 %v12606_v19  ;;  %8419 = vmatpush3.msra.mxu0 %v5182_v10  ;;  %v5088_v15 = vpop.permute.xlu0 %5087  ;;  %v6054_v19 = vld [vmem:[#allocation2 + $0x198] sm:$0xff]  ;;  %v5911_v10 = vld [vmem:[#allocation2 + $0x170] sm:$0xff]  ;;  %v5184_v25 = vsel %vm11632_vm7, %v12135_v4, %v12148_v63  ;;  %v6202_v47 = vld [vmem:[#allocation2 + $0x1e8] sm:$0xff] }
 0x836   : > { %8392 = vmatprep.subr.mxu1 %v12607_v9  ;;  %8353 = vmatprep.mubr.msk.f32.mxu1 %vm3137_vm1, %v5615_v7  ;;  %v5064_v43 = vpop.permute.xlu1 %5063  ;;  %v6055_v7 = vld [vmem:[#allocation2 + $0x1a0] sm:$0xff] }
 0x837   : > { %8393 = vmatpush3.msra.mxu1 %v12607_v9  ;;  %8381 = vmatprep.mubr.msk.f32.mxu0 %vm3137_vm1, %v5761_v48  ;;  %v12151_v20 = vsel %vm4842_vm4, %v5064_v43, %v5088_v15  ;;  %v12616_v48 = vld [vmem:[#allocation27_spill] sm:$0xff]  ;;  %v5186_v9 = vsel %vm11632_vm7, %v12096_v24, %v12107_v42  ;;  %v6204_v24 = vld [vmem:[#allocation2 + $0x1f8] sm:$0xff] }
 0x838   : > { %8354 = vmatmul.mubr.msk.f32.gmra.mxu1 %vm3137_vm1, %v5616_v53  ;;  %8394 = vmatprep.subr.mxu1 %v5052_v60  ;;  %v5912_v53 = vld [vmem:[#allocation2 + $0x178] sm:$0xff]  ;;  %v6344_v15 = vld [vmem:[#allocation2 + $0x208] sm:$0xff] }
 0x839   : > { %8395 = vmatpush3.msra.mxu1 %v5052_v60  ;;  %8382 = vmatmul.mubr.msk.f32.gmra.mxu0 %vm3137_vm1, %v5762_v28  ;;  %v5144_v21 = vpop.permute.xlu0 %5143  ;;  %v12617_v28 = vld [vmem:[#allocation36_spill] sm:$0xff]  ;;  %v6197_v60 = vld [vmem:[#allocation2 + $0x1c0] sm:$0xff]  ;;  %v6350_v42 = vld [vmem:[#allocation2 + $0x238] sm:$0xff] }
 0x83a   : > { %8396 = vmatprep.subr.mxu1 %v12608_v30  ;;  %8420 = vmatprep.subr.mxu0 %v5181_v56  ;;  %v5120_v35 = vpop.permute.xlu1 %5119 }
 0x83b   : > { %8356 = vmatprep.mubr.msk.f32.mxu1 %vm3137_vm1, %v5617_v62  ;;  %8397 = vmatpush3.msra.mxu1 %v12608_v30  ;;  %v12142_v39 = vsel %vm774_vm5, %v5120_v35, %v5144_v21  ;;  %v6058_v62 = vld [vmem:[#allocation2 + $0x1b8] sm:$0xff]  ;;  %v6199_v30 = vld [vmem:[#allocation2 + $0x1d0] sm:$0xff] }
 0x83c   : > { %8421 = vmatpush3.msra.mxu0 %v5181_v56  ;;  %8357 = vmatmul.mubr.msk.f32.gmra.mxu1 %vm3137_vm1, %v5618_v36  ;;  %v5175_v22 = vsel %vm11628_vm6, %v12151_v20, %v12142_v39  ;;  %v12618_v56 = vld [vmem:[#allocation31_spill] sm:$0xff]  ;;  %v5183_v43 = vsel %vm11632_vm7, %v12142_v39, %v12151_v20 }
 0x83d   : > { %8398 = vmatprep.subr.mxu1 %v5050_v0  ;;  %8422 = vmatprep.subr.mxu0 %v12609_v27  ;;  %v6198_v36 = vld [vmem:[#allocation2 + $0x1c8] sm:$0xff] }
 0x83e   : > { %8384 = vmatprep.mubr.msk.f32.mxu0 %vm3137_vm1, %v5763_v6  ;;  %8399 = vmatpush3.msra.mxu1 %v5050_v0  ;;  %v6343_v6 = vld [vmem:[#allocation2 + $0x200] sm:$0xff]  ;;  %v6200_v0 = vld [vmem:[#allocation2 + $0x1d8] sm:$0xff] }
 0x83f   : > { %8423 = vmatpush3.msra.mxu0 %v12609_v27  ;;  %8400 = vmatprep.subr.mxu1 %v5049_v26  ;;  %v6201_v27 = vld [vmem:[#allocation2 + $0x1e0] sm:$0xff] }
 0x840   : > { %8385 = vmatmul.mubr.msk.f32.gmra.mxu0 %vm3137_vm1, %v5764_v32  ;;  %8424 = vmatprep.subr.mxu0 %v5179_v18  ;;  %v6345_v32 = vld [vmem:[#allocation2 + $0x210] sm:$0xff] }
 0x841   : > { %8359 = vmatprep.mubr.msk.f32.mxu1 %vm3137_vm1, %v5619_v34  ;;  %8401 = vmatpush3.msra.mxu1 %v5049_v26  ;;  %v6346_v26 = vld [vmem:[#allocation2 + $0x218] sm:$0xff]  ;;  %v6203_v34 = vld [vmem:[#allocation2 + $0x1f0] sm:$0xff] }
 0x842   : > { %8425 = vmatpush3.msra.mxu0 %v5179_v18  ;;  %8360 = vmatmul.mubr.msk.f32.gmra.mxu1 %vm3137_vm1, %v5620_v41  ;;  %v6348_v18 = vld [vmem:[#allocation2 + $0x228] sm:$0xff]  ;;  %v6349_v41 = vld [vmem:[#allocation2 + $0x230] sm:$0xff] }
 0x843   : > { %8402 = vmatprep.subr.mxu1 %v5048_v5  ;;  %8426 = vmatprep.subr.mxu0 %v5178_v52 }
 0x844   : > { %8387 = vmatprep.mubr.msk.f32.mxu0 %vm3137_vm1, %v5765_v44  ;;  %8403 = vmatpush3.msra.mxu1 %v5048_v5  ;;  %v6572_v44 = vld [vmem:[#allocation5 + $0x8] sm:$0xff]  ;;  %v12619_v5 = vmov 0.0  }
 0x845   : > { %8427 = vmatpush3.msra.mxu0 %v5178_v52  ;;  %8404 = vmatprep.subr.mxu1 %v5047_v58 }
 0x846   : > { %8388 = vmatmul.mubr.msk.f32.gmra.mxu0 %vm3137_vm1, %v5766_v17  ;;  %8428 = vmatprep.subr.mxu0 %v5177_v37 }
 0x847   : > { %8405 = vmatpush3.msra.mxu1 %v5047_v58  ;;  %8406 = vmatprep.mubr.msk.f32.mxu1 %vm3137_vm1, %v5905_v45 }
 0x848   : > { %8429 = vmatpush3.msra.mxu0 %v5177_v37  ;;  %8407 = vmatmul.mubr.msk.f32.vlgmr.msra.gmra.mxu1 %vm3137_vm1, %v5906_v55 }
 0x849   : > { %8430 = vmatprep.subr.mxu0 %v5176_v29  ;;  %8446 = vmatprep.subr.mxu1 %v12610_v13 }
 0x84a   : > { %8431 = vmatpush3.msra.mxu0 %v5176_v29  ;;  %8447 = vmatpush3.msra.mxu1 %v12610_v13 }
 0x84b   : > { %8432 = vmatprep.subr.mxu0 %v5175_v22  ;;  %8448 = vmatprep.subr.mxu1 %v12611_v61 }
 0x84c   : > { %8409 = vmatprep.mubr.msk.f32.mxu1 %vm3137_vm1, %v5907_v46  ;;  %8433 = vmatpush3.msra.mxu0 %v5175_v22 }
 0x84d   : > { %8434 = vmatprep.mubr.msk.f32.mxu0 %vm3137_vm1, %v6051_v59  ;;  %8449 = vmatpush3.msra.mxu1 %v12611_v61 }
 0x84e   : > { %8410 = vmatmul.mubr.msk.f32.gmra.mxu1 %vm3137_vm1, %v5908_v50  ;;  %8435 = vmatmul.mubr.msk.f32.vlgmr.msra.gmra.mxu0 %vm3137_vm1, %v6052_v38 }
 0x84f   : > { %8450 = vmatprep.subr.mxu1 %v12612_v8  ;;  %8474 = vmatprep.subr.mxu0 %v5190_v23 }
 0x850   : > { %8451 = vmatpush3.msra.mxu1 %v12612_v8  ;;  %8475 = vmatpush3.msra.mxu0 %v5190_v23 }
 0x851   : > { %8452 = vmatprep.subr.mxu1 %v12613_v31  ;;  %8476 = vmatprep.subr.mxu0 %v5189_v16 }
 0x852   : > { %8412 = vmatprep.mubr.msk.f32.mxu1 %vm3137_vm1, %v5909_v54  ;;  %8437 = vmatprep.mubr.msk.f32.mxu0 %vm3137_vm1, %v6053_v40 }
 0x853   : > { %8453 = vmatpush3.msra.mxu1 %v12613_v31  ;;  %8477 = vmatpush3.msra.mxu0 %v5189_v16 }
 0x854   : > { %8413 = vmatmul.mubr.msk.f32.gmra.mxu1 %vm3137_vm1, %v5910_v57  ;;  %8438 = vmatmul.mubr.msk.f32.gmra.mxu0 %vm3137_vm1, %v6054_v19 }
 0x855   : > { %8454 = vmatprep.subr.mxu1 %v12614_v2  ;;  %8478 = vmatprep.subr.mxu0 %v12615_v33 }
 0x856   : > { %8455 = vmatpush3.msra.mxu1 %v12614_v2  ;;  %8479 = vmatpush3.msra.mxu0 %v12615_v33 }
 0x857   : > { %8456 = vmatprep.subr.mxu1 %v12616_v48  ;;  %8480 = vmatprep.subr.mxu0 %v5187_v1 }
 0x858   : > { %8415 = vmatprep.mubr.msk.f32.mxu1 %vm3137_vm1, %v5911_v10  ;;  %8440 = vmatprep.mubr.msk.f32.mxu0 %vm3137_vm1, %v6055_v7 }
 0x859   : > { %8457 = vmatpush3.msra.mxu1 %v12616_v48  ;;  %8481 = vmatpush3.msra.mxu0 %v5187_v1 }
 0x85a   : > { %8416 = vmatmul.mubr.msk.f32.gmra.mxu1 %vm3137_vm1, %v5912_v53  ;;  %8441 = vmatmul.mubr.msk.f32.gmra.mxu0 %vm3137_vm1, %v6056_v49 }
 0x85b   : > { %8458 = vmatprep.subr.mxu1 %v12617_v28  ;;  %8482 = vmatprep.subr.mxu0 %v5186_v9 }
 0x85c   : > { %8459 = vmatpush3.msra.mxu1 %v12617_v28  ;;  %8483 = vmatpush3.msra.mxu0 %v5186_v9 }
 0x85d   : > { %8460 = vmatprep.subr.mxu1 %v12618_v56  ;;  %8484 = vmatprep.subr.mxu0 %v5185_v12 }
 0x85e   : > { %8443 = vmatprep.mubr.msk.f32.mxu0 %vm3137_vm1, %v6057_v11  ;;  %8461 = vmatpush3.msra.mxu1 %v12618_v56 }
 0x85f   : > { %8462 = vmatprep.mubr.msk.f32.mxu1 %vm3137_vm1, %v6197_v60  ;;  %8485 = vmatpush3.msra.mxu0 %v5185_v12 }
 0x860   : > { %8444 = vmatmul.mubr.msk.f32.gmra.mxu0 %vm3137_vm1, %v6058_v62  ;;  %8463 = vmatmul.mubr.msk.f32.vlgmr.msra.gmra.mxu1 %vm3137_vm1, %v6198_v36 }
 0x861   : > { %8486 = vmatprep.subr.mxu0 %v5184_v25  ;;  %8465 = vmatprep.mubr.msk.f32.mxu1 %vm3137_vm1, %v6199_v30 }
 0x862   : > { %8487 = vmatpush3.msra.mxu0 %v5184_v25  ;;  %8490 = vmatprep.mubr.msk.f32.mxu0 %vm3137_vm1, %v6343_v6  ;;  %v8268_v52 = vpop.f32.mrf.mxu0 }
 0x863   : > { %8488 = vmatprep.subr.mxu0 %v5183_v43  ;;  %8502 = vmatprep.subr.mxu1 %v6572_v44 }
 0x864   : > { %8489 = vmatpush3.msra.mxu0 %v5183_v43  ;;  %8466 = vmatmul.mubr.msk.f32.gmra.mxu1 %vm3137_vm1, %v6200_v0  ;;  %v5298_v35 = vpop.f32.mrf.mxu0 }
 0x865   : > { %8491 = vmatmul.mubr.msk.f32.vlgmr.msra.gmra.mxu0 %vm3137_vm1, %v6344_v15  ;;  %8468 = vmatprep.mubr.msk.f32.mxu1 %vm3137_vm1, %v6201_v27 }
 0x866   : > { %8493 = vmatprep.mubr.msk.f32.mxu0 %vm3137_vm1, %v6345_v32  ;;  %8503 = vmatpush3.msra.mxu1 %v6572_v44  ;;  %v8271_v21 = vpop.f32.mrf.mxu0 }
 0x867   : > { %8504 = vmatprep.subr.mxu1 %v6571_v3 }
 0x868   : > { %8469 = vmatmul.mubr.msk.f32.gmra.mxu1 %vm3137_vm1, %v6202_v47  ;;  %v5308_v17 = vpop.f32.mrf.mxu0 }
 0x869   : > { %8494 = vmatmul.mubr.msk.f32.gmra.mxu0 %vm3137_vm1, %v6346_v26  ;;  %8471 = vmatprep.mubr.msk.f32.mxu1 %vm3137_vm1, %v6203_v34 }
 0x86a   : > { %8496 = vmatprep.mubr.msk.f32.mxu0 %vm3137_vm1, %v6347_v51  ;;  %8505 = vmatpush3.msra.mxu1 %v6571_v3  ;;  %v8274_v14 = vpop.f32.mrf.mxu0 }
 0x86b   : > { %8532 = vmatprep.subr.mxu1 %v12619_v5 }
 0x86c   : > { %8472 = vmatmul.mubr.msk.f32.gmra.mxu1 %vm3137_vm1, %v6204_v24  ;;  %v5318_v58 = vpop.f32.mrf.mxu0 }
 0x86d   : > { %8497 = vmatmul.mubr.msk.f32.gmra.mxu0 %vm3137_vm1, %v6348_v18 }
 0x86e   : > { %8499 = vmatprep.mubr.msk.f32.mxu0 %vm3137_vm1, %v6349_v41  ;;  %v12240_v45 = vpop.f32.mrf.mxu0 }
 0x870   : > { %v12242_v4 = vpop.f32.mrf.mxu0 }
 0x871   : > { %8500 = vmatmul.mubr.msk.f32.gmra.mxu0 %vm3137_vm1, %v6350_v42 }
 0x8db   : > { %v8296_v37 = vpop.f32.mrf.mxu1 }
 0x8dc   : > { %v8324_v39 = vpop.f32.mrf.mxu0  ;;  %v5433_v6 = vadd.f32 %v8296_v37, %v8268_v52 }
 0x8dd   : > { %v5427_v55 = vpop.f32.mrf.mxu1 }
 0x8de   : > { %v5565_v63 = vpop.f32.mrf.mxu0  ;;  %v5428_v43 = vadd.f32 %v5427_v55, %v5298_v35  ;;  %v5605_v32 = vadd.f32 %v8324_v39, %v5433_v6 }
 0x8e0   : > { %v8299_v20 = vpop.f32.mrf.mxu1  ;;  %v5604_v26 = vadd.f32 %v5565_v63, %v5428_v43 }
 0x8e1   : > { %v5443_v47 = vadd.f32 %v8299_v20, %v8271_v21 }
 0x8e2   : > { %v5437_v29 = vpop.f32.mrf.mxu1  ;;  %v8327_v22 = vpop.f32.mrf.mxu0 }
 0x8e3   : > { %v5438_v34 = vadd.f32 %v5437_v29, %v5308_v17  ;;  %v5607_v42 = vadd.f32 %v8327_v22, %v5443_v47  ;;  %v6500_v22 = vpop.permute.xlu1 %6499 }
 0x8e4   : > { %v5575_v13 = vpop.f32.mrf.mxu0 }
 0x8e5   : > { %v5606_v35 = vadd.f32 %v5575_v13, %v5438_v34 }
 0x8e6   : > { %v8302_v46 = vpop.f32.mrf.mxu1 }
 0x8e7   : > { %v5453_v41 = vadd.f32 %v8302_v46, %v8274_v14  ;;  %v6505_v46 = vpop.permute.xlu0 %6504 }
 0x8e8   : > { %v5447_v59 = vpop.f32.mrf.mxu1  ;;  %v8330_v61 = vpop.f32.mrf.mxu0 }
 0x8e9   : > { %v5448_v37 = vadd.f32 %v5447_v59, %v5318_v58 }
 0x8ea   : > { %v5585_v50 = vpop.f32.mrf.mxu0 }
 0x8ec   : > { %v8305_v38 = vpop.f32.mrf.mxu1 }
 0x8ed   : > { %v5463_v21 = vadd.f32 %v8305_v38, %v12240_v45 }
 0x8ee   : > { %v5457_v23 = vpop.f32.mrf.mxu1  ;;  %v12244_v8 = vpop.f32.mrf.mxu0 }
 0x8ef   : > { %v5458_v17 = vadd.f32 %v5457_v23, %v12242_v4  ;;  %v5611_v45 = vadd.f32 %v12244_v8, %v5463_v21 }
 0x8f0   : > { %v12246_v54 = vpop.f32.mrf.mxu0 }
 0x8f1   : > { %v5610_v4 = vadd.f32 %v12246_v54, %v5458_v17 }
 0x8f2   : > { %v8352_v40 = vpop.f32.mrf.mxu1 }
 0x8f3   : > { %v5751_v51 = vadd.f32 %v8352_v40, %v5605_v32  ;;  %v5608_v40 = vadd.f32 %v5585_v50, %v5448_v37  ;;  %v6515_v32 = vpop.permute.xlu0 %6514 }
 0x8f4   : > { %v5711_v16 = vpop.f32.mrf.mxu1  ;;  %v8380_v31 = vpop.f32.mrf.mxu0 }
 0x8f5   : > { %v5750_v44 = vadd.f32 %v5711_v16, %v5604_v26  ;;  %v5897_v55 = vadd.f32 %v8380_v31, %v5751_v51 }
 0x8f6   : > { %v5857_v57 = vpop.f32.mrf.mxu0 }
 0x8f7   : > { %v5896_v39 = vadd.f32 %v5857_v57, %v5750_v44 }
 0x8f8   : > { %v8355_v19 = vpop.f32.mrf.mxu1 }
 0x8f9   : > { %v8383_v2 = vpop.f32.mrf.mxu0  ;;  %v5753_v5 = vadd.f32 %v8355_v19, %v5607_v42 }
 0x8fa   : > { %v5721_v33 = vpop.f32.mrf.mxu1 }
 0x8fb   : > { %v5867_v7 = vpop.f32.mrf.mxu0  ;;  %v5752_v63 = vadd.f32 %v5721_v33, %v5606_v35  ;;  %v5899_v58 = vadd.f32 %v8383_v2, %v5753_v5 }
 0x8fc   : > { %v8358_v10 = vpop.f32.mrf.mxu1 }
 0x8fd   : > { %v5898_v23 = vadd.f32 %v5867_v7, %v5752_v63  ;;  %v6525_v63 = vpop.permute.xlu0 %6524 }
 0x8fe   : > { %v5731_v1 = vpop.f32.mrf.mxu1 }
 0x8ff   : > { %v5754_v38 = vadd.f32 %v5731_v1, %v5608_v40  ;;  %v12270_v1 = vstv %s12264_s19  ;;  %s655_s19 = scalar_lea.vmem %s12362_s17, %s7188_s1 }
 0x900   : > { %v8386_v48 = vpop.f32.mrf.mxu0 }
 0x902   : > { %v8361_v53 = vpop.f32.mrf.mxu1  ;;  %v12248_v49 = vpop.f32.mrf.mxu0 }
 0x903   : > { %v5757_v43 = vadd.f32 %v8361_v53, %v5611_v45  ;;  %v5900_v8 = vadd.f32 %v12248_v49, %v5754_v38 }
 0x904   : > { %v5741_v9 = vpop.f32.mrf.mxu1 }
 0x905   : > { %v5756_v50 = vadd.f32 %v5741_v9, %v5610_v4 }
 0x906   : > { %v12250_v28 = vpop.f32.mrf.mxu0 }
 0x907   : > { %v5903_v9 = vadd.f32 %v12250_v28, %v5757_v43 }
 0x908   : > { %v8408_v11 = vpop.f32.mrf.mxu1  ;;  %v12252_v60 = vpop.f32.mrf.mxu0 }
 0x909   : > { %v6043_v14 = vadd.f32 %v8408_v11, %v5897_v55 }
 0x90a   : > { %v6003_v12 = vpop.f32.mrf.mxu1 }
 0x90b   : > { %v6042_v13 = vadd.f32 %v6003_v12, %v5896_v39 }
 0x90e   : > { %v8411_v56 = vpop.f32.mrf.mxu1  ;;  %v8436_v62 = vpop.f32.mrf.mxu0 }
 0x90f   : > { %v6189_v59 = vadd.f32 %v8436_v62, %v6043_v14  ;;  %v6045_v57 = vadd.f32 %v8411_v56, %v5899_v58  ;;  %v6510_v56 = vpop.permute.xlu1 %6509 }
 0x910   : > { %v6013_v36 = vpop.f32.mrf.mxu1  ;;  %v6149_v30 = vpop.f32.mrf.mxu0 }
 0x911   : > { %v6188_v19 = vadd.f32 %v6149_v30, %v6042_v13  ;;  %v6044_v5 = vadd.f32 %v6013_v36, %v5898_v23  ;;  %v5902_v36 = vadd.f32 %v12252_v60, %v5756_v50 }
 0x914   : > { %v8414_v25 = vpop.f32.mrf.mxu1  ;;  %v8439_v0 = vpop.f32.mrf.mxu0 }
 0x915   : > { %v6191_v2 = vadd.f32 %v8439_v0, %v6045_v57 }
 0x916   : > { %v12254_v15 = vpop.f32.mrf.mxu1  ;;  %v6159_v27 = vpop.f32.mrf.mxu0 }
 0x917   : > { %12620 = vst [vmem:[#allocation51_spill] sm:$0xff] %v12254_v15  ;;  %v5609_v15 = vadd.f32 %v8330_v61, %v5453_v41  ;;  %v6190_v30 = vadd.f32 %v6159_v27, %v6044_v5 }
 0x919   : > { %v5755_v16 = vadd.f32 %v8358_v10, %v5609_v15 }
 0x91a   : > { %v12256_v24 = vpop.f32.mrf.mxu1  ;;  %v8442_v18 = vpop.f32.mrf.mxu0 }
 0x91b   : > { %v5901_v6 = vadd.f32 %v8386_v48, %v5755_v16  ;;  %v6049_v27 = vadd.f32 %v12256_v24, %v5903_v9 }
 0x91c   : > { %v12258_v3 = vpop.f32.mrf.mxu1  ;;  %v12260_v52 = vpop.f32.mrf.mxu0 }
 0x91d   : > { %v6047_v54 = vadd.f32 %v8414_v25, %v5901_v6  ;;  %v6048_v35 = vadd.f32 %v12258_v3, %v5902_v36 }
 0x91e   : > { %v12621_v0 = vld [vmem:[#allocation51_spill] sm:$0xff] }
 0x91f   : > { %v6046_v34 = vadd.f32 %v12621_v0, %v5900_v8  ;;  %v6193_v51 = vadd.f32 %v8442_v18, %v6047_v54 }
 0x920   : > { %v8445_v20 = vpop.f32.mrf.mxu0  ;;  %v8464_v29 = vpop.f32.mrf.mxu1 }
 0x921   : > { %v6335_v33 = vadd.f32 %v8464_v29, %v6189_v59  ;;  %v6192_v55 = vadd.f32 %v12260_v52, %v6046_v34  ;;  %v6195_v14 = vadd.f32 %v8445_v20, %v6049_v27  ;;  %v6934_v34 = vld [vmem:[#allocation10 + $0x38] sm:$0xff] }
 0x922   : > { %v6179_v31 = vpop.f32.mrf.mxu0  ;;  %v6295_v61 = vpop.f32.mrf.mxu1 }
 0x923   : > { %v6334_v12 = vadd.f32 %v6295_v61, %v6188_v19  ;;  %v6194_v29 = vadd.f32 %v6179_v31, %v6048_v35  ;;  %v6535_v19 = vpop.permute.xlu0 %6534 }
 0x924   : > { %v8467_v11 = vpop.f32.mrf.mxu1 }
 0x925   : > { %v8492_v10 = vpop.f32.mrf.mxu0  ;;  %v6337_v47 = vadd.f32 %v8467_v11, %v6191_v2 }
 0x926   : > { %v6481_v62 = vadd.f32 %v8492_v10, %v6335_v33  ;;  %v6305_v15 = vpop.f32.mrf.mxu1 }
 0x927   : > { %v6441_v7 = vpop.f32.mrf.mxu0  ;;  %v6336_v25 = vadd.f32 %v6305_v15, %v6190_v30  ;;  %v12622_v30 = vmov 0.0  }
 0x928   : > { %v6538_v26 = vadd.f32 %v6505_v46, %v6481_v62  ;;  %v6480_v48 = vadd.f32 %v6441_v7, %v6334_v12  ;;  %v8470_v53 = vpop.f32.mrf.mxu1  ;;  %v6520_v46 = vpop.permute.xlu1 %6519 }
 0x929   : > { %v8495_v41 = vpop.f32.mrf.mxu0  ;;  %v6339_v21 = vadd.f32 %v8470_v53, %v6193_v51  ;;  %v6933_v51 = vld [vmem:[#allocation10 + $0x30] sm:$0xff] }
 0x92a   : > { %v6556_v49 = vmul.f32 %v12270_v1, %v6538_v26  ;;  %v6537_v42 = vadd.f32 %v6500_v22, %v6480_v48  ;;  %v6483_v44 = vadd.f32 %v8495_v41, %v6337_v47  ;;  %v6315_v37 = vpop.f32.mrf.mxu1  ;;  %vm6547_vm5 = vcmp.gt.f32.partialorder %v6538_v26, 0.0  ;;  %v6932_v41 = vld [vmem:[#allocation10 + $0x28] sm:$0xff] }
 0x92b   : > { %v6451_v28 = vpop.f32.mrf.mxu0  ;;  %v6338_v24 = vadd.f32 %v6315_v37, %v6192_v55 }
 0x92c   : > { %v6555_v60 = vmul.f32 %v12270_v1, %v6537_v42  ;;  %v6540_v17 = vadd.f32 %v6515_v32, %v6483_v44  ;;  %v6482_v18 = vadd.f32 %v6451_v28, %v6336_v25  ;;  %v8473_v39 = vpop.f32.mrf.mxu1  ;;  %vm6546_vm8 = vcmp.gt.f32.partialorder %v6537_v42, 0.0  ;;  %v6530_v2 = vpop.permute.xlu1 %6529  ;;  %v6930_v25 = vld [vmem:[#allocation10 + $0x18] sm:$0xff]  ;;  %v6928_v44 = vld [vmem:[#allocation10 + $0x8] sm:$0xff] }
 0x92d   : > { %v8498_v22 = vpop.f32.mrf.mxu0  ;;  %v6564_v40 = vsel %vm6547_vm5, %v6538_v26, %v6556_v49  ;;  %v6341_v58 = vadd.f32 %v8473_v39, %v6195_v14  ;;  %v6931_v49 = vld [vmem:[#allocation10 + $0x20] sm:$0xff] }
 0x92e   : > { %v6539_v16 = vadd.f32 %v6510_v56, %v6482_v18  ;;  %v6485_v3 = vadd.f32 %v8498_v22, %v6339_v21  ;;  %vm6549_vm9 = vcmp.gt.f32.partialorder %v6540_v17, 0.0  ;;  %v6558_v52 = vmul.f32 %v12270_v1, %v6540_v17  ;;  %v6325_v13 = vpop.f32.mrf.mxu1  ;;  %v6702_v56 = vld [vmem:[%s12354_s9] sm:$0xf]  ;;  %v6844_v21 = vld [vmem:[#allocation8 + $0x38] sm:$0xff]  ;;  %v6841_v22 = vld [vmem:[#allocation8 + $0x20] sm:$0xff] }
 0x92f   : > { %v6461_v59 = vpop.f32.mrf.mxu0  ;;  %v6563_v61 = vsel %vm6546_vm8, %v6537_v42, %v6555_v60  ;;  %v6340_v31 = vadd.f32 %v6325_v13, %v6194_v29  ;;  %8518 = vmatprep.subr.msk.mxu0 %vm6727_vm2, %v6702_v56  ;;  %v6929_v42 = vld [vmem:[#allocation10 + $0x10] sm:$0xff]  ;;  %v6837_v13 = vld [vmem:[#allocation8] sm:$0xff] }
 0x930   : > { %v6557_v45 = vmul.f32 %v12270_v1, %v6539_v16  ;;  %v6542_v4 = vadd.f32 %v6525_v63, %v6485_v3  ;;  %v6484_v38 = vadd.f32 %v6461_v59, %v6338_v24  ;;  %8506 = vmatprep.mubr.msk.f32.mxu1 %vm716_vm0, %v6563_v61  ;;  %vm6548_vm10 = vcmp.gt.f32.partialorder %v6539_v16, 0.0  ;;  %8519 = vmatpush3.msk.msra.mxu0 %vm6727_vm2, %v6702_v56  ;;  %v6843_v18 = vld [vmem:[#allocation8 + $0x30] sm:$0xff]  ;;  %v6842_v63 = vld [vmem:[#allocation8 + $0x28] sm:$0xff] }
 0x931   : > { %8507 = vmatmul.mubr.msk.f32.vlgmr.msra.gmra.mxu1 %vm716_vm0, %v6564_v40  ;;  %v8501_v20 = vpop.f32.mrf.mxu0  ;;  %v6566_v43 = vsel %vm6549_vm9, %v6540_v17, %v6558_v52  ;;  %8551 = vmatprep.subr.mxu0 %v12622_v30  ;;  %v6840_v40 = vld [vmem:[#allocation8 + $0x18] sm:$0xff]  ;;  %v6838_v52 = vld [vmem:[#allocation8 + $0x8] sm:$0xff] }
 0x932   : > { %v6541_v23 = vadd.f32 %v6520_v46, %v6484_v38  ;;  %v6487_v57 = vadd.f32 %v8501_v20, %v6341_v58  ;;  %v6560_v33 = vmul.f32 %v12270_v1, %v6542_v4  ;;  %v6565_v6 = vsel %vm6548_vm10, %v6539_v16, %v6557_v45  ;;  %v6839_v16 = vld [vmem:[#allocation8 + $0x10] sm:$0xff] }
 0x933   : > { %v6471_v11 = vpop.f32.mrf.mxu0  ;;  %8509 = vmatprep.mubr.msk.f32.mxu1 %vm716_vm0, %v6565_v6  ;;  %vm6551_vm12 = vcmp.gt.f32.partialorder %v6542_v4, 0.0  ;;  %v6836_v45 = vld [vmem:[%s12356_s11] sm:$0xf] }
 0x934   : > { %v6559_v50 = vmul.f32 %v12270_v1, %v6541_v23  ;;  %v6544_v10 = vadd.f32 %v6535_v19, %v6487_v57  ;;  %v6486_v5 = vadd.f32 %v6471_v11, %v6340_v31  ;;  %vm6550_vm11 = vcmp.gt.f32.partialorder %v6541_v23, 0.0  ;;  %v7566_v31 = vld [vmem:[%s12358_s13] ss:$0 sm:$0xff] }
 0x935   : > { %8510 = vmatmul.mubr.msk.f32.gmra.mxu1 %vm716_vm0, %v6566_v43  ;;  %v6568_v8 = vsel %vm6551_vm12, %v6542_v4, %v6560_v33  ;;  %v6927_v4 = vld [vmem:[#allocation10] sm:$0xff]  ;;  %v7568_v33 = vld [vmem:[%s12359_s14] ss:$0 sm:$0xff] }
 0x936   : > { %v6543_v12 = vadd.f32 %v6530_v2, %v6486_v5  ;;  %v6567_v62 = vsel %vm6550_vm11, %v6541_v23, %v6559_v50  ;;  %v6562_v15 = vmul.f32 %v12270_v1, %v6544_v10  ;;  %vm6553_vm14 = vcmp.gt.f32.partialorder %v6544_v10, 0.0  ;;  %v6939_v23 = vpop.permute.xlu1 %6938  ;;  %v7569_v6 = vld [vmem:[%s12360_s15] ss:$0 sm:$0xff] }
 0x937   : > { %8512 = vmatprep.mubr.msk.f32.mxu1 %vm716_vm0, %v6567_v62  ;;  %v6947_v57 = vmul.f32 %v7566_v31, %v6939_v23 }
 0x938   : > { %v6561_v32 = vmul.f32 %v12270_v1, %v6543_v12  ;;  %vm6552_vm13 = vcmp.gt.f32.partialorder %v6543_v12, 0.0  ;;  %v6570_v7 = vsel %vm6553_vm14, %v6544_v10, %v6562_v15 }
 0x939   : > { %8513 = vmatmul.mubr.msk.f32.gmra.mxu1 %vm716_vm0, %v6568_v8 }
 0x93a   : > { %v6569_v54 = vsel %vm6552_vm13, %v6543_v12, %v6561_v32 }
 0x93b   : > { %8515 = vmatprep.mubr.msk.f32.mxu1 %vm716_vm0, %v6569_v54 }
 0x93d   : > { %8516 = vmatmul.mubr.msk.f32.gmra.mxu1 %vm716_vm0, %v6570_v7  ;;  %vm8861_vm0 = vmmov 0  }
 0x93e   : > { %8548 = vmatprep.mubr.msk.f32.mxu1 %vm8861_vm0, %v12622_v30 }
 0x9f1   : > { %v8508_v1 = vpop.f32.mrf.mxu1 }
 0x9f3   : > { %v6663_v47 = vpop.f32.mrf.mxu1 }
 0x9f4   : > { %8520 = vmatprep.mubr.msk.f32.mxu0 %vm4757_vm15, %v6663_v47 }
 0x9f5   : > { %v8511_v26 = vpop.f32.mrf.mxu1  ;;  %8521 = vmatmul.mubr.msk.f32.vlgmr.msra.gmra.mxu0 %vm4757_vm15, %v8508_v1 }
 0x9f6   : > { %8552 = vmatpush3.msra.mxu0 %v6934_v34 }
 0x9f7   : > { %v6673_v48 = vpop.f32.mrf.mxu1  ;;  %8553 = vmatprep.subr.mxu0 %v12622_v30 }
 0x9f8   : > { %8523 = vmatprep.mubr.msk.f32.mxu0 %vm4757_vm15, %v6673_v48  ;;  %8554 = vmatpush3.msra.mxu0 %v6933_v51 }
 0x9f9   : > { %v8514_v53 = vpop.f32.mrf.mxu1  ;;  %8524 = vmatmul.mubr.msk.f32.gmra.mxu0 %vm4757_vm15, %v8511_v26  ;;  %8555 = vmatprep.subr.mxu0 %v12622_v30 }
 0x9fa   : > { %8556 = vmatpush3.msra.mxu0 %v6932_v41 }
 0x9fb   : > { %v6683_v9 = vpop.f32.mrf.mxu1  ;;  %8557 = vmatprep.subr.mxu0 %v12622_v30 }
 0x9fc   : > { %8526 = vmatprep.mubr.msk.f32.mxu0 %vm4757_vm15, %v6683_v9  ;;  %8558 = vmatpush3.msra.mxu0 %v6931_v49 }
 0x9fd   : > { %v8517_v36 = vpop.f32.mrf.mxu1  ;;  %8527 = vmatmul.mubr.msk.f32.gmra.mxu0 %vm4757_vm15, %v8514_v53  ;;  %8559 = vmatprep.subr.mxu0 %v12622_v30 }
 0x9fe   : > { %8560 = vmatpush3.msra.mxu0 %v6930_v25 }
 0x9ff   : > { %v6693_v0 = vpop.f32.mrf.mxu1  ;;  %8561 = vmatprep.subr.mxu0 %v12622_v30 }
 0xa00   : > { %8529 = vmatprep.mubr.msk.f32.mxu0 %vm4757_vm15, %v6693_v0  ;;  %8562 = vmatpush3.msra.mxu0 %v6929_v42 }
 0xa01   : > { %8530 = vmatmul.mubr.msk.f32.gmra.mxu0 %vm4757_vm15, %v8517_v36  ;;  %8563 = vmatprep.subr.mxu0 %v12622_v30  ;;  %vm7039_vm15 = vcmask 519168  }
 0xa02   : > { %8567 = vmatprep.mubr.msk.f32.mxu0 %vm8861_vm0, %v12622_v30  ;;  %8564 = vmatpush3.msra.mxu0 %v6928_v44 }
 0xa03   : > { %8565 = vmatprep.subr.mxu0 %v12622_v30 }
 0xa04   : > { %8566 = vmatpush3.msra.mxu0 %v6927_v4 }
 0xab5   : > { %v8522_v37 = vpop.f32.mrf.mxu0 }
 0xab6   : > { %v6846_v59 = vmul.f32 %v8522_v37, %v6838_v52 }
 0xab7   : > { %v6797_v27 = vpop.f32.mrf.mxu0 }
 0xab8   : > { %v6845_v61 = vmul.f32 %v6837_v13, %v6797_v27 }
 0xab9   : > { %v8525_v35 = vpop.f32.mrf.mxu0 }
 0xaba   : > { %v6848_v3 = vmul.f32 %v8525_v35, %v6840_v40 }
 0xabb   : > { %v6807_v55 = vpop.f32.mrf.mxu0 }
 0xabc   : > { %v6847_v58 = vmul.f32 %v6839_v16, %v6807_v55 }
 0xabd   : > { %v8528_v28 = vpop.f32.mrf.mxu0 }
 0xabe   : > { %v6850_v46 = vmul.f32 %v8528_v28, %v6842_v63 }
 0xabf   : > { %v6817_v60 = vpop.f32.mrf.mxu0 }
 0xac0   : > { %v6849_v24 = vmul.f32 %v6841_v22, %v6817_v60 }
 0xac1   : > { %v8531_v17 = vpop.f32.mrf.mxu0 }
 0xac2   : > { %v6852_v39 = vmul.f32 %v8531_v17, %v6844_v21 }
 0xac3   : > { %v6827_v14 = vpop.f32.mrf.mxu0 }
 0xac4   : > { %v6851_v29 = vmul.f32 %v6843_v18, %v6827_v14  ;;  %8533 = vmatpush3.msra.mxu1 %v6852_v39 }
 0xac5   : > { %8534 = vmatprep.subr.mxu1 %v12622_v30 }
 0xac6   : > { %8535 = vmatpush3.msra.mxu1 %v6851_v29 }
 0xac7   : > { %8536 = vmatprep.subr.mxu1 %v12622_v30 }
 0xac8   : > { %8537 = vmatpush3.msra.mxu1 %v6850_v46 }
 0xac9   : > { %8538 = vmatprep.subr.mxu1 %v12622_v30 }
 0xaca   : > { %8539 = vmatpush3.msra.mxu1 %v6849_v24 }
 0xacb   : > { %8540 = vmatprep.subr.mxu1 %v12622_v30 }
 0xacc   : > { %8541 = vmatpush3.msra.mxu1 %v6848_v3 }
 0xacd   : > { %8542 = vmatprep.subr.mxu1 %v12622_v30 }
 0xace   : > { %8543 = vmatpush3.msra.mxu1 %v6847_v58 }
 0xacf   : > { %8544 = vmatprep.subr.mxu1 %v12622_v30 }
 0xad0   : > { %8545 = vmatpush3.msra.mxu1 %v6846_v59 }
 0xad1   : > { %8546 = vmatprep.subr.mxu1 %v12622_v30 }
 0xad2   : > { %8547 = vmatpush3.msra.mxu1 %v6845_v61 }
 0xad3   : > { %8549 = vmatmul.mubr.msk.f32.vlgmr.msra.gmra.mxu1 %vm3137_vm1, %v6836_v45 }
 0xb93   : > { %v6922_v38 = vpop.f32.mrf.mxu1 }
 0xb94   : > { %8568 = vmatmul.mubr.msk.f32.vlgmr.msra.gmra.mxu0 %vm3137_vm1, %v6922_v38 }
 0xb95   : > { %v8550_v20 = vpop.f32.mrf.mxu1 }
 0xc54   : > { %v7017_v19 = vpop.f32.mrf.mxu0 }
 0xc55   : > { %v7018_v11 = vadd.f32 %v7017_v19, %v6947_v57 }
 0xc56   : > { %v8569_v43 = vpop.f32.mrf.mxu0 }
 0xc57   : > { %v7028_v50 = vadd.f32 %v7568_v33, %v7018_v11 }
 0xc59   : > { %vm7029_vm1 = vcmp.gt.f32.partialorder %v7028_v50, 0.0  ;;  %v7037_v10 = vmul.f32 %v7569_v6, %v7028_v50 }
 0xc5b   : > { %v7038_v5 = vsel %vm7029_vm1, %v7028_v50, %v7037_v10 }
 0xc5c   : > { %7040 = vst.msk [vmem:[%s655_s19] sm:$0xf] %vm7039_vm15, %v7038_v5 }
 0xc5d PF: > { %s31_s24 = sadd.s32 1, %s8833_s24  }
 0xc5e   : > { %p28_p5 = scmp.ge.s32.totalorder %s31_s24, 4  }
 0xc60   :  { %30 = sbr.rel (!%p28_p5) target bundleno = 8 (0x8), region = 173 }
 0xc65   :  { %7060 = vsyncpa [#allocation3], 1 }
 0xc66   :  { %7062 = vsyncpa [#allocation3 + $0x1], 1 }
 0xc67   :  { %7063 = vsyncpa [#allocation6], 1 }
 0xc68   :  { %7064 = vsyncpa [#allocation9], 1 }
 0xc69   :  { %7065 = vsyncpa [#allocation4], 1 }
 0xc6a   :  { %7067 = vsyncpa [#allocation4 + $0x1], 1 }

</bundles_post_ra>
